<compile_context>
chip_gen: v7x
topology: tpu7x:2x2x1
jax: 0.10.0
libtpu: 0.0.40
codegen_flags: <defaults>
</compile_context>

<pallas_src>
import math

import jax
import jax.numpy as jnp
from jax.experimental import pallas as pl
from jax.experimental.pallas import tpu as pltpu

D_MODEL = 64          # d_model (single head: num_heads=1, downsample_rate=1)
D_FF = 128            # dim_feedforward
NUM_LAYERS = 2
SEQ_LEN = 16          # current tokens -> 4x4 axial RoPE grid (perfect square)
MEM_LEN = 32          # memory tokens -> multiple of SEQ_LEN (rope_k_repeat=True)
BATCH = 2
EPS = 1e-5
POS_ENC_AT_INPUT = True
ROPE_THETA = 10000.0

V64_PER_LAYER = 10    # rows per layer in the packed (rows, 1, 64) vector slab
# vec64 row layout per layer: 0 ln1_g, 1 ln1_b, 2 ln2_g, 3 ln2_b, 4 ln3_g, 5 ln3_b,
#                             6 sa_out_b, 7 ca_v_b, 8 ca_out_b, 9 ff2_b
# final rows: 10*L -> final norm gamma, 10*L+1 -> final norm beta


# ------------------------------ fused Pallas kernel ------------------------------
def _memory_attention_kernel(
    x_ref, memk_ref, memv_ref, cosm_ref, sinm_ref,
    w_qkv_ref, sa_b_ref, w128_ref, b128_ref, w_sq_ref, w_ff2_ref, vec64_ref,
    o_ref,
):
    f32 = jnp.float32
    D = D_MODEL
    BS = BATCH * SEQ_LEN
    scale = 1.0 / math.sqrt(D)

    tgt = x_ref[...].astype(f32)        # (B*S, D)   = curr (+ 0.1*curr_pos)
    memk = memk_ref[...].astype(f32)    # (B*M, D)   = memory + memory_pos
    memv = memv_ref[...].astype(f32)    # (B*M, D)   = memory
    cosm = cosm_ref[...]                # (B*M, D)   interleave-duplicated cos
    sinm = sinm_ref[...]                # (B*M, D)   interleaved, sign-baked sin
    cosq = cosm[0:BS, :]                # query-length table = leading rows (rope_k_repeat)
    sinq = sinm[0:BS, :]

    def ln(x, g, b):
        mu = jnp.mean(x, axis=-1, keepdims=True)
        var = jnp.mean(jnp.square(x - mu), axis=-1, keepdims=True)
        return (x - mu) * jax.lax.rsqrt(var + EPS) * g + b

    def attend(q, k, v, nq, nk):
        # q: (B*nq, D); k, v: (B*nk, D).  Per-batch static sublane slices (B=2, unrolled).
        outs = []
        for b in range(BATCH):
            qb = q[b * nq:(b + 1) * nq, :]
            kb = k[b * nk:(b + 1) * nk, :]
            vb = v[b * nk:(b + 1) * nk, :]
            s = jax.lax.dot_general(
                qb, kb, (((1,), (1,)), ((), ())),
                preferred_element_type=f32) * scale        # (nq, nk)
            s = s - jnp.max(s, axis=-1, keepdims=True)
            p = jnp.exp(s)
            p = p * pl.reciprocal(jnp.sum(p, axis=-1, keepdims=True), approx=True)
            outs.append(jnp.dot(p, vb, preferred_element_type=f32))
        return jnp.concatenate(outs, axis=0)               # (B*nq, D)

    for l in range(NUM_LAYERS):
        vrow = V64_PER_LAYER * l
        brow = 3 * l

        # ---------------- self attention (pre-LN, RoPE on q and k) ----------------
        t2 = ln(tgt, vec64_ref[vrow + 0], vec64_ref[vrow + 1])
        qkv = jnp.dot(t2, w_qkv_ref[l], preferred_element_type=f32) + sa_b_ref[l]
        # packed columns: [q | q_swapped | k | k_swapped | v]
        qr = qkv[:, 0 * D:1 * D] * cosq + qkv[:, 1 * D:2 * D] * sinq
        kr = qkv[:, 2 * D:3 * D] * cosq + qkv[:, 3 * D:4 * D] * sinq
        v = qkv[:, 4 * D:5 * D]
        at = attend(qr, kr, v, SEQ_LEN, SEQ_LEN)
        tgt = tgt + jnp.dot(at, w_sq_ref[l, 0], preferred_element_type=f32) + vec64_ref[vrow + 6]

        # ------------- cross attention (k = memory+pos w/ repeated RoPE) ----------
        t2 = ln(tgt, vec64_ref[vrow + 2], vec64_ref[vrow + 3])
        qq = jnp.dot(t2, w128_ref[l, 0], preferred_element_type=f32) + b128_ref[brow + 0]
        kk = jnp.dot(memk, w128_ref[l, 1], preferred_element_type=f32) + b128_ref[brow + 1]
        vv = jnp.dot(memv, w_sq_ref[l, 1], preferred_element_type=f32) + vec64_ref[vrow + 7]
        qr = qq[:, :D] * cosq + qq[:, D:] * sinq
        kr = kk[:, :D] * cosm + kk[:, D:] * sinm
        at = attend(qr, kr, vv, SEQ_LEN, MEM_LEN)
        tgt = tgt + jnp.dot(at, w_sq_ref[l, 2], preferred_element_type=f32) + vec64_ref[vrow + 8]

        # ------------------------------ feed-forward -------------------------------
        t2 = ln(tgt, vec64_ref[vrow + 4], vec64_ref[vrow + 5])
        h = jnp.maximum(
            jnp.dot(t2, w128_ref[l, 2], preferred_element_type=f32) + b128_ref[brow + 2], 0.0)
        tgt = tgt + jnp.dot(h, w_ff2_ref[l], preferred_element_type=f32) + vec64_ref[vrow + 9]

    o_ref[...] = ln(tgt, vec64_ref[V64_PER_LAYER * NUM_LAYERS],
                    vec64_ref[V64_PER_LAYER * NUM_LAYERS + 1]).astype(o_ref.dtype)


def _full_spec(a):
    rank = a.ndim
    return pl.BlockSpec(a.shape, lambda *_: (0,) * rank)


# ----------------------------- RoPE tables (host glue) -----------------------------
def compute_axial_rope_tables(dim, end_x, end_y, theta=ROPE_THETA):
    """cos/sin of SAM2 compute_axial_cis angles; shape (end_x*end_y, dim//2)."""
    freqs = 1.0 / (theta ** (jnp.arange(0, dim, 4)[: dim // 4].astype(jnp.float32) / dim))
    t = jnp.arange(end_x * end_y, dtype=jnp.float32)
    t_x = t % end_x
    t_y = jnp.floor(t / end_x)
    ang = jnp.concatenate([jnp.outer(t_x, freqs), jnp.outer(t_y, freqs)], axis=-1)
    return jnp.cos(ang), jnp.sin(ang)


def build_rope_tables():
    """Full-width, batch-tiled cos / signed-sin tables (memory length only)."""
    side = int(round(math.sqrt(SEQ_LEN)))
    cos, sin = compute_axial_rope_tables(D_MODEL, side, side)           # (S, D/2)
    sign = jnp.tile(jnp.array([-1.0, 1.0], jnp.float32), D_MODEL // 2)  # (-,+,-,+,...)
    cos_f = jnp.repeat(cos, 2, axis=-1)                                 # (S, D)
    sin_f = jnp.repeat(sin, 2, axis=-1) * sign                          # (S, D) signed
    rep = MEM_LEN // SEQ_LEN                                            # rope_k_repeat
    cosm = jnp.tile(cos_f, (BATCH * rep, 1))                            # (B*M, D)
    sinm = jnp.tile(sin_f, (BATCH * rep, 1))
    return cosm, sinm


# ---------------------------- weight packing (host glue) ---------------------------
def pack_params(params):
    """Concatenate / stack per-layer weights into a few VMEM slabs (runs once)."""
    perm = jnp.arange(D_MODEL, dtype=jnp.int32) ^ 1   # pairwise swap 0<->1, 2<->3, ...

    def fold_w(w):   # (D, X) -> (D, 2X): [W | W with pair-swapped output columns]
        return jnp.concatenate([w, w[:, perm]], axis=1)

    def fold_b(b):
        return jnp.concatenate([b, b[perm]], axis=0)

    w_qkv, sa_b, w128, b128, w_sq, w_ff2, vec64 = [], [], [], [], [], [], []
    for lp in params["layers"]:
        sa, ca = lp["self_attn"], lp["cross_attn"]
        w_qkv.append(jnp.concatenate(
            [fold_w(sa["q"]["w"]), fold_w(sa["k"]["w"]), sa["v"]["w"]], axis=1))   # (64,320)
        sa_b.append(jnp.concatenate(
            [fold_b(sa["q"]["b"]), fold_b(sa["k"]["b"]), sa["v"]["b"]])[None, :])  # (1,320)
        w128.append(jnp.stack(
            [fold_w(ca["q"]["w"]), fold_w(ca["k"]["w"]), lp["lin1"]["w"]]))        # (3,64,128)
        b128.extend([fold_b(ca["q"]["b"])[None, :],
                     fold_b(ca["k"]["b"])[None, :],
                     lp["lin1"]["b"][None, :]])                                    # 3 x (1,128)
        w_sq.append(jnp.stack([sa["o"]["w"], ca["v"]["w"], ca["o"]["w"]]))         # (3,64,64)
        w_ff2.append(lp["lin2"]["w"])                                              # (128,64)
        vec64.extend([lp["norm1"]["g"][None, :], lp["norm1"]["b"][None, :],
                      lp["norm2"]["g"][None, :], lp["norm2"]["b"][None, :],
                      lp["norm3"]["g"][None, :], lp["norm3"]["b"][None, :],
                      sa["o"]["b"][None, :], ca["v"]["b"][None, :],
                      ca["o"]["b"][None, :], lp["lin2"]["b"][None, :]])            # 10 x (1,64)
    vec64.extend([params["norm"]["g"][None, :], params["norm"]["b"][None, :]])

    cosm, sinm = build_rope_tables()
    return {
        "w_qkv": jnp.stack(w_qkv),     # (L, 64, 320)
        "sa_b": jnp.stack(sa_b),       # (L, 1, 320)
        "w128": jnp.stack(w128),       # (L, 3, 64, 128)   [ca_q | ca_k | ff1]
        "b128": jnp.stack(b128),       # (3L, 1, 128)
        "w_sq": jnp.stack(w_sq),       # (L, 3, 64, 64)    [sa_out | ca_v | ca_out]
        "w_ff2": jnp.stack(w_ff2),     # (L, 128, 64)
        "vec64": jnp.stack(vec64),     # (10L+2, 1, 64)    LN params + 64-wide biases
        "cosm": cosm, "sinm": sinm,    # (B*M, 64) each
    }


# ------------------------------ MemoryAttention forward ----------------------------
@jax.jit
def memory_attention_forward(curr, memory, curr_pos, memory_pos, packed):
    # curr/curr_pos: (S, B, D); memory/memory_pos: (M, B, D) — seq-first as in PyTorch.
    S, B, D = curr.shape
    M = memory.shape[0]

    x = curr
    if POS_ENC_AT_INPUT:
        x = x + 0.1 * curr_pos                       # pos_enc_at_input
    # batch_first=True -> transpose(0,1); flatten to row-major (B*S, D) slabs.
    x2d = jnp.swapaxes(x, 0, 1).reshape(B * S, D)
    memv2d = jnp.swapaxes(memory, 0, 1).reshape(B * M, D)
    memk2d = jnp.swapaxes(memory + memory_pos, 0, 1).reshape(B * M, D)  # pos_enc_at_cross_attn_keys

    args = (
        x2d, memk2d, memv2d, packed["cosm"], packed["sinm"],
        packed["w_qkv"], packed["sa_b"], packed["w128"], packed["b128"],
        packed["w_sq"], packed["w_ff2"], packed["vec64"],
    )

    out2d = pl.pallas_call(
        _memory_attention_kernel,
        out_shape=jax.ShapeDtypeStruct((B * S, D), curr.dtype),
        grid=(1,),
        in_specs=[_full_spec(a) for a in args],
        out_specs=pl.BlockSpec((B * S, D), lambda i: (0, 0)),
        compiler_params=pltpu.CompilerParams(
            dimension_semantics=("arbitrary",)),       # tiny workload: keep on one TC
    )(*args)

    return jnp.swapaxes(out2d.reshape(B, S, D), 0, 1)  # back to (S, B, D)


# ------------------------------ pure-JAX reference ---------------------------------
def memory_attention_reference(curr, memory, curr_pos, memory_pos, params):
    S, B, D = curr.shape
    M = memory.shape[0]
    side = int(round(math.sqrt(S)))
    cos, sin = compute_axial_rope_tables(D, side, side)            # (S, D//2)
    cos_m, sin_m = jnp.tile(cos, (M // S, 1)), jnp.tile(sin, (M // S, 1))
    scale = 1.0 / math.sqrt(D)

    def ln(x, g, b):
        mu = jnp.mean(x, -1, keepdims=True)
        var = jnp.mean((x - mu) ** 2, -1, keepdims=True)
        return (x - mu) / jnp.sqrt(var + EPS) * g + b

    def rope(x, c, s):                                             # x: (B, N, D)
        xr, xi = x[..., 0::2], x[..., 1::2]
        return jnp.stack([xr * c - xi * s, xi * c + xr * s], axis=-1).reshape(x.shape)

    def attn(q, k, v):
        p = jax.nn.softmax(jnp.einsum("bqd,bkd->bqk", q, k) * scale, axis=-1)
        return jnp.einsum("bqk,bkd->bqd", p, v)

    def lin(x, p):
        return x @ p["w"] + p["b"]

    out = curr + 0.1 * curr_pos if POS_ENC_AT_INPUT else curr
    out = jnp.swapaxes(out, 0, 1)
    mem = jnp.swapaxes(memory, 0, 1)
    memk = jnp.swapaxes(memory + memory_pos, 0, 1)

    for lp in params["layers"]:
        sa, ca = lp["self_attn"], lp["cross_attn"]
        t2 = ln(out, lp["norm1"]["g"], lp["norm1"]["b"])
        out = out + lin(attn(rope(lin(t2, sa["q"]), cos, sin),
                             rope(lin(t2, sa["k"]), cos, sin),
                             lin(t2, sa["v"])), sa["o"])
        t2 = ln(out, lp["norm2"]["g"], lp["norm2"]["b"])
        out = out + lin(attn(rope(lin(t2, ca["q"]), cos, sin),
                             rope(lin(memk, ca["k"]), cos_m, sin_m),
                             lin(mem, ca["v"])), ca["o"])
        t2 = ln(out, lp["norm3"]["g"], lp["norm3"]["b"])
        out = out + lin(jax.nn.relu(lin(t2, lp["lin1"])), lp["lin2"])

    out = ln(out, params["norm"]["g"], params["norm"]["b"])
    return jnp.swapaxes(out, 0, 1)


# ------------------------------------ parameters -----------------------------------
def init_params(key):
    # torch.nn.Linear(in,out) default init; weights stored as (in, out) so y = x @ W + b.
    def linear_init(k, fan_in, fan_out):
        kw, kb = jax.random.split(k)
        bound = 1.0 / math.sqrt(fan_in)
        return {"w": jax.random.uniform(kw, (fan_in, fan_out), jnp.float32, -bound, bound),
                "b": jax.random.uniform(kb, (fan_out,), jnp.float32, -bound, bound)}

    def ln_init():
        return {"g": jnp.ones((D_MODEL,), jnp.float32), "b": jnp.zeros((D_MODEL,), jnp.float32)}

    def attn_init(k):
        kq, kk, kv, ko = jax.random.split(k, 4)
        return {"q": linear_init(kq, D_MODEL, D_MODEL),
                "k": linear_init(kk, D_MODEL, D_MODEL),
                "v": linear_init(kv, D_MODEL, D_MODEL),
                "o": linear_init(ko, D_MODEL, D_MODEL)}

    ks = jax.random.split(key, 5)
    # MemoryAttention copy.deepcopy's the prototype layer -> every layer starts with the
    # SAME initial weights; replicate that behavior here.
    proto = {
        "self_attn": attn_init(ks[0]),
        "cross_attn": attn_init(ks[1]),
        "lin1": linear_init(ks[2], D_MODEL, D_FF),
        "lin2": linear_init(ks[3], D_FF, D_MODEL),
        "norm1": ln_init(), "norm2": ln_init(), "norm3": ln_init(),
    }
    layers = [jax.tree_util.tree_map(lambda x: x, proto) for _ in range(NUM_LAYERS)]
    return {"layers": layers, "norm": ln_init()}


if __name__ == "__main__":
    key = jax.random.PRNGKey(0)
    k1, k2, k3, k4, kp = jax.random.split(key, 5)
    curr = jax.random.normal(k1, (SEQ_LEN, BATCH, D_MODEL), jnp.float32)
    memory = jax.random.normal(k2, (MEM_LEN, BATCH, D_MODEL), jnp.float32)
    curr_pos = jax.random.normal(k3, (SEQ_LEN, BATCH, D_MODEL), jnp.float32)
    memory_pos = jax.random.normal(k4, (MEM_LEN, BATCH, D_MODEL), jnp.float32)

    params = init_params(kp)
    packed = jax.tree_util.tree_map(jax.block_until_ready, pack_params(params))

    out = memory_attention_forward(curr, memory, curr_pos, memory_pos, packed)
    out = jax.block_until_ready(out)
    assert out.shape == (SEQ_LEN, BATCH, D_MODEL)
    assert bool(jnp.all(jnp.isfinite(out)))

    # Pure-JAX reference check (loose tolerance: approx-reciprocal softmax in-kernel).
    ref = memory_attention_reference(curr, memory, curr_pos, memory_pos, params)
    max_err = float(jnp.max(jnp.abs(out - ref)))
    assert max_err < 5e-2, f"kernel vs reference mismatch: {max_err}"

    print("KERNEL_OK")
</pallas_src>

<mosaic_0001>
module attributes {stable_mosaic.version = 11 : i64} {
  func.func @_memory_attention_kernel(%arg0: i32, %arg1: memref<32x64xf32, #tpu.memory_space<vmem>>, %arg2: memref<64x64xf32, #tpu.memory_space<vmem>>, %arg3: memref<64x64xf32, #tpu.memory_space<vmem>>, %arg4: memref<64x64xf32, #tpu.memory_space<vmem>>, %arg5: memref<64x64xf32, #tpu.memory_space<vmem>>, %arg6: memref<2x64x320xf32, #tpu.memory_space<vmem>>, %arg7: memref<2x1x320xf32, #tpu.memory_space<vmem>>, %arg8: memref<2x3x64x128xf32, #tpu.memory_space<vmem>>, %arg9: memref<6x1x128xf32, #tpu.memory_space<vmem>>, %arg10: memref<2x3x64x64xf32, #tpu.memory_space<vmem>>, %arg11: memref<2x128x64xf32, #tpu.memory_space<vmem>>, %arg12: memref<22x1x64xf32, #tpu.memory_space<vmem>>, %arg13: memref<32x64xf32, #tpu.memory_space<vmem>>) attributes {dimension_semantics = [#tpu.dimension_semantics<arbitrary>], iteration_bounds = array<i64: 1>, scalar_prefetch = 0 : i64, scratch_operands = 0 : i64, tpu.core_type = #tpu.core_type<tc>, window_params = [{pipeline_mode = #tpu.pipeline_mode<synchronous>, transform_indices = @transform_0, window_bounds = array<i64: 32, 64>}, {pipeline_mode = #tpu.pipeline_mode<synchronous>, transform_indices = @transform_1, window_bounds = array<i64: 64, 64>}, {pipeline_mode = #tpu.pipeline_mode<synchronous>, transform_indices = @transform_2, window_bounds = array<i64: 64, 64>}, {pipeline_mode = #tpu.pipeline_mode<synchronous>, transform_indices = @transform_3, window_bounds = array<i64: 64, 64>}, {pipeline_mode = #tpu.pipeline_mode<synchronous>, transform_indices = @transform_4, window_bounds = array<i64: 64, 64>}, {pipeline_mode = #tpu.pipeline_mode<synchronous>, transform_indices = @transform_5, window_bounds = array<i64: 2, 64, 320>}, {pipeline_mode = #tpu.pipeline_mode<synchronous>, transform_indices = @transform_6, window_bounds = array<i64: 2, 1, 320>}, {pipeline_mode = #tpu.pipeline_mode<synchronous>, transform_indices = @transform_7, window_bounds = array<i64: 2, 3, 64, 128>}, {pipeline_mode = #tpu.pipeline_mode<synchronous>, transform_indices = @transform_8, window_bounds = array<i64: 6, 1, 128>}, {pipeline_mode = #tpu.pipeline_mode<synchronous>, transform_indices = @transform_9, window_bounds = array<i64: 2, 3, 64, 64>}, {pipeline_mode = #tpu.pipeline_mode<synchronous>, transform_indices = @transform_10, window_bounds = array<i64: 2, 128, 64>}, {pipeline_mode = #tpu.pipeline_mode<synchronous>, transform_indices = @transform_11, window_bounds = array<i64: 22, 1, 64>}, {pipeline_mode = #tpu.pipeline_mode<synchronous>, transform_indices = @transform_12, window_bounds = array<i64: 32, 64>}]} {
    %c0 = arith.constant 0 : index
    %c0_0 = arith.constant 0 : index
    %0 = vector.load %arg1[%c0, %c0_0] : memref<32x64xf32, #tpu.memory_space<vmem>>, vector<32x64xf32>
    %c0_1 = arith.constant 0 : index
    %c0_2 = arith.constant 0 : index
    %1 = vector.load %arg2[%c0_1, %c0_2] : memref<64x64xf32, #tpu.memory_space<vmem>>, vector<64x64xf32>
    %c0_3 = arith.constant 0 : index
    %c0_4 = arith.constant 0 : index
    %2 = vector.load %arg3[%c0_3, %c0_4] : memref<64x64xf32, #tpu.memory_space<vmem>>, vector<64x64xf32>
    %c0_5 = arith.constant 0 : index
    %c0_6 = arith.constant 0 : index
    %3 = vector.load %arg4[%c0_5, %c0_6] : memref<64x64xf32, #tpu.memory_space<vmem>>, vector<64x64xf32>
    %c0_7 = arith.constant 0 : index
    %c0_8 = arith.constant 0 : index
    %4 = vector.load %arg5[%c0_7, %c0_8] : memref<64x64xf32, #tpu.memory_space<vmem>>, vector<64x64xf32>
    %5 = vector.extract_strided_slice %3 {offsets = [0, 0], sizes = [32, 64], strides = [1, 1]} : vector<64x64xf32> to vector<32x64xf32>
    %6 = vector.extract_strided_slice %4 {offsets = [0, 0], sizes = [32, 64], strides = [1, 1]} : vector<64x64xf32> to vector<32x64xf32>
    %c0_9 = arith.constant 0 : index
    %c0_10 = arith.constant 0 : index
    %c0_11 = arith.constant 0 : index
    %7 = vector.load %arg12[%c0_9, %c0_10, %c0_11] : memref<22x1x64xf32, #tpu.memory_space<vmem>>, vector<1x1x64xf32>
    %8 = vector.shape_cast %7 : vector<1x1x64xf32> to vector<1x64xf32>
    %c1 = arith.constant 1 : index
    %c0_12 = arith.constant 0 : index
    %c0_13 = arith.constant 0 : index
    %9 = vector.load %arg12[%c1, %c0_12, %c0_13] : memref<22x1x64xf32, #tpu.memory_space<vmem>>, vector<1x1x64xf32>
    %10 = vector.shape_cast %9 : vector<1x1x64xf32> to vector<1x64xf32>
    %cst = arith.constant dense<0.000000e+00> : vector<32xf32>
    %11 = vector.multi_reduction <add>, %0, %cst [1] : vector<32x64xf32> to vector<32xf32>
    %12 = vector.shape_cast %11 : vector<32xf32> to vector<32x1xf32>
    %cst_14 = arith.constant 6.400000e+01 : f32
    %13 = vector.broadcast %cst_14 : f32 to vector<32x1xf32>
    %14 = arith.divf %12, %13 : vector<32x1xf32>
    %15 = vector.broadcast %14 : vector<32x1xf32> to vector<32x64xf32>
    %16 = arith.subf %0, %15 : vector<32x64xf32>
    %17 = arith.mulf %16, %16 : vector<32x64xf32>
    %cst_15 = arith.constant dense<0.000000e+00> : vector<32xf32>
    %18 = vector.multi_reduction <add>, %17, %cst_15 [1] : vector<32x64xf32> to vector<32xf32>
    %19 = vector.shape_cast %18 : vector<32xf32> to vector<32x1xf32>
    %cst_16 = arith.constant 6.400000e+01 : f32
    %20 = vector.broadcast %cst_16 : f32 to vector<32x1xf32>
    %21 = arith.divf %19, %20 : vector<32x1xf32>
    %22 = vector.broadcast %14 : vector<32x1xf32> to vector<32x64xf32>
    %23 = arith.subf %0, %22 : vector<32x64xf32>
    %cst_17 = arith.constant 9.99999974E-6 : f32
    %24 = vector.broadcast %cst_17 : f32 to vector<32x1xf32>
    %25 = arith.addf %21, %24 : vector<32x1xf32>
    %26 = math.rsqrt %25 : vector<32x1xf32>
    %27 = vector.broadcast %26 : vector<32x1xf32> to vector<32x64xf32>
    %28 = arith.mulf %23, %27 : vector<32x64xf32>
    %29 = vector.broadcast %8 : vector<1x64xf32> to vector<32x64xf32>
    %30 = arith.mulf %28, %29 : vector<32x64xf32>
    %31 = vector.broadcast %10 : vector<1x64xf32> to vector<32x64xf32>
    %32 = arith.addf %30, %31 : vector<32x64xf32>
    %c0_18 = arith.constant 0 : index
    %c0_19 = arith.constant 0 : index
    %c0_20 = arith.constant 0 : index
    %33 = vector.load %arg6[%c0_18, %c0_19, %c0_20] : memref<2x64x320xf32, #tpu.memory_space<vmem>>, vector<1x64x320xf32>
    %34 = vector.shape_cast %33 : vector<1x64x320xf32> to vector<64x320xf32>
    %cst_21 = arith.constant dense<0.000000e+00> : vector<32x320xf32>
    %35 = tpu.matmul %32, %34, %cst_21 {dimension_numbers = #tpu.dot_dimension_numbers<[1], [0], [0], [1], [0, 0, 1, 1], [], []>} : vector<32x64xf32>, vector<64x320xf32>, vector<32x320xf32> -> vector<32x320xf32>
    %c0_22 = arith.constant 0 : index
    %c0_23 = arith.constant 0 : index
    %c0_24 = arith.constant 0 : index
    %36 = vector.load %arg7[%c0_22, %c0_23, %c0_24] : memref<2x1x320xf32, #tpu.memory_space<vmem>>, vector<1x1x320xf32>
    %37 = vector.shape_cast %36 : vector<1x1x320xf32> to vector<1x320xf32>
    %38 = vector.broadcast %37 : vector<1x320xf32> to vector<32x320xf32>
    %39 = arith.addf %35, %38 : vector<32x320xf32>
    %40 = vector.extract_strided_slice %39 {offsets = [0, 0], sizes = [32, 64], strides = [1, 1]} : vector<32x320xf32> to vector<32x64xf32>
    %41 = arith.mulf %40, %5 : vector<32x64xf32>
    %42 = vector.extract_strided_slice %39 {offsets = [0, 64], sizes = [32, 64], strides = [1, 1]} : vector<32x320xf32> to vector<32x64xf32>
    %43 = arith.mulf %42, %6 : vector<32x64xf32>
    %44 = arith.addf %41, %43 : vector<32x64xf32>
    %45 = vector.extract_strided_slice %39 {offsets = [0, 128], sizes = [32, 64], strides = [1, 1]} : vector<32x320xf32> to vector<32x64xf32>
    %46 = arith.mulf %45, %5 : vector<32x64xf32>
    %47 = vector.extract_strided_slice %39 {offsets = [0, 192], sizes = [32, 64], strides = [1, 1]} : vector<32x320xf32> to vector<32x64xf32>
    %48 = arith.mulf %47, %6 : vector<32x64xf32>
    %49 = arith.addf %46, %48 : vector<32x64xf32>
    %50 = vector.extract_strided_slice %39 {offsets = [0, 256], sizes = [32, 64], strides = [1, 1]} : vector<32x320xf32> to vector<32x64xf32>
    %51 = vector.extract_strided_slice %44 {offsets = [0, 0], sizes = [16, 64], strides = [1, 1]} : vector<32x64xf32> to vector<16x64xf32>
    %52 = vector.extract_strided_slice %49 {offsets = [0, 0], sizes = [16, 64], strides = [1, 1]} : vector<32x64xf32> to vector<16x64xf32>
    %53 = vector.extract_strided_slice %50 {offsets = [0, 0], sizes = [16, 64], strides = [1, 1]} : vector<32x64xf32> to vector<16x64xf32>
    %cst_25 = arith.constant dense<0.000000e+00> : vector<16x16xf32>
    %54 = tpu.matmul %51, %52, %cst_25 {dimension_numbers = #tpu.dot_dimension_numbers<[1], [1], [0], [0], [0, 0, 1, 0], [], []>} : vector<16x64xf32>, vector<16x64xf32>, vector<16x16xf32> -> vector<16x16xf32>
    %cst_26 = arith.constant 1.250000e-01 : f32
    %55 = vector.broadcast %cst_26 : f32 to vector<16x16xf32>
    %56 = arith.mulf %54, %55 : vector<16x16xf32>
    %cst_27 = arith.constant dense<0xFF800000> : vector<16xf32>
    %57 = vector.multi_reduction <maximumf>, %56, %cst_27 [1] : vector<16x16xf32> to vector<16xf32>
    %58 = vector.shape_cast %57 : vector<16xf32> to vector<16x1xf32>
    %59 = vector.broadcast %58 : vector<16x1xf32> to vector<16x16xf32>
    %60 = arith.subf %56, %59 : vector<16x16xf32>
    %61 = math.exp %60 : vector<16x16xf32>
    %cst_28 = arith.constant dense<0.000000e+00> : vector<16xf32>
    %62 = vector.multi_reduction <add>, %61, %cst_28 [1] : vector<16x16xf32> to vector<16xf32>
    %63 = vector.shape_cast %62 : vector<16xf32> to vector<16x1xf32>
    %64 = tpu.reciprocal %63 {approx = true} : vector<16x1xf32> -> vector<16x1xf32>
    %65 = vector.broadcast %64 : vector<16x1xf32> to vector<16x16xf32>
    %66 = arith.mulf %61, %65 : vector<16x16xf32>
    %cst_29 = arith.constant dense<0.000000e+00> : vector<16x64xf32>
    %67 = tpu.matmul %66, %53, %cst_29 {dimension_numbers = #tpu.dot_dimension_numbers<[1], [0], [0], [1], [0, 0, 1, 1], [], []>} : vector<16x16xf32>, vector<16x64xf32>, vector<16x64xf32> -> vector<16x64xf32>
    %68 = vector.extract_strided_slice %44 {offsets = [16, 0], sizes = [16, 64], strides = [1, 1]} : vector<32x64xf32> to vector<16x64xf32>
    %69 = vector.extract_strided_slice %49 {offsets = [16, 0], sizes = [16, 64], strides = [1, 1]} : vector<32x64xf32> to vector<16x64xf32>
    %70 = vector.extract_strided_slice %50 {offsets = [16, 0], sizes = [16, 64], strides = [1, 1]} : vector<32x64xf32> to vector<16x64xf32>
    %cst_30 = arith.constant dense<0.000000e+00> : vector<16x16xf32>
    %71 = tpu.matmul %68, %69, %cst_30 {dimension_numbers = #tpu.dot_dimension_numbers<[1], [1], [0], [0], [0, 0, 1, 0], [], []>} : vector<16x64xf32>, vector<16x64xf32>, vector<16x16xf32> -> vector<16x16xf32>
    %cst_31 = arith.constant 1.250000e-01 : f32
    %72 = vector.broadcast %cst_31 : f32 to vector<16x16xf32>
    %73 = arith.mulf %71, %72 : vector<16x16xf32>
    %cst_32 = arith.constant dense<0xFF800000> : vector<16xf32>
    %74 = vector.multi_reduction <maximumf>, %73, %cst_32 [1] : vector<16x16xf32> to vector<16xf32>
    %75 = vector.shape_cast %74 : vector<16xf32> to vector<16x1xf32>
    %76 = vector.broadcast %75 : vector<16x1xf32> to vector<16x16xf32>
    %77 = arith.subf %73, %76 : vector<16x16xf32>
    %78 = math.exp %77 : vector<16x16xf32>
    %cst_33 = arith.constant dense<0.000000e+00> : vector<16xf32>
    %79 = vector.multi_reduction <add>, %78, %cst_33 [1] : vector<16x16xf32> to vector<16xf32>
    %80 = vector.shape_cast %79 : vector<16xf32> to vector<16x1xf32>
    %81 = tpu.reciprocal %80 {approx = true} : vector<16x1xf32> -> vector<16x1xf32>
    %82 = vector.broadcast %81 : vector<16x1xf32> to vector<16x16xf32>
    %83 = arith.mulf %78, %82 : vector<16x16xf32>
    %cst_34 = arith.constant dense<0.000000e+00> : vector<16x64xf32>
    %84 = tpu.matmul %83, %70, %cst_34 {dimension_numbers = #tpu.dot_dimension_numbers<[1], [0], [0], [1], [0, 0, 1, 1], [], []>} : vector<16x16xf32>, vector<16x64xf32>, vector<16x64xf32> -> vector<16x64xf32>
    %85 = tpu.concatenate %67, %84 in 0 : vector<16x64xf32>, vector<16x64xf32> -> vector<32x64xf32>
    %c0_35 = arith.constant 0 : index
    %c0_36 = arith.constant 0 : index
    %c0_37 = arith.constant 0 : index
    %c0_38 = arith.constant 0 : index
    %86 = vector.load %arg10[%c0_35, %c0_36, %c0_37, %c0_38] : memref<2x3x64x64xf32, #tpu.memory_space<vmem>>, vector<1x1x64x64xf32>
    %87 = vector.shape_cast %86 : vector<1x1x64x64xf32> to vector<64x64xf32>
    %cst_39 = arith.constant dense<0.000000e+00> : vector<32x64xf32>
    %88 = tpu.matmul %85, %87, %cst_39 {dimension_numbers = #tpu.dot_dimension_numbers<[1], [0], [0], [1], [0, 0, 1, 1], [], []>} : vector<32x64xf32>, vector<64x64xf32>, vector<32x64xf32> -> vector<32x64xf32>
    %89 = arith.addf %0, %88 : vector<32x64xf32>
    %c6 = arith.constant 6 : index
    %c0_40 = arith.constant 0 : index
    %c0_41 = arith.constant 0 : index
    %90 = vector.load %arg12[%c6, %c0_40, %c0_41] : memref<22x1x64xf32, #tpu.memory_space<vmem>>, vector<1x1x64xf32>
    %91 = vector.shape_cast %90 : vector<1x1x64xf32> to vector<1x64xf32>
    %92 = vector.broadcast %91 : vector<1x64xf32> to vector<32x64xf32>
    %93 = arith.addf %89, %92 : vector<32x64xf32>
    %c2 = arith.constant 2 : index
    %c0_42 = arith.constant 0 : index
    %c0_43 = arith.constant 0 : index
    %94 = vector.load %arg12[%c2, %c0_42, %c0_43] : memref<22x1x64xf32, #tpu.memory_space<vmem>>, vector<1x1x64xf32>
    %95 = vector.shape_cast %94 : vector<1x1x64xf32> to vector<1x64xf32>
    %c3 = arith.constant 3 : index
    %c0_44 = arith.constant 0 : index
    %c0_45 = arith.constant 0 : index
    %96 = vector.load %arg12[%c3, %c0_44, %c0_45] : memref<22x1x64xf32, #tpu.memory_space<vmem>>, vector<1x1x64xf32>
    %97 = vector.shape_cast %96 : vector<1x1x64xf32> to vector<1x64xf32>
    %cst_46 = arith.constant dense<0.000000e+00> : vector<32xf32>
    %98 = vector.multi_reduction <add>, %93, %cst_46 [1] : vector<32x64xf32> to vector<32xf32>
    %99 = vector.shape_cast %98 : vector<32xf32> to vector<32x1xf32>
    %cst_47 = arith.constant 6.400000e+01 : f32
    %100 = vector.broadcast %cst_47 : f32 to vector<32x1xf32>
    %101 = arith.divf %99, %100 : vector<32x1xf32>
    %102 = vector.broadcast %101 : vector<32x1xf32> to vector<32x64xf32>
    %103 = arith.subf %93, %102 : vector<32x64xf32>
    %104 = arith.mulf %103, %103 : vector<32x64xf32>
    %cst_48 = arith.constant dense<0.000000e+00> : vector<32xf32>
    %105 = vector.multi_reduction <add>, %104, %cst_48 [1] : vector<32x64xf32> to vector<32xf32>
    %106 = vector.shape_cast %105 : vector<32xf32> to vector<32x1xf32>
    %cst_49 = arith.constant 6.400000e+01 : f32
    %107 = vector.broadcast %cst_49 : f32 to vector<32x1xf32>
    %108 = arith.divf %106, %107 : vector<32x1xf32>
    %109 = vector.broadcast %101 : vector<32x1xf32> to vector<32x64xf32>
    %110 = arith.subf %93, %109 : vector<32x64xf32>
    %cst_50 = arith.constant 9.99999974E-6 : f32
    %111 = vector.broadcast %cst_50 : f32 to vector<32x1xf32>
    %112 = arith.addf %108, %111 : vector<32x1xf32>
    %113 = math.rsqrt %112 : vector<32x1xf32>
    %114 = vector.broadcast %113 : vector<32x1xf32> to vector<32x64xf32>
    %115 = arith.mulf %110, %114 : vector<32x64xf32>
    %116 = vector.broadcast %95 : vector<1x64xf32> to vector<32x64xf32>
    %117 = arith.mulf %115, %116 : vector<32x64xf32>
    %118 = vector.broadcast %97 : vector<1x64xf32> to vector<32x64xf32>
    %119 = arith.addf %117, %118 : vector<32x64xf32>
    %c0_51 = arith.constant 0 : index
    %c0_52 = arith.constant 0 : index
    %c0_53 = arith.constant 0 : index
    %c0_54 = arith.constant 0 : index
    %120 = vector.load %arg8[%c0_51, %c0_52, %c0_53, %c0_54] : memref<2x3x64x128xf32, #tpu.memory_space<vmem>>, vector<1x1x64x128xf32>
    %121 = vector.shape_cast %120 : vector<1x1x64x128xf32> to vector<64x128xf32>
    %cst_55 = arith.constant dense<0.000000e+00> : vector<32x128xf32>
    %122 = tpu.matmul %119, %121, %cst_55 {dimension_numbers = #tpu.dot_dimension_numbers<[1], [0], [0], [1], [0, 0, 1, 1], [], []>} : vector<32x64xf32>, vector<64x128xf32>, vector<32x128xf32> -> vector<32x128xf32>
    %c0_56 = arith.constant 0 : index
    %c0_57 = arith.constant 0 : index
    %c0_58 = arith.constant 0 : index
    %123 = vector.load %arg9[%c0_56, %c0_57, %c0_58] : memref<6x1x128xf32, #tpu.memory_space<vmem>>, vector<1x1x128xf32>
    %124 = vector.shape_cast %123 : vector<1x1x128xf32> to vector<1x128xf32>
    %125 = vector.broadcast %124 : vector<1x128xf32> to vector<32x128xf32>
    %126 = arith.addf %122, %125 : vector<32x128xf32>
    %c0_59 = arith.constant 0 : index
    %c1_60 = arith.constant 1 : index
    %c0_61 = arith.constant 0 : index
    %c0_62 = arith.constant 0 : index
    %127 = vector.load %arg8[%c0_59, %c1_60, %c0_61, %c0_62] : memref<2x3x64x128xf32, #tpu.memory_space<vmem>>, vector<1x1x64x128xf32>
    %128 = vector.shape_cast %127 : vector<1x1x64x128xf32> to vector<64x128xf32>
    %cst_63 = arith.constant dense<0.000000e+00> : vector<64x128xf32>
    %129 = tpu.matmul %1, %128, %cst_63 {dimension_numbers = #tpu.dot_dimension_numbers<[1], [0], [0], [1], [0, 0, 1, 1], [], []>} : vector<64x64xf32>, vector<64x128xf32>, vector<64x128xf32> -> vector<64x128xf32>
    %c1_64 = arith.constant 1 : index
    %c0_65 = arith.constant 0 : index
    %c0_66 = arith.constant 0 : index
    %130 = vector.load %arg9[%c1_64, %c0_65, %c0_66] : memref<6x1x128xf32, #tpu.memory_space<vmem>>, vector<1x1x128xf32>
    %131 = vector.shape_cast %130 : vector<1x1x128xf32> to vector<1x128xf32>
    %132 = vector.broadcast %131 : vector<1x128xf32> to vector<64x128xf32>
    %133 = arith.addf %129, %132 : vector<64x128xf32>
    %c0_67 = arith.constant 0 : index
    %c1_68 = arith.constant 1 : index
    %c0_69 = arith.constant 0 : index
    %c0_70 = arith.constant 0 : index
    %134 = vector.load %arg10[%c0_67, %c1_68, %c0_69, %c0_70] : memref<2x3x64x64xf32, #tpu.memory_space<vmem>>, vector<1x1x64x64xf32>
    %135 = vector.shape_cast %134 : vector<1x1x64x64xf32> to vector<64x64xf32>
    %cst_71 = arith.constant dense<0.000000e+00> : vector<64x64xf32>
    %136 = tpu.matmul %2, %135, %cst_71 {dimension_numbers = #tpu.dot_dimension_numbers<[1], [0], [0], [1], [0, 0, 1, 1], [], []>} : vector<64x64xf32>, vector<64x64xf32>, vector<64x64xf32> -> vector<64x64xf32>
    %c7 = arith.constant 7 : index
    %c0_72 = arith.constant 0 : index
    %c0_73 = arith.constant 0 : index
    %137 = vector.load %arg12[%c7, %c0_72, %c0_73] : memref<22x1x64xf32, #tpu.memory_space<vmem>>, vector<1x1x64xf32>
    %138 = vector.shape_cast %137 : vector<1x1x64xf32> to vector<1x64xf32>
    %139 = vector.broadcast %138 : vector<1x64xf32> to vector<64x64xf32>
    %140 = arith.addf %136, %139 : vector<64x64xf32>
    %141 = vector.extract_strided_slice %126 {offsets = [0, 0], sizes = [32, 64], strides = [1, 1]} : vector<32x128xf32> to vector<32x64xf32>
    %142 = arith.mulf %141, %5 : vector<32x64xf32>
    %143 = vector.extract_strided_slice %126 {offsets = [0, 64], sizes = [32, 64], strides = [1, 1]} : vector<32x128xf32> to vector<32x64xf32>
    %144 = arith.mulf %143, %6 : vector<32x64xf32>
    %145 = arith.addf %142, %144 : vector<32x64xf32>
    %146 = vector.extract_strided_slice %133 {offsets = [0, 0], sizes = [64, 64], strides = [1, 1]} : vector<64x128xf32> to vector<64x64xf32>
    %147 = arith.mulf %146, %3 : vector<64x64xf32>
    %148 = vector.extract_strided_slice %133 {offsets = [0, 64], sizes = [64, 64], strides = [1, 1]} : vector<64x128xf32> to vector<64x64xf32>
    %149 = arith.mulf %148, %4 : vector<64x64xf32>
    %150 = arith.addf %147, %149 : vector<64x64xf32>
    %151 = vector.extract_strided_slice %145 {offsets = [0, 0], sizes = [16, 64], strides = [1, 1]} : vector<32x64xf32> to vector<16x64xf32>
    %152 = vector.extract_strided_slice %150 {offsets = [0, 0], sizes = [32, 64], strides = [1, 1]} : vector<64x64xf32> to vector<32x64xf32>
    %153 = vector.extract_strided_slice %140 {offsets = [0, 0], sizes = [32, 64], strides = [1, 1]} : vector<64x64xf32> to vector<32x64xf32>
    %cst_74 = arith.constant dense<0.000000e+00> : vector<16x32xf32>
    %154 = tpu.matmul %151, %152, %cst_74 {dimension_numbers = #tpu.dot_dimension_numbers<[1], [1], [0], [0], [0, 0, 1, 0], [], []>} : vector<16x64xf32>, vector<32x64xf32>, vector<16x32xf32> -> vector<16x32xf32>
    %cst_75 = arith.constant 1.250000e-01 : f32
    %155 = vector.broadcast %cst_75 : f32 to vector<16x32xf32>
    %156 = arith.mulf %154, %155 : vector<16x32xf32>
    %cst_76 = arith.constant dense<0xFF800000> : vector<16xf32>
    %157 = vector.multi_reduction <maximumf>, %156, %cst_76 [1] : vector<16x32xf32> to vector<16xf32>
    %158 = vector.shape_cast %157 : vector<16xf32> to vector<16x1xf32>
    %159 = vector.broadcast %158 : vector<16x1xf32> to vector<16x32xf32>
    %160 = arith.subf %156, %159 : vector<16x32xf32>
    %161 = math.exp %160 : vector<16x32xf32>
    %cst_77 = arith.constant dense<0.000000e+00> : vector<16xf32>
    %162 = vector.multi_reduction <add>, %161, %cst_77 [1] : vector<16x32xf32> to vector<16xf32>
    %163 = vector.shape_cast %162 : vector<16xf32> to vector<16x1xf32>
    %164 = tpu.reciprocal %163 {approx = true} : vector<16x1xf32> -> vector<16x1xf32>
    %165 = vector.broadcast %164 : vector<16x1xf32> to vector<16x32xf32>
    %166 = arith.mulf %161, %165 : vector<16x32xf32>
    %cst_78 = arith.constant dense<0.000000e+00> : vector<16x64xf32>
    %167 = tpu.matmul %166, %153, %cst_78 {dimension_numbers = #tpu.dot_dimension_numbers<[1], [0], [0], [1], [0, 0, 1, 1], [], []>} : vector<16x32xf32>, vector<32x64xf32>, vector<16x64xf32> -> vector<16x64xf32>
    %168 = vector.extract_strided_slice %145 {offsets = [16, 0], sizes = [16, 64], strides = [1, 1]} : vector<32x64xf32> to vector<16x64xf32>
    %169 = vector.extract_strided_slice %150 {offsets = [32, 0], sizes = [32, 64], strides = [1, 1]} : vector<64x64xf32> to vector<32x64xf32>
    %170 = vector.extract_strided_slice %140 {offsets = [32, 0], sizes = [32, 64], strides = [1, 1]} : vector<64x64xf32> to vector<32x64xf32>
    %cst_79 = arith.constant dense<0.000000e+00> : vector<16x32xf32>
    %171 = tpu.matmul %168, %169, %cst_79 {dimension_numbers = #tpu.dot_dimension_numbers<[1], [1], [0], [0], [0, 0, 1, 0], [], []>} : vector<16x64xf32>, vector<32x64xf32>, vector<16x32xf32> -> vector<16x32xf32>
    %cst_80 = arith.constant 1.250000e-01 : f32
    %172 = vector.broadcast %cst_80 : f32 to vector<16x32xf32>
    %173 = arith.mulf %171, %172 : vector<16x32xf32>
    %cst_81 = arith.constant dense<0xFF800000> : vector<16xf32>
    %174 = vector.multi_reduction <maximumf>, %173, %cst_81 [1] : vector<16x32xf32> to vector<16xf32>
    %175 = vector.shape_cast %174 : vector<16xf32> to vector<16x1xf32>
    %176 = vector.broadcast %175 : vector<16x1xf32> to vector<16x32xf32>
    %177 = arith.subf %173, %176 : vector<16x32xf32>
    %178 = math.exp %177 : vector<16x32xf32>
    %cst_82 = arith.constant dense<0.000000e+00> : vector<16xf32>
    %179 = vector.multi_reduction <add>, %178, %cst_82 [1] : vector<16x32xf32> to vector<16xf32>
    %180 = vector.shape_cast %179 : vector<16xf32> to vector<16x1xf32>
    %181 = tpu.reciprocal %180 {approx = true} : vector<16x1xf32> -> vector<16x1xf32>
    %182 = vector.broadcast %181 : vector<16x1xf32> to vector<16x32xf32>
    %183 = arith.mulf %178, %182 : vector<16x32xf32>
    %cst_83 = arith.constant dense<0.000000e+00> : vector<16x64xf32>
    %184 = tpu.matmul %183, %170, %cst_83 {dimension_numbers = #tpu.dot_dimension_numbers<[1], [0], [0], [1], [0, 0, 1, 1], [], []>} : vector<16x32xf32>, vector<32x64xf32>, vector<16x64xf32> -> vector<16x64xf32>
    %185 = tpu.concatenate %167, %184 in 0 : vector<16x64xf32>, vector<16x64xf32> -> vector<32x64xf32>
    %c0_84 = arith.constant 0 : index
    %c2_85 = arith.constant 2 : index
    %c0_86 = arith.constant 0 : index
    %c0_87 = arith.constant 0 : index
    %186 = vector.load %arg10[%c0_84, %c2_85, %c0_86, %c0_87] : memref<2x3x64x64xf32, #tpu.memory_space<vmem>>, vector<1x1x64x64xf32>
    %187 = vector.shape_cast %186 : vector<1x1x64x64xf32> to vector<64x64xf32>
    %cst_88 = arith.constant dense<0.000000e+00> : vector<32x64xf32>
    %188 = tpu.matmul %185, %187, %cst_88 {dimension_numbers = #tpu.dot_dimension_numbers<[1], [0], [0], [1], [0, 0, 1, 1], [], []>} : vector<32x64xf32>, vector<64x64xf32>, vector<32x64xf32> -> vector<32x64xf32>
    %189 = arith.addf %93, %188 : vector<32x64xf32>
    %c8 = arith.constant 8 : index
    %c0_89 = arith.constant 0 : index
    %c0_90 = arith.constant 0 : index
    %190 = vector.load %arg12[%c8, %c0_89, %c0_90] : memref<22x1x64xf32, #tpu.memory_space<vmem>>, vector<1x1x64xf32>
    %191 = vector.shape_cast %190 : vector<1x1x64xf32> to vector<1x64xf32>
    %192 = vector.broadcast %191 : vector<1x64xf32> to vector<32x64xf32>
    %193 = arith.addf %189, %192 : vector<32x64xf32>
    %c4 = arith.constant 4 : index
    %c0_91 = arith.constant 0 : index
    %c0_92 = arith.constant 0 : index
    %194 = vector.load %arg12[%c4, %c0_91, %c0_92] : memref<22x1x64xf32, #tpu.memory_space<vmem>>, vector<1x1x64xf32>
    %195 = vector.shape_cast %194 : vector<1x1x64xf32> to vector<1x64xf32>
    %c5 = arith.constant 5 : index
    %c0_93 = arith.constant 0 : index
    %c0_94 = arith.constant 0 : index
    %196 = vector.load %arg12[%c5, %c0_93, %c0_94] : memref<22x1x64xf32, #tpu.memory_space<vmem>>, vector<1x1x64xf32>
    %197 = vector.shape_cast %196 : vector<1x1x64xf32> to vector<1x64xf32>
    %cst_95 = arith.constant dense<0.000000e+00> : vector<32xf32>
    %198 = vector.multi_reduction <add>, %193, %cst_95 [1] : vector<32x64xf32> to vector<32xf32>
    %199 = vector.shape_cast %198 : vector<32xf32> to vector<32x1xf32>
    %cst_96 = arith.constant 6.400000e+01 : f32
    %200 = vector.broadcast %cst_96 : f32 to vector<32x1xf32>
    %201 = arith.divf %199, %200 : vector<32x1xf32>
    %202 = vector.broadcast %201 : vector<32x1xf32> to vector<32x64xf32>
    %203 = arith.subf %193, %202 : vector<32x64xf32>
    %204 = arith.mulf %203, %203 : vector<32x64xf32>
    %cst_97 = arith.constant dense<0.000000e+00> : vector<32xf32>
    %205 = vector.multi_reduction <add>, %204, %cst_97 [1] : vector<32x64xf32> to vector<32xf32>
    %206 = vector.shape_cast %205 : vector<32xf32> to vector<32x1xf32>
    %cst_98 = arith.constant 6.400000e+01 : f32
    %207 = vector.broadcast %cst_98 : f32 to vector<32x1xf32>
    %208 = arith.divf %206, %207 : vector<32x1xf32>
    %209 = vector.broadcast %201 : vector<32x1xf32> to vector<32x64xf32>
    %210 = arith.subf %193, %209 : vector<32x64xf32>
    %cst_99 = arith.constant 9.99999974E-6 : f32
    %211 = vector.broadcast %cst_99 : f32 to vector<32x1xf32>
    %212 = arith.addf %208, %211 : vector<32x1xf32>
    %213 = math.rsqrt %212 : vector<32x1xf32>
    %214 = vector.broadcast %213 : vector<32x1xf32> to vector<32x64xf32>
    %215 = arith.mulf %210, %214 : vector<32x64xf32>
    %216 = vector.broadcast %195 : vector<1x64xf32> to vector<32x64xf32>
    %217 = arith.mulf %215, %216 : vector<32x64xf32>
    %218 = vector.broadcast %197 : vector<1x64xf32> to vector<32x64xf32>
    %219 = arith.addf %217, %218 : vector<32x64xf32>
    %c0_100 = arith.constant 0 : index
    %c2_101 = arith.constant 2 : index
    %c0_102 = arith.constant 0 : index
    %c0_103 = arith.constant 0 : index
    %220 = vector.load %arg8[%c0_100, %c2_101, %c0_102, %c0_103] : memref<2x3x64x128xf32, #tpu.memory_space<vmem>>, vector<1x1x64x128xf32>
    %221 = vector.shape_cast %220 : vector<1x1x64x128xf32> to vector<64x128xf32>
    %cst_104 = arith.constant dense<0.000000e+00> : vector<32x128xf32>
    %222 = tpu.matmul %219, %221, %cst_104 {dimension_numbers = #tpu.dot_dimension_numbers<[1], [0], [0], [1], [0, 0, 1, 1], [], []>} : vector<32x64xf32>, vector<64x128xf32>, vector<32x128xf32> -> vector<32x128xf32>
    %c2_105 = arith.constant 2 : index
    %c0_106 = arith.constant 0 : index
    %c0_107 = arith.constant 0 : index
    %223 = vector.load %arg9[%c2_105, %c0_106, %c0_107] : memref<6x1x128xf32, #tpu.memory_space<vmem>>, vector<1x1x128xf32>
    %224 = vector.shape_cast %223 : vector<1x1x128xf32> to vector<1x128xf32>
    %225 = vector.broadcast %224 : vector<1x128xf32> to vector<32x128xf32>
    %226 = arith.addf %222, %225 : vector<32x128xf32>
    %cst_108 = arith.constant 0.000000e+00 : f32
    %227 = vector.broadcast %cst_108 : f32 to vector<32x128xf32>
    %228 = arith.maximumf %226, %227 : vector<32x128xf32>
    %c0_109 = arith.constant 0 : index
    %c0_110 = arith.constant 0 : index
    %c0_111 = arith.constant 0 : index
    %229 = vector.load %arg11[%c0_109, %c0_110, %c0_111] : memref<2x128x64xf32, #tpu.memory_space<vmem>>, vector<1x128x64xf32>
    %230 = vector.shape_cast %229 : vector<1x128x64xf32> to vector<128x64xf32>
    %cst_112 = arith.constant dense<0.000000e+00> : vector<32x64xf32>
    %231 = tpu.matmul %228, %230, %cst_112 {dimension_numbers = #tpu.dot_dimension_numbers<[1], [0], [0], [1], [0, 0, 1, 1], [], []>} : vector<32x128xf32>, vector<128x64xf32>, vector<32x64xf32> -> vector<32x64xf32>
    %232 = arith.addf %193, %231 : vector<32x64xf32>
    %c9 = arith.constant 9 : index
    %c0_113 = arith.constant 0 : index
    %c0_114 = arith.constant 0 : index
    %233 = vector.load %arg12[%c9, %c0_113, %c0_114] : memref<22x1x64xf32, #tpu.memory_space<vmem>>, vector<1x1x64xf32>
    %234 = vector.shape_cast %233 : vector<1x1x64xf32> to vector<1x64xf32>
    %235 = vector.broadcast %234 : vector<1x64xf32> to vector<32x64xf32>
    %236 = arith.addf %232, %235 : vector<32x64xf32>
    %c10 = arith.constant 10 : index
    %c0_115 = arith.constant 0 : index
    %c0_116 = arith.constant 0 : index
    %237 = vector.load %arg12[%c10, %c0_115, %c0_116] : memref<22x1x64xf32, #tpu.memory_space<vmem>>, vector<1x1x64xf32>
    %238 = vector.shape_cast %237 : vector<1x1x64xf32> to vector<1x64xf32>
    %c11 = arith.constant 11 : index
    %c0_117 = arith.constant 0 : index
    %c0_118 = arith.constant 0 : index
    %239 = vector.load %arg12[%c11, %c0_117, %c0_118] : memref<22x1x64xf32, #tpu.memory_space<vmem>>, vector<1x1x64xf32>
    %240 = vector.shape_cast %239 : vector<1x1x64xf32> to vector<1x64xf32>
    %cst_119 = arith.constant dense<0.000000e+00> : vector<32xf32>
    %241 = vector.multi_reduction <add>, %236, %cst_119 [1] : vector<32x64xf32> to vector<32xf32>
    %242 = vector.shape_cast %241 : vector<32xf32> to vector<32x1xf32>
    %cst_120 = arith.constant 6.400000e+01 : f32
    %243 = vector.broadcast %cst_120 : f32 to vector<32x1xf32>
    %244 = arith.divf %242, %243 : vector<32x1xf32>
    %245 = vector.broadcast %244 : vector<32x1xf32> to vector<32x64xf32>
    %246 = arith.subf %236, %245 : vector<32x64xf32>
    %247 = arith.mulf %246, %246 : vector<32x64xf32>
    %cst_121 = arith.constant dense<0.000000e+00> : vector<32xf32>
    %248 = vector.multi_reduction <add>, %247, %cst_121 [1] : vector<32x64xf32> to vector<32xf32>
    %249 = vector.shape_cast %248 : vector<32xf32> to vector<32x1xf32>
    %cst_122 = arith.constant 6.400000e+01 : f32
    %250 = vector.broadcast %cst_122 : f32 to vector<32x1xf32>
    %251 = arith.divf %249, %250 : vector<32x1xf32>
    %252 = vector.broadcast %244 : vector<32x1xf32> to vector<32x64xf32>
    %253 = arith.subf %236, %252 : vector<32x64xf32>
    %cst_123 = arith.constant 9.99999974E-6 : f32
    %254 = vector.broadcast %cst_123 : f32 to vector<32x1xf32>
    %255 = arith.addf %251, %254 : vector<32x1xf32>
    %256 = math.rsqrt %255 : vector<32x1xf32>
    %257 = vector.broadcast %256 : vector<32x1xf32> to vector<32x64xf32>
    %258 = arith.mulf %253, %257 : vector<32x64xf32>
    %259 = vector.broadcast %238 : vector<1x64xf32> to vector<32x64xf32>
    %260 = arith.mulf %258, %259 : vector<32x64xf32>
    %261 = vector.broadcast %240 : vector<1x64xf32> to vector<32x64xf32>
    %262 = arith.addf %260, %261 : vector<32x64xf32>
    %c1_124 = arith.constant 1 : index
    %c0_125 = arith.constant 0 : index
    %c0_126 = arith.constant 0 : index
    %263 = vector.load %arg6[%c1_124, %c0_125, %c0_126] : memref<2x64x320xf32, #tpu.memory_space<vmem>>, vector<1x64x320xf32>
    %264 = vector.shape_cast %263 : vector<1x64x320xf32> to vector<64x320xf32>
    %cst_127 = arith.constant dense<0.000000e+00> : vector<32x320xf32>
    %265 = tpu.matmul %262, %264, %cst_127 {dimension_numbers = #tpu.dot_dimension_numbers<[1], [0], [0], [1], [0, 0, 1, 1], [], []>} : vector<32x64xf32>, vector<64x320xf32>, vector<32x320xf32> -> vector<32x320xf32>
    %c1_128 = arith.constant 1 : index
    %c0_129 = arith.constant 0 : index
    %c0_130 = arith.constant 0 : index
    %266 = vector.load %arg7[%c1_128, %c0_129, %c0_130] : memref<2x1x320xf32, #tpu.memory_space<vmem>>, vector<1x1x320xf32>
    %267 = vector.shape_cast %266 : vector<1x1x320xf32> to vector<1x320xf32>
    %268 = vector.broadcast %267 : vector<1x320xf32> to vector<32x320xf32>
    %269 = arith.addf %265, %268 : vector<32x320xf32>
    %270 = vector.extract_strided_slice %269 {offsets = [0, 0], sizes = [32, 64], strides = [1, 1]} : vector<32x320xf32> to vector<32x64xf32>
    %271 = arith.mulf %270, %5 : vector<32x64xf32>
    %272 = vector.extract_strided_slice %269 {offsets = [0, 64], sizes = [32, 64], strides = [1, 1]} : vector<32x320xf32> to vector<32x64xf32>
    %273 = arith.mulf %272, %6 : vector<32x64xf32>
    %274 = arith.addf %271, %273 : vector<32x64xf32>
    %275 = vector.extract_strided_slice %269 {offsets = [0, 128], sizes = [32, 64], strides = [1, 1]} : vector<32x320xf32> to vector<32x64xf32>
    %276 = arith.mulf %275, %5 : vector<32x64xf32>
    %277 = vector.extract_strided_slice %269 {offsets = [0, 192], sizes = [32, 64], strides = [1, 1]} : vector<32x320xf32> to vector<32x64xf32>
    %278 = arith.mulf %277, %6 : vector<32x64xf32>
    %279 = arith.addf %276, %278 : vector<32x64xf32>
    %280 = vector.extract_strided_slice %269 {offsets = [0, 256], sizes = [32, 64], strides = [1, 1]} : vector<32x320xf32> to vector<32x64xf32>
    %281 = vector.extract_strided_slice %274 {offsets = [0, 0], sizes = [16, 64], strides = [1, 1]} : vector<32x64xf32> to vector<16x64xf32>
    %282 = vector.extract_strided_slice %279 {offsets = [0, 0], sizes = [16, 64], strides = [1, 1]} : vector<32x64xf32> to vector<16x64xf32>
    %283 = vector.extract_strided_slice %280 {offsets = [0, 0], sizes = [16, 64], strides = [1, 1]} : vector<32x64xf32> to vector<16x64xf32>
    %cst_131 = arith.constant dense<0.000000e+00> : vector<16x16xf32>
    %284 = tpu.matmul %281, %282, %cst_131 {dimension_numbers = #tpu.dot_dimension_numbers<[1], [1], [0], [0], [0, 0, 1, 0], [], []>} : vector<16x64xf32>, vector<16x64xf32>, vector<16x16xf32> -> vector<16x16xf32>
    %cst_132 = arith.constant 1.250000e-01 : f32
    %285 = vector.broadcast %cst_132 : f32 to vector<16x16xf32>
    %286 = arith.mulf %284, %285 : vector<16x16xf32>
    %cst_133 = arith.constant dense<0xFF800000> : vector<16xf32>
    %287 = vector.multi_reduction <maximumf>, %286, %cst_133 [1] : vector<16x16xf32> to vector<16xf32>
    %288 = vector.shape_cast %287 : vector<16xf32> to vector<16x1xf32>
    %289 = vector.broadcast %288 : vector<16x1xf32> to vector<16x16xf32>
    %290 = arith.subf %286, %289 : vector<16x16xf32>
    %291 = math.exp %290 : vector<16x16xf32>
    %cst_134 = arith.constant dense<0.000000e+00> : vector<16xf32>
    %292 = vector.multi_reduction <add>, %291, %cst_134 [1] : vector<16x16xf32> to vector<16xf32>
    %293 = vector.shape_cast %292 : vector<16xf32> to vector<16x1xf32>
    %294 = tpu.reciprocal %293 {approx = true} : vector<16x1xf32> -> vector<16x1xf32>
    %295 = vector.broadcast %294 : vector<16x1xf32> to vector<16x16xf32>
    %296 = arith.mulf %291, %295 : vector<16x16xf32>
    %cst_135 = arith.constant dense<0.000000e+00> : vector<16x64xf32>
    %297 = tpu.matmul %296, %283, %cst_135 {dimension_numbers = #tpu.dot_dimension_numbers<[1], [0], [0], [1], [0, 0, 1, 1], [], []>} : vector<16x16xf32>, vector<16x64xf32>, vector<16x64xf32> -> vector<16x64xf32>
    %298 = vector.extract_strided_slice %274 {offsets = [16, 0], sizes = [16, 64], strides = [1, 1]} : vector<32x64xf32> to vector<16x64xf32>
    %299 = vector.extract_strided_slice %279 {offsets = [16, 0], sizes = [16, 64], strides = [1, 1]} : vector<32x64xf32> to vector<16x64xf32>
    %300 = vector.extract_strided_slice %280 {offsets = [16, 0], sizes = [16, 64], strides = [1, 1]} : vector<32x64xf32> to vector<16x64xf32>
    %cst_136 = arith.constant dense<0.000000e+00> : vector<16x16xf32>
    %301 = tpu.matmul %298, %299, %cst_136 {dimension_numbers = #tpu.dot_dimension_numbers<[1], [1], [0], [0], [0, 0, 1, 0], [], []>} : vector<16x64xf32>, vector<16x64xf32>, vector<16x16xf32> -> vector<16x16xf32>
    %cst_137 = arith.constant 1.250000e-01 : f32
    %302 = vector.broadcast %cst_137 : f32 to vector<16x16xf32>
    %303 = arith.mulf %301, %302 : vector<16x16xf32>
    %cst_138 = arith.constant dense<0xFF800000> : vector<16xf32>
    %304 = vector.multi_reduction <maximumf>, %303, %cst_138 [1] : vector<16x16xf32> to vector<16xf32>
    %305 = vector.shape_cast %304 : vector<16xf32> to vector<16x1xf32>
    %306 = vector.broadcast %305 : vector<16x1xf32> to vector<16x16xf32>
    %307 = arith.subf %303, %306 : vector<16x16xf32>
    %308 = math.exp %307 : vector<16x16xf32>
    %cst_139 = arith.constant dense<0.000000e+00> : vector<16xf32>
    %309 = vector.multi_reduction <add>, %308, %cst_139 [1] : vector<16x16xf32> to vector<16xf32>
    %310 = vector.shape_cast %309 : vector<16xf32> to vector<16x1xf32>
    %311 = tpu.reciprocal %310 {approx = true} : vector<16x1xf32> -> vector<16x1xf32>
    %312 = vector.broadcast %311 : vector<16x1xf32> to vector<16x16xf32>
    %313 = arith.mulf %308, %312 : vector<16x16xf32>
    %cst_140 = arith.constant dense<0.000000e+00> : vector<16x64xf32>
    %314 = tpu.matmul %313, %300, %cst_140 {dimension_numbers = #tpu.dot_dimension_numbers<[1], [0], [0], [1], [0, 0, 1, 1], [], []>} : vector<16x16xf32>, vector<16x64xf32>, vector<16x64xf32> -> vector<16x64xf32>
    %315 = tpu.concatenate %297, %314 in 0 : vector<16x64xf32>, vector<16x64xf32> -> vector<32x64xf32>
    %c1_141 = arith.constant 1 : index
    %c0_142 = arith.constant 0 : index
    %c0_143 = arith.constant 0 : index
    %c0_144 = arith.constant 0 : index
    %316 = vector.load %arg10[%c1_141, %c0_142, %c0_143, %c0_144] : memref<2x3x64x64xf32, #tpu.memory_space<vmem>>, vector<1x1x64x64xf32>
    %317 = vector.shape_cast %316 : vector<1x1x64x64xf32> to vector<64x64xf32>
    %cst_145 = arith.constant dense<0.000000e+00> : vector<32x64xf32>
    %318 = tpu.matmul %315, %317, %cst_145 {dimension_numbers = #tpu.dot_dimension_numbers<[1], [0], [0], [1], [0, 0, 1, 1], [], []>} : vector<32x64xf32>, vector<64x64xf32>, vector<32x64xf32> -> vector<32x64xf32>
    %319 = arith.addf %236, %318 : vector<32x64xf32>
    %c16 = arith.constant 16 : index
    %c0_146 = arith.constant 0 : index
    %c0_147 = arith.constant 0 : index
    %320 = vector.load %arg12[%c16, %c0_146, %c0_147] : memref<22x1x64xf32, #tpu.memory_space<vmem>>, vector<1x1x64xf32>
    %321 = vector.shape_cast %320 : vector<1x1x64xf32> to vector<1x64xf32>
    %322 = vector.broadcast %321 : vector<1x64xf32> to vector<32x64xf32>
    %323 = arith.addf %319, %322 : vector<32x64xf32>
    %c12 = arith.constant 12 : index
    %c0_148 = arith.constant 0 : index
    %c0_149 = arith.constant 0 : index
    %324 = vector.load %arg12[%c12, %c0_148, %c0_149] : memref<22x1x64xf32, #tpu.memory_space<vmem>>, vector<1x1x64xf32>
    %325 = vector.shape_cast %324 : vector<1x1x64xf32> to vector<1x64xf32>
    %c13 = arith.constant 13 : index
    %c0_150 = arith.constant 0 : index
    %c0_151 = arith.constant 0 : index
    %326 = vector.load %arg12[%c13, %c0_150, %c0_151] : memref<22x1x64xf32, #tpu.memory_space<vmem>>, vector<1x1x64xf32>
    %327 = vector.shape_cast %326 : vector<1x1x64xf32> to vector<1x64xf32>
    %cst_152 = arith.constant dense<0.000000e+00> : vector<32xf32>
    %328 = vector.multi_reduction <add>, %323, %cst_152 [1] : vector<32x64xf32> to vector<32xf32>
    %329 = vector.shape_cast %328 : vector<32xf32> to vector<32x1xf32>
    %cst_153 = arith.constant 6.400000e+01 : f32
    %330 = vector.broadcast %cst_153 : f32 to vector<32x1xf32>
    %331 = arith.divf %329, %330 : vector<32x1xf32>
    %332 = vector.broadcast %331 : vector<32x1xf32> to vector<32x64xf32>
    %333 = arith.subf %323, %332 : vector<32x64xf32>
    %334 = arith.mulf %333, %333 : vector<32x64xf32>
    %cst_154 = arith.constant dense<0.000000e+00> : vector<32xf32>
    %335 = vector.multi_reduction <add>, %334, %cst_154 [1] : vector<32x64xf32> to vector<32xf32>
    %336 = vector.shape_cast %335 : vector<32xf32> to vector<32x1xf32>
    %cst_155 = arith.constant 6.400000e+01 : f32
    %337 = vector.broadcast %cst_155 : f32 to vector<32x1xf32>
    %338 = arith.divf %336, %337 : vector<32x1xf32>
    %339 = vector.broadcast %331 : vector<32x1xf32> to vector<32x64xf32>
    %340 = arith.subf %323, %339 : vector<32x64xf32>
    %cst_156 = arith.constant 9.99999974E-6 : f32
    %341 = vector.broadcast %cst_156 : f32 to vector<32x1xf32>
    %342 = arith.addf %338, %341 : vector<32x1xf32>
    %343 = math.rsqrt %342 : vector<32x1xf32>
    %344 = vector.broadcast %343 : vector<32x1xf32> to vector<32x64xf32>
    %345 = arith.mulf %340, %344 : vector<32x64xf32>
    %346 = vector.broadcast %325 : vector<1x64xf32> to vector<32x64xf32>
    %347 = arith.mulf %345, %346 : vector<32x64xf32>
    %348 = vector.broadcast %327 : vector<1x64xf32> to vector<32x64xf32>
    %349 = arith.addf %347, %348 : vector<32x64xf32>
    %c1_157 = arith.constant 1 : index
    %c0_158 = arith.constant 0 : index
    %c0_159 = arith.constant 0 : index
    %c0_160 = arith.constant 0 : index
    %350 = vector.load %arg8[%c1_157, %c0_158, %c0_159, %c0_160] : memref<2x3x64x128xf32, #tpu.memory_space<vmem>>, vector<1x1x64x128xf32>
    %351 = vector.shape_cast %350 : vector<1x1x64x128xf32> to vector<64x128xf32>
    %cst_161 = arith.constant dense<0.000000e+00> : vector<32x128xf32>
    %352 = tpu.matmul %349, %351, %cst_161 {dimension_numbers = #tpu.dot_dimension_numbers<[1], [0], [0], [1], [0, 0, 1, 1], [], []>} : vector<32x64xf32>, vector<64x128xf32>, vector<32x128xf32> -> vector<32x128xf32>
    %c3_162 = arith.constant 3 : index
    %c0_163 = arith.constant 0 : index
    %c0_164 = arith.constant 0 : index
    %353 = vector.load %arg9[%c3_162, %c0_163, %c0_164] : memref<6x1x128xf32, #tpu.memory_space<vmem>>, vector<1x1x128xf32>
    %354 = vector.shape_cast %353 : vector<1x1x128xf32> to vector<1x128xf32>
    %355 = vector.broadcast %354 : vector<1x128xf32> to vector<32x128xf32>
    %356 = arith.addf %352, %355 : vector<32x128xf32>
    %c1_165 = arith.constant 1 : index
    %c1_166 = arith.constant 1 : index
    %c0_167 = arith.constant 0 : index
    %c0_168 = arith.constant 0 : index
    %357 = vector.load %arg8[%c1_165, %c1_166, %c0_167, %c0_168] : memref<2x3x64x128xf32, #tpu.memory_space<vmem>>, vector<1x1x64x128xf32>
    %358 = vector.shape_cast %357 : vector<1x1x64x128xf32> to vector<64x128xf32>
    %cst_169 = arith.constant dense<0.000000e+00> : vector<64x128xf32>
    %359 = tpu.matmul %1, %358, %cst_169 {dimension_numbers = #tpu.dot_dimension_numbers<[1], [0], [0], [1], [0, 0, 1, 1], [], []>} : vector<64x64xf32>, vector<64x128xf32>, vector<64x128xf32> -> vector<64x128xf32>
    %c4_170 = arith.constant 4 : index
    %c0_171 = arith.constant 0 : index
    %c0_172 = arith.constant 0 : index
    %360 = vector.load %arg9[%c4_170, %c0_171, %c0_172] : memref<6x1x128xf32, #tpu.memory_space<vmem>>, vector<1x1x128xf32>
    %361 = vector.shape_cast %360 : vector<1x1x128xf32> to vector<1x128xf32>
    %362 = vector.broadcast %361 : vector<1x128xf32> to vector<64x128xf32>
    %363 = arith.addf %359, %362 : vector<64x128xf32>
    %c1_173 = arith.constant 1 : index
    %c1_174 = arith.constant 1 : index
    %c0_175 = arith.constant 0 : index
    %c0_176 = arith.constant 0 : index
    %364 = vector.load %arg10[%c1_173, %c1_174, %c0_175, %c0_176] : memref<2x3x64x64xf32, #tpu.memory_space<vmem>>, vector<1x1x64x64xf32>
    %365 = vector.shape_cast %364 : vector<1x1x64x64xf32> to vector<64x64xf32>
    %cst_177 = arith.constant dense<0.000000e+00> : vector<64x64xf32>
    %366 = tpu.matmul %2, %365, %cst_177 {dimension_numbers = #tpu.dot_dimension_numbers<[1], [0], [0], [1], [0, 0, 1, 1], [], []>} : vector<64x64xf32>, vector<64x64xf32>, vector<64x64xf32> -> vector<64x64xf32>
    %c17 = arith.constant 17 : index
    %c0_178 = arith.constant 0 : index
    %c0_179 = arith.constant 0 : index
    %367 = vector.load %arg12[%c17, %c0_178, %c0_179] : memref<22x1x64xf32, #tpu.memory_space<vmem>>, vector<1x1x64xf32>
    %368 = vector.shape_cast %367 : vector<1x1x64xf32> to vector<1x64xf32>
    %369 = vector.broadcast %368 : vector<1x64xf32> to vector<64x64xf32>
    %370 = arith.addf %366, %369 : vector<64x64xf32>
    %371 = vector.extract_strided_slice %356 {offsets = [0, 0], sizes = [32, 64], strides = [1, 1]} : vector<32x128xf32> to vector<32x64xf32>
    %372 = arith.mulf %371, %5 : vector<32x64xf32>
    %373 = vector.extract_strided_slice %356 {offsets = [0, 64], sizes = [32, 64], strides = [1, 1]} : vector<32x128xf32> to vector<32x64xf32>
    %374 = arith.mulf %373, %6 : vector<32x64xf32>
    %375 = arith.addf %372, %374 : vector<32x64xf32>
    %376 = vector.extract_strided_slice %363 {offsets = [0, 0], sizes = [64, 64], strides = [1, 1]} : vector<64x128xf32> to vector<64x64xf32>
    %377 = arith.mulf %376, %3 : vector<64x64xf32>
    %378 = vector.extract_strided_slice %363 {offsets = [0, 64], sizes = [64, 64], strides = [1, 1]} : vector<64x128xf32> to vector<64x64xf32>
    %379 = arith.mulf %378, %4 : vector<64x64xf32>
    %380 = arith.addf %377, %379 : vector<64x64xf32>
    %381 = vector.extract_strided_slice %375 {offsets = [0, 0], sizes = [16, 64], strides = [1, 1]} : vector<32x64xf32> to vector<16x64xf32>
    %382 = vector.extract_strided_slice %380 {offsets = [0, 0], sizes = [32, 64], strides = [1, 1]} : vector<64x64xf32> to vector<32x64xf32>
    %383 = vector.extract_strided_slice %370 {offsets = [0, 0], sizes = [32, 64], strides = [1, 1]} : vector<64x64xf32> to vector<32x64xf32>
    %cst_180 = arith.constant dense<0.000000e+00> : vector<16x32xf32>
    %384 = tpu.matmul %381, %382, %cst_180 {dimension_numbers = #tpu.dot_dimension_numbers<[1], [1], [0], [0], [0, 0, 1, 0], [], []>} : vector<16x64xf32>, vector<32x64xf32>, vector<16x32xf32> -> vector<16x32xf32>
    %cst_181 = arith.constant 1.250000e-01 : f32
    %385 = vector.broadcast %cst_181 : f32 to vector<16x32xf32>
    %386 = arith.mulf %384, %385 : vector<16x32xf32>
    %cst_182 = arith.constant dense<0xFF800000> : vector<16xf32>
    %387 = vector.multi_reduction <maximumf>, %386, %cst_182 [1] : vector<16x32xf32> to vector<16xf32>
    %388 = vector.shape_cast %387 : vector<16xf32> to vector<16x1xf32>
    %389 = vector.broadcast %388 : vector<16x1xf32> to vector<16x32xf32>
    %390 = arith.subf %386, %389 : vector<16x32xf32>
    %391 = math.exp %390 : vector<16x32xf32>
    %cst_183 = arith.constant dense<0.000000e+00> : vector<16xf32>
    %392 = vector.multi_reduction <add>, %391, %cst_183 [1] : vector<16x32xf32> to vector<16xf32>
    %393 = vector.shape_cast %392 : vector<16xf32> to vector<16x1xf32>
    %394 = tpu.reciprocal %393 {approx = true} : vector<16x1xf32> -> vector<16x1xf32>
    %395 = vector.broadcast %394 : vector<16x1xf32> to vector<16x32xf32>
    %396 = arith.mulf %391, %395 : vector<16x32xf32>
    %cst_184 = arith.constant dense<0.000000e+00> : vector<16x64xf32>
    %397 = tpu.matmul %396, %383, %cst_184 {dimension_numbers = #tpu.dot_dimension_numbers<[1], [0], [0], [1], [0, 0, 1, 1], [], []>} : vector<16x32xf32>, vector<32x64xf32>, vector<16x64xf32> -> vector<16x64xf32>
    %398 = vector.extract_strided_slice %375 {offsets = [16, 0], sizes = [16, 64], strides = [1, 1]} : vector<32x64xf32> to vector<16x64xf32>
    %399 = vector.extract_strided_slice %380 {offsets = [32, 0], sizes = [32, 64], strides = [1, 1]} : vector<64x64xf32> to vector<32x64xf32>
    %400 = vector.extract_strided_slice %370 {offsets = [32, 0], sizes = [32, 64], strides = [1, 1]} : vector<64x64xf32> to vector<32x64xf32>
    %cst_185 = arith.constant dense<0.000000e+00> : vector<16x32xf32>
    %401 = tpu.matmul %398, %399, %cst_185 {dimension_numbers = #tpu.dot_dimension_numbers<[1], [1], [0], [0], [0, 0, 1, 0], [], []>} : vector<16x64xf32>, vector<32x64xf32>, vector<16x32xf32> -> vector<16x32xf32>
    %cst_186 = arith.constant 1.250000e-01 : f32
    %402 = vector.broadcast %cst_186 : f32 to vector<16x32xf32>
    %403 = arith.mulf %401, %402 : vector<16x32xf32>
    %cst_187 = arith.constant dense<0xFF800000> : vector<16xf32>
    %404 = vector.multi_reduction <maximumf>, %403, %cst_187 [1] : vector<16x32xf32> to vector<16xf32>
    %405 = vector.shape_cast %404 : vector<16xf32> to vector<16x1xf32>
    %406 = vector.broadcast %405 : vector<16x1xf32> to vector<16x32xf32>
    %407 = arith.subf %403, %406 : vector<16x32xf32>
    %408 = math.exp %407 : vector<16x32xf32>
    %cst_188 = arith.constant dense<0.000000e+00> : vector<16xf32>
    %409 = vector.multi_reduction <add>, %408, %cst_188 [1] : vector<16x32xf32> to vector<16xf32>
    %410 = vector.shape_cast %409 : vector<16xf32> to vector<16x1xf32>
    %411 = tpu.reciprocal %410 {approx = true} : vector<16x1xf32> -> vector<16x1xf32>
    %412 = vector.broadcast %411 : vector<16x1xf32> to vector<16x32xf32>
    %413 = arith.mulf %408, %412 : vector<16x32xf32>
    %cst_189 = arith.constant dense<0.000000e+00> : vector<16x64xf32>
    %414 = tpu.matmul %413, %400, %cst_189 {dimension_numbers = #tpu.dot_dimension_numbers<[1], [0], [0], [1], [0, 0, 1, 1], [], []>} : vector<16x32xf32>, vector<32x64xf32>, vector<16x64xf32> -> vector<16x64xf32>
    %415 = tpu.concatenate %397, %414 in 0 : vector<16x64xf32>, vector<16x64xf32> -> vector<32x64xf32>
    %c1_190 = arith.constant 1 : index
    %c2_191 = arith.constant 2 : index
    %c0_192 = arith.constant 0 : index
    %c0_193 = arith.constant 0 : index
    %416 = vector.load %arg10[%c1_190, %c2_191, %c0_192, %c0_193] : memref<2x3x64x64xf32, #tpu.memory_space<vmem>>, vector<1x1x64x64xf32>
    %417 = vector.shape_cast %416 : vector<1x1x64x64xf32> to vector<64x64xf32>
    %cst_194 = arith.constant dense<0.000000e+00> : vector<32x64xf32>
    %418 = tpu.matmul %415, %417, %cst_194 {dimension_numbers = #tpu.dot_dimension_numbers<[1], [0], [0], [1], [0, 0, 1, 1], [], []>} : vector<32x64xf32>, vector<64x64xf32>, vector<32x64xf32> -> vector<32x64xf32>
    %419 = arith.addf %323, %418 : vector<32x64xf32>
    %c18 = arith.constant 18 : index
    %c0_195 = arith.constant 0 : index
    %c0_196 = arith.constant 0 : index
    %420 = vector.load %arg12[%c18, %c0_195, %c0_196] : memref<22x1x64xf32, #tpu.memory_space<vmem>>, vector<1x1x64xf32>
    %421 = vector.shape_cast %420 : vector<1x1x64xf32> to vector<1x64xf32>
    %422 = vector.broadcast %421 : vector<1x64xf32> to vector<32x64xf32>
    %423 = arith.addf %419, %422 : vector<32x64xf32>
    %c14 = arith.constant 14 : index
    %c0_197 = arith.constant 0 : index
    %c0_198 = arith.constant 0 : index
    %424 = vector.load %arg12[%c14, %c0_197, %c0_198] : memref<22x1x64xf32, #tpu.memory_space<vmem>>, vector<1x1x64xf32>
    %425 = vector.shape_cast %424 : vector<1x1x64xf32> to vector<1x64xf32>
    %c15 = arith.constant 15 : index
    %c0_199 = arith.constant 0 : index
    %c0_200 = arith.constant 0 : index
    %426 = vector.load %arg12[%c15, %c0_199, %c0_200] : memref<22x1x64xf32, #tpu.memory_space<vmem>>, vector<1x1x64xf32>
    %427 = vector.shape_cast %426 : vector<1x1x64xf32> to vector<1x64xf32>
    %cst_201 = arith.constant dense<0.000000e+00> : vector<32xf32>
    %428 = vector.multi_reduction <add>, %423, %cst_201 [1] : vector<32x64xf32> to vector<32xf32>
    %429 = vector.shape_cast %428 : vector<32xf32> to vector<32x1xf32>
    %cst_202 = arith.constant 6.400000e+01 : f32
    %430 = vector.broadcast %cst_202 : f32 to vector<32x1xf32>
    %431 = arith.divf %429, %430 : vector<32x1xf32>
    %432 = vector.broadcast %431 : vector<32x1xf32> to vector<32x64xf32>
    %433 = arith.subf %423, %432 : vector<32x64xf32>
    %434 = arith.mulf %433, %433 : vector<32x64xf32>
    %cst_203 = arith.constant dense<0.000000e+00> : vector<32xf32>
    %435 = vector.multi_reduction <add>, %434, %cst_203 [1] : vector<32x64xf32> to vector<32xf32>
    %436 = vector.shape_cast %435 : vector<32xf32> to vector<32x1xf32>
    %cst_204 = arith.constant 6.400000e+01 : f32
    %437 = vector.broadcast %cst_204 : f32 to vector<32x1xf32>
    %438 = arith.divf %436, %437 : vector<32x1xf32>
    %439 = vector.broadcast %431 : vector<32x1xf32> to vector<32x64xf32>
    %440 = arith.subf %423, %439 : vector<32x64xf32>
    %cst_205 = arith.constant 9.99999974E-6 : f32
    %441 = vector.broadcast %cst_205 : f32 to vector<32x1xf32>
    %442 = arith.addf %438, %441 : vector<32x1xf32>
    %443 = math.rsqrt %442 : vector<32x1xf32>
    %444 = vector.broadcast %443 : vector<32x1xf32> to vector<32x64xf32>
    %445 = arith.mulf %440, %444 : vector<32x64xf32>
    %446 = vector.broadcast %425 : vector<1x64xf32> to vector<32x64xf32>
    %447 = arith.mulf %445, %446 : vector<32x64xf32>
    %448 = vector.broadcast %427 : vector<1x64xf32> to vector<32x64xf32>
    %449 = arith.addf %447, %448 : vector<32x64xf32>
    %c1_206 = arith.constant 1 : index
    %c2_207 = arith.constant 2 : index
    %c0_208 = arith.constant 0 : index
    %c0_209 = arith.constant 0 : index
    %450 = vector.load %arg8[%c1_206, %c2_207, %c0_208, %c0_209] : memref<2x3x64x128xf32, #tpu.memory_space<vmem>>, vector<1x1x64x128xf32>
    %451 = vector.shape_cast %450 : vector<1x1x64x128xf32> to vector<64x128xf32>
    %cst_210 = arith.constant dense<0.000000e+00> : vector<32x128xf32>
    %452 = tpu.matmul %449, %451, %cst_210 {dimension_numbers = #tpu.dot_dimension_numbers<[1], [0], [0], [1], [0, 0, 1, 1], [], []>} : vector<32x64xf32>, vector<64x128xf32>, vector<32x128xf32> -> vector<32x128xf32>
    %c5_211 = arith.constant 5 : index
    %c0_212 = arith.constant 0 : index
    %c0_213 = arith.constant 0 : index
    %453 = vector.load %arg9[%c5_211, %c0_212, %c0_213] : memref<6x1x128xf32, #tpu.memory_space<vmem>>, vector<1x1x128xf32>
    %454 = vector.shape_cast %453 : vector<1x1x128xf32> to vector<1x128xf32>
    %455 = vector.broadcast %454 : vector<1x128xf32> to vector<32x128xf32>
    %456 = arith.addf %452, %455 : vector<32x128xf32>
    %cst_214 = arith.constant 0.000000e+00 : f32
    %457 = vector.broadcast %cst_214 : f32 to vector<32x128xf32>
    %458 = arith.maximumf %456, %457 : vector<32x128xf32>
    %c1_215 = arith.constant 1 : index
    %c0_216 = arith.constant 0 : index
    %c0_217 = arith.constant 0 : index
    %459 = vector.load %arg11[%c1_215, %c0_216, %c0_217] : memref<2x128x64xf32, #tpu.memory_space<vmem>>, vector<1x128x64xf32>
    %460 = vector.shape_cast %459 : vector<1x128x64xf32> to vector<128x64xf32>
    %cst_218 = arith.constant dense<0.000000e+00> : vector<32x64xf32>
    %461 = tpu.matmul %458, %460, %cst_218 {dimension_numbers = #tpu.dot_dimension_numbers<[1], [0], [0], [1], [0, 0, 1, 1], [], []>} : vector<32x128xf32>, vector<128x64xf32>, vector<32x64xf32> -> vector<32x64xf32>
    %462 = arith.addf %423, %461 : vector<32x64xf32>
    %c19 = arith.constant 19 : index
    %c0_219 = arith.constant 0 : index
    %c0_220 = arith.constant 0 : index
    %463 = vector.load %arg12[%c19, %c0_219, %c0_220] : memref<22x1x64xf32, #tpu.memory_space<vmem>>, vector<1x1x64xf32>
    %464 = vector.shape_cast %463 : vector<1x1x64xf32> to vector<1x64xf32>
    %465 = vector.broadcast %464 : vector<1x64xf32> to vector<32x64xf32>
    %466 = arith.addf %462, %465 : vector<32x64xf32>
    %c20 = arith.constant 20 : index
    %c0_221 = arith.constant 0 : index
    %c0_222 = arith.constant 0 : index
    %467 = vector.load %arg12[%c20, %c0_221, %c0_222] : memref<22x1x64xf32, #tpu.memory_space<vmem>>, vector<1x1x64xf32>
    %468 = vector.shape_cast %467 : vector<1x1x64xf32> to vector<1x64xf32>
    %c21 = arith.constant 21 : index
    %c0_223 = arith.constant 0 : index
    %c0_224 = arith.constant 0 : index
    %469 = vector.load %arg12[%c21, %c0_223, %c0_224] : memref<22x1x64xf32, #tpu.memory_space<vmem>>, vector<1x1x64xf32>
    %470 = vector.shape_cast %469 : vector<1x1x64xf32> to vector<1x64xf32>
    %cst_225 = arith.constant dense<0.000000e+00> : vector<32xf32>
    %471 = vector.multi_reduction <add>, %466, %cst_225 [1] : vector<32x64xf32> to vector<32xf32>
    %472 = vector.shape_cast %471 : vector<32xf32> to vector<32x1xf32>
    %cst_226 = arith.constant 6.400000e+01 : f32
    %473 = vector.broadcast %cst_226 : f32 to vector<32x1xf32>
    %474 = arith.divf %472, %473 : vector<32x1xf32>
    %475 = vector.broadcast %474 : vector<32x1xf32> to vector<32x64xf32>
    %476 = arith.subf %466, %475 : vector<32x64xf32>
    %477 = arith.mulf %476, %476 : vector<32x64xf32>
    %cst_227 = arith.constant dense<0.000000e+00> : vector<32xf32>
    %478 = vector.multi_reduction <add>, %477, %cst_227 [1] : vector<32x64xf32> to vector<32xf32>
    %479 = vector.shape_cast %478 : vector<32xf32> to vector<32x1xf32>
    %cst_228 = arith.constant 6.400000e+01 : f32
    %480 = vector.broadcast %cst_228 : f32 to vector<32x1xf32>
    %481 = arith.divf %479, %480 : vector<32x1xf32>
    %482 = vector.broadcast %474 : vector<32x1xf32> to vector<32x64xf32>
    %483 = arith.subf %466, %482 : vector<32x64xf32>
    %cst_229 = arith.constant 9.99999974E-6 : f32
    %484 = vector.broadcast %cst_229 : f32 to vector<32x1xf32>
    %485 = arith.addf %481, %484 : vector<32x1xf32>
    %486 = math.rsqrt %485 : vector<32x1xf32>
    %487 = vector.broadcast %486 : vector<32x1xf32> to vector<32x64xf32>
    %488 = arith.mulf %483, %487 : vector<32x64xf32>
    %489 = vector.broadcast %468 : vector<1x64xf32> to vector<32x64xf32>
    %490 = arith.mulf %488, %489 : vector<32x64xf32>
    %491 = vector.broadcast %470 : vector<1x64xf32> to vector<32x64xf32>
    %492 = arith.addf %490, %491 : vector<32x64xf32>
    %c0_230 = arith.constant 0 : index
    %c0_231 = arith.constant 0 : index
    %493 = vector.load %arg13[%c0_230, %c0_231] : memref<32x64xf32, #tpu.memory_space<vmem>>, vector<32x64xf32>
    tpu.vector_store %arg13[%c0_230, %c0_231], %492 {strides = array<i32>} : memref<32x64xf32, #tpu.memory_space<vmem>>, vector<32x64xf32>,
    return
  }
  func.func @transform_0(%arg0: i32) -> (i32, i32) {
    %c0_i32 = arith.constant 0 : i32
    %c0_i32_0 = arith.constant 0 : i32
    %c0_i32_1 = arith.constant 0 : i32
    return %c0_i32, %c0_i32_0 : i32, i32
  }
  func.func @transform_1(%arg0: i32) -> (i32, i32) {
    %c0_i32 = arith.constant 0 : i32
    %c0_i32_0 = arith.constant 0 : i32
    %c0_i32_1 = arith.constant 0 : i32
    return %c0_i32, %c0_i32_0 : i32, i32
  }
  func.func @transform_2(%arg0: i32) -> (i32, i32) {
    %c0_i32 = arith.constant 0 : i32
    %c0_i32_0 = arith.constant 0 : i32
    %c0_i32_1 = arith.constant 0 : i32
    return %c0_i32, %c0_i32_0 : i32, i32
  }
  func.func @transform_3(%arg0: i32) -> (i32, i32) {
    %c0_i32 = arith.constant 0 : i32
    %c0_i32_0 = arith.constant 0 : i32
    %c0_i32_1 = arith.constant 0 : i32
    return %c0_i32, %c0_i32_0 : i32, i32
  }
  func.func @transform_4(%arg0: i32) -> (i32, i32) {
    %c0_i32 = arith.constant 0 : i32
    %c0_i32_0 = arith.constant 0 : i32
    %c0_i32_1 = arith.constant 0 : i32
    return %c0_i32, %c0_i32_0 : i32, i32
  }
  func.func @transform_5(%arg0: i32) -> (i32, i32, i32) {
    %c0_i32 = arith.constant 0 : i32
    %c0_i32_0 = arith.constant 0 : i32
    %c0_i32_1 = arith.constant 0 : i32
    %c0_i32_2 = arith.constant 0 : i32
    return %c0_i32, %c0_i32_0, %c0_i32_1 : i32, i32, i32
  }
  func.func @transform_6(%arg0: i32) -> (i32, i32, i32) {
    %c0_i32 = arith.constant 0 : i32
    %c0_i32_0 = arith.constant 0 : i32
    %c0_i32_1 = arith.constant 0 : i32
    %c0_i32_2 = arith.constant 0 : i32
    return %c0_i32, %c0_i32_0, %c0_i32_1 : i32, i32, i32
  }
  func.func @transform_7(%arg0: i32) -> (i32, i32, i32, i32) {
    %c0_i32 = arith.constant 0 : i32
    %c0_i32_0 = arith.constant 0 : i32
    %c0_i32_1 = arith.constant 0 : i32
    %c0_i32_2 = arith.constant 0 : i32
    %c0_i32_3 = arith.constant 0 : i32
    return %c0_i32, %c0_i32_0, %c0_i32_1, %c0_i32_2 : i32, i32, i32, i32
  }
  func.func @transform_8(%arg0: i32) -> (i32, i32, i32) {
    %c0_i32 = arith.constant 0 : i32
    %c0_i32_0 = arith.constant 0 : i32
    %c0_i32_1 = arith.constant 0 : i32
    %c0_i32_2 = arith.constant 0 : i32
    return %c0_i32, %c0_i32_0, %c0_i32_1 : i32, i32, i32
  }
  func.func @transform_9(%arg0: i32) -> (i32, i32, i32, i32) {
    %c0_i32 = arith.constant 0 : i32
    %c0_i32_0 = arith.constant 0 : i32
    %c0_i32_1 = arith.constant 0 : i32
    %c0_i32_2 = arith.constant 0 : i32
    %c0_i32_3 = arith.constant 0 : i32
    return %c0_i32, %c0_i32_0, %c0_i32_1, %c0_i32_2 : i32, i32, i32, i32
  }
  func.func @transform_10(%arg0: i32) -> (i32, i32, i32) {
    %c0_i32 = arith.constant 0 : i32
    %c0_i32_0 = arith.constant 0 : i32
    %c0_i32_1 = arith.constant 0 : i32
    %c0_i32_2 = arith.constant 0 : i32
    return %c0_i32, %c0_i32_0, %c0_i32_1 : i32, i32, i32
  }
  func.func @transform_11(%arg0: i32) -> (i32, i32, i32) {
    %c0_i32 = arith.constant 0 : i32
    %c0_i32_0 = arith.constant 0 : i32
    %c0_i32_1 = arith.constant 0 : i32
    %c0_i32_2 = arith.constant 0 : i32
    return %c0_i32, %c0_i32_0, %c0_i32_1 : i32, i32, i32
  }
  func.func @transform_12(%arg0: i32) -> (i32, i32) {
    %c0_i32 = arith.constant 0 : i32
    %c0_i32_0 = arith.constant 0 : i32
    %c0_i32_1 = arith.constant 0 : i32
    return %c0_i32, %c0_i32_0 : i32, i32
  }
}

</mosaic_0001>

<bundles_post_ra>
// kernel: memory_attention_forward.1
= control target key start
LH: loop header
LB: loop body
LE: loop exit
PB: predicated region body
PF: predicated region fallthrough
CT: control target
= control target key end

     0   :  { %17 = vsyncpa [#allocation3], 0  ;;  %s7926_s0 = inlined_call_operand.vmem [shape: f32[32,64], index: 0, kind: input, shape index: {}]   ;;  %s7927_s1 = inlined_call_operand.vmem [shape: f32[64,64], index: 1, kind: input, shape index: {}]   ;;  %s7928_s2 = inlined_call_operand.vmem [shape: f32[64,64], index: 2, kind: input, shape index: {}]   ;;  %s7929_s3 = inlined_call_operand.hbm [shape: f32[64,64], index: 3, kind: input, shape index: {}]   ;;  %s7930_s4 = inlined_call_operand.vmem [shape: f32[64,64], index: 4, kind: input, shape index: {}]   ;;  %s7931_s5 = inlined_call_operand.vmem [shape: f32[2,64,320], index: 5, kind: input, shape index: {}]   ;;  %s7932_s6 = inlined_call_operand.hbm [shape: f32[2,1,320], index: 6, kind: input, shape index: {}]   ;;  %s7933_s7 = inlined_call_operand.vmem [shape: f32[2,3,64,128], index: 7, kind: input, shape index: {}]   ;;  %s7934_s8 = inlined_call_operand.hbm [shape: f32[6,1,128], index: 8, kind: input, shape index: {}]   ;;  %s7935_s9 = inlined_call_operand.hbm [shape: f32[2,3,64,64], index: 9, kind: input, shape index: {}]   ;;  %s7936_s10 = inlined_call_operand.vmem [shape: f32[2,128,64], index: 10, kind: input, shape index: {}]   ;;  %s7937_s11 = inlined_call_operand.hbm [shape: f32[22,1,64], index: 11, kind: input, shape index: {}]   ;;  %s7938_s12 = inlined_call_operand.vmem [shape: f32[32,64], index: 12, kind: output, shape index: {}]  }
   0x1   :  { %18 = vsyncpa [#allocation5], 0 }
   0x2   :  { %19 = vsyncpa [#allocation8], 0  ;;  %s6552_s21 = smov [#allocation4]   ;;  %s6436_s25 = scalar_lea.hbm %s7932_s6, 96 }
   0x3   :  { %s47_s22 = sshll.u32 %s6552_s21, 4  ;;  %p6437_p0 = scmp.ne.s32.totalorder %s7932_s6, %s6436_s25  ;;  %s48_s22 = int_to_ptr.vmem [resolvable:$true] %s47_s22 }
   0x4   :  { %p6440_p1 = scmp.lt.u32.totalorder %s6436_s25, %s7932_s6 }
   0x6   :  { %p6442_p2 = pnand %p6440_p1, %p6437_p0 }
   0x8   :  { %6445 = shalt.err (!%p6442_p2)
}
   0x9   :  { %s6446_s30 = scalar_lea.vmem %s48_s22, 96  ;;  %p6451_p4 = scmp.lt.s32.totalorder %s48_s22, %s48_s22 }
   0xa   :  { %p6447_p3 = scmp.ne.s32.totalorder %s48_s22, %s6446_s30  ;;  %p6452_p5 = scmp.lt.s32.totalorder %s6446_s30, %s6446_s30 }
   0xc   :  { %p6453_p6 = por %p6452_p5, %p6451_p4 }
   0xe   :  { %p6454_p7 = pnand %p6453_p6, %p6447_p3 }
  0x10   :  { %6457 = shalt.err (!%p6454_p7)
}
  0x11   :  { %s6553_s13 = smov 48   ;;  %s6554_s14 = smov 3  }
  0x12   :  { %53 = dma.hbm_to_vmem [thread:$0]  %s7932_s6, 96, %s48_s22, [#allocation5], %s6553_s13, %s6553_s13, %s6554_s14  }
  0x13   :  { %s6555_s17 = smov [#allocation7]   ;;  %s6556_s19 = smov [#allocation2]  }
  0x14   :  { %s73_s18 = sshll.u32 %s6555_s17, 4  ;;  %s31_s20 = sshll.u32 %s6556_s19, 4  ;;  %s74_s18 = int_to_ptr.vmem [resolvable:$true] %s73_s18  ;;  %s32_s20 = int_to_ptr.vmem [resolvable:$true] %s31_s20 }
  0x15   :  { %s6458_s24 = scalar_lea.hbm %s7935_s9, 6144 }
  0x16   :  { %p6459_p8 = scmp.ne.s32.totalorder %s7935_s9, %s6458_s24  ;;  %p6462_p9 = scmp.lt.u32.totalorder %s6458_s24, %s7935_s9 }
  0x18   :  { %p6464_p10 = pnand %p6462_p9, %p6459_p8 }
  0x1a   :  { %6467 = shalt.err (!%p6464_p10)
}
  0x1b   :  { %s6468_s6 = scalar_lea.vmem %s74_s18, 6144  ;;  %p6473_p12 = scmp.lt.s32.totalorder %s74_s18, %s74_s18 }
  0x1c   :  { %p6469_p11 = scmp.ne.s32.totalorder %s74_s18, %s6468_s6  ;;  %p6474_p13 = scmp.lt.s32.totalorder %s6468_s6, %s6468_s6 }
  0x1e   :  { %p6475_p0 = por %p6474_p13, %p6473_p12 }
  0x20   :  { %p6476_p1 = pnand %p6475_p0, %p6469_p11 }
  0x22   :  { %6479 = shalt.err (!%p6476_p1)
}
  0x23   :  { %s6557_s22 = smov 128   ;;  %s6558_s29 = smov 8  }
  0x24   :  { %79 = dma.hbm_to_vmem [thread:$0]  %s7935_s9, 6144, %s74_s18, [#allocation8], %s6557_s22, %s6557_s22, %s6558_s29  }
  0x25   :  { %s6480_s16 = scalar_lea.hbm %s7929_s3, 1024 }
  0x26   :  { %p6481_p2 = scmp.ne.s32.totalorder %s7929_s3, %s6480_s16  ;;  %p6484_p3 = scmp.lt.u32.totalorder %s6480_s16, %s7929_s3 }
  0x28   :  { %p6486_p4 = pnand %p6484_p3, %p6481_p2 }
  0x2a   :  { %6489 = shalt.err (!%p6486_p4)
}
  0x2b   :  { %s6490_s24 = scalar_lea.vmem %s32_s20, 1024  ;;  %p6495_p6 = scmp.lt.s32.totalorder %s32_s20, %s32_s20 }
  0x2c   :  { %p6491_p5 = scmp.ne.s32.totalorder %s32_s20, %s6490_s24  ;;  %p6496_p7 = scmp.lt.s32.totalorder %s6490_s24, %s6490_s24 }
  0x2e   :  { %p6497_p8 = por %p6496_p7, %p6495_p6 }
  0x30   :  { %p6498_p9 = pnand %p6497_p8, %p6491_p5 }
  0x32   :  { %6501 = shalt.err (!%p6498_p9)
}
  0x33   :  { %37 = dma.hbm_to_vmem [thread:$0]  %s7929_s3, 1024, %s32_s20, [#allocation3], %s6557_s22, %s6557_s22, %s6558_s29  }
  0x34   :  { %s6559_s25 = smov [#allocation6]   ;;  %s6502_s6 = scalar_lea.hbm %s7934_s8, 96 }
  0x35   :  { %s61_s26 = sshll.u32 %s6559_s25, 4  ;;  %p6503_p10 = scmp.ne.s32.totalorder %s7934_s8, %s6502_s6  ;;  %s62_s26 = int_to_ptr.vmem [resolvable:$true] %s61_s26 }
  0x36   :  { %p6506_p11 = scmp.lt.u32.totalorder %s6502_s6, %s7934_s8 }
  0x38   :  { %p6508_p12 = pnand %p6506_p11, %p6503_p10 }
  0x3a   :  { %6511 = shalt.err (!%p6508_p12)
}
  0x3b   :  { %s6512_s16 = scalar_lea.vmem %s62_s26, 96  ;;  %p6517_p0 = scmp.lt.s32.totalorder %s62_s26, %s62_s26 }
  0x3c   :  { %p6513_p13 = scmp.ne.s32.totalorder %s62_s26, %s6512_s16  ;;  %p6518_p1 = scmp.lt.s32.totalorder %s6512_s16, %s6512_s16 }
  0x3e   :  { %p6519_p2 = por %p6518_p1, %p6517_p0 }
  0x40   :  { %p6520_p3 = pnand %p6519_p2, %p6513_p13 }
  0x42   :  { %6523 = shalt.err (!%p6520_p3)
}
  0x43   :  { %s6560_s3 = smov 16   ;;  %s6561_s20 = smov 1  }
  0x44   :  { %67 = dma.hbm_to_vmem [thread:$0]  %s7934_s8, 96, %s62_s26, [#allocation5], %s6560_s3, %s6560_s3, %s6561_s20  }
  0x45   :  { %s6562_s17 = smov [#allocation9]   ;;  %s6524_s24 = scalar_lea.hbm %s7937_s11, 352 }
  0x46   :  { %s87_s19 = sshll.u32 %s6562_s17, 4  ;;  %p6525_p4 = scmp.ne.s32.totalorder %s7937_s11, %s6524_s24  ;;  %s88_s19 = int_to_ptr.vmem [resolvable:$true] %s87_s19 }
  0x47   :  { %p6528_p5 = scmp.lt.u32.totalorder %s6524_s24, %s7937_s11 }
  0x49   :  { %p6530_p6 = pnand %p6528_p5, %p6525_p4 }
  0x4b   :  { %6533 = shalt.err (!%p6530_p6)
}
  0x4c   :  { %s6534_s28 = scalar_lea.vmem %s88_s19, 352  ;;  %p6539_p8 = scmp.lt.s32.totalorder %s88_s19, %s88_s19 }
  0x4d   :  { %p6535_p7 = scmp.ne.s32.totalorder %s88_s19, %s6534_s28  ;;  %p6540_p9 = scmp.lt.s32.totalorder %s6534_s28, %s6534_s28 }
  0x4f   :  { %p6541_p10 = por %p6540_p9, %p6539_p8 }
  0x51   :  { %p6542_p11 = pnand %p6541_p10, %p6535_p7 }
  0x53   :  { %6545 = shalt.err (!%p6542_p11)
}
  0x54   :  { %93 = dma.hbm_to_vmem [thread:$0]  %s7937_s11, 352, %s88_s19, [#allocation8], %s6560_s3, %s6560_s3, %s6561_s20  }
  0x55   :  { %6546 = dma.done.wait [#allocation3], 1024  }
  0x56   :  { %6547 = vsyncadd [#allocation3], 4294966272 }
  0x57   :  { %6548 = dma.done.wait [#allocation5], 192  }
  0x58   :  { %6549 = vsyncadd [#allocation5], 4294967104 }
  0x59   :  { %6550 = dma.done.wait [#allocation8], 6496  }
  0x5a   :  { %6551 = vsyncadd [#allocation8], 4294960800  ;;  %vm148_vm0 = vcmask 523264   ;;  %v6693_v0 = vld [vmem:[%s7926_s0] sm:$0xff]  ;;  %v6698_v1 = vld [vmem:[%s7926_s0 + $0x10] sm:$0xff]  ;;  %v6563_v50 = vmov 0.0  }
  0x5b   :  { %v6703_v2 = vld [vmem:[%s7926_s0 + $0x8] sm:$0xff]  ;;  %v149_v3 = vsel %vm148_vm0, %v6693_v0, 0.0  ;;  %v155_v4 = vsel %vm148_vm0, %v6698_v1, 0.0  ;;  %v6712_v5 = vld [vmem:[%s7926_s0 + $0x18] sm:$0xff]  ;;  %v226_v29 = vld [vmem:[%s7931_s5 + $0x20] sm:$0xff]  ;;  %339 = vmatprep.mubr.f32.mxu0 %v6563_v50  ;;  %s6564_s6 = smov 64  }
  0x5c   :  { %150 = vadd.xlane.f32.xlu0 %v149_v3  ;;  %156 = vadd.xlane.f32.xlu1 %v155_v4  ;;  %v152_v6 = vsel %vm148_vm0, %v6703_v2, 0.0  ;;  %v158_v7 = vsel %vm148_vm0, %v6712_v5, 0.0  ;;  %v223_v28 = vld [vmem:[%s7931_s5 + $0x8] sm:$0xff]  ;;  %v222_v31 = vld [vmem:[%s7931_s5] sm:$0xff]  ;;  %v225_v32 = vld [vmem:[%s7931_s5 + $0x18] sm:$0xff]  ;;  %vm610_vm2 = vcmask 130048  }
  0x5d   :  { %v5839_v30 = vpack.c.bf16 %v226_v29, %v223_v28  ;;  %v5841_v33 = vpack.c.bf16 %v225_v32, %v222_v31  ;;  %v229_v34 = vld [vmem:[%s7931_s5 + $0x38] sm:$0xff]  ;;  %v232_v35 = vld [vmem:[%s7931_s5 + $0x50] sm:$0xff]  ;;  %v231_v38 = vld [vmem:[%s7931_s5 + $0x48] sm:$0xff]  ;;  %vm1702_vm3 = vcmask 261120  }
  0x5e   :  { %v5843_v36 = vpack.c.bf16 %v232_v35, %v229_v34  ;;  %v228_v37 = vld [vmem:[%s7931_s5 + $0x30] sm:$0xff]  ;;  %v235_v40 = vld [vmem:[%s7931_s5 + $0x68] sm:$0xff]  ;;  %v238_v41 = vld [vmem:[%s7931_s5 + $0x80] sm:$0xff] }
  0x5f   :  { %5840 = vmatprep.subr.bf16.mxu0 %v5839_v30  ;;  %v5845_v39 = vpack.c.bf16 %v231_v38, %v228_v37  ;;  %v5847_v42 = vpack.c.bf16 %v238_v41, %v235_v40  ;;  %v234_v43 = vld [vmem:[%s7931_s5 + $0x60] sm:$0xff]  ;;  %v237_v44 = vld [vmem:[%s7931_s5 + $0x78] sm:$0xff]  ;;  %v244_v47 = vld [vmem:[%s7931_s5 + $0xb0] sm:$0xff] }
  0x60   :  { %153 = vadd.xlane.f32.xlu0 %v152_v6  ;;  %159 = vadd.xlane.f32.xlu1 %v158_v7  ;;  %v241_v45 = vld [vmem:[%s7931_s5 + $0x98] sm:$0xff]  ;;  %v5849_v46 = vpack.c.bf16 %v237_v44, %v234_v43  ;;  %v240_v48 = vld [vmem:[%s7931_s5 + $0x90] sm:$0xff]  ;;  %v243_v49 = vld [vmem:[%s7931_s5 + $0xa8] sm:$0xff] }
  0x61   :  { %5842 = vmatpush1.bf16.msra.mxu0 %v5841_v33  ;;  %v5851_v51 = vpack.c.bf16 %v244_v47, %v241_v45  ;;  %v5853_v52 = vpack.c.bf16 %v243_v49, %v240_v48  ;;  %v224_v53 = vld [vmem:[%s7931_s5 + $0x10] sm:$0xff]  ;;  %v227_v54 = vld [vmem:[%s7931_s5 + $0x28] sm:$0xff]  ;;  %v137_v56 = vld [vmem:[%s7930_s4] sm:$0xff] }
  0x62   :  { %5844 = vmatprep.subr.bf16.mxu0 %v5843_v36  ;;  %v5855_v55 = vpack.c.bf16 %v227_v54, %v224_v53  ;;  %v138_v57 = vld [vmem:[%s7930_s4 + $0x8] sm:$0xff]  ;;  %v139_v58 = vld [vmem:[%s7930_s4 + $0x10] sm:$0xff]  ;;  %v140_v59 = vld [vmem:[%s7930_s4 + $0x18] sm:$0xff] }
  0x63   :  { %v239_v29 = vld [vmem:[%s7931_s5 + $0x88] sm:$0xff]  ;;  %v242_v34 = vld [vmem:[%s7931_s5 + $0xa0] sm:$0xff]  ;;  %v245_v35 = vld [vmem:[%s7931_s5 + $0xb8] sm:$0xff] }
  0x64   :  { %v5867_v38 = vpack.c.bf16 %v245_v35, %v242_v34  ;;  %vm6892_vm1 = vmpackc.low %vm148_vm0, %vm148_vm0 }
  0x65   :  { %5846 = vmatpush1.bf16.msra.mxu0 %v5845_v39  ;;  %v248_v39 = vlaneseq }
  0x66   :  { %5848 = vmatprep.subr.bf16.mxu0 %v5847_v42  ;;  %v246_v42 = vld [vmem:[#allocation4] sm:$0x7] }
  0x67   :  { %v6846_v40 = vshrl.u32 %v248_v39, 7 }
  0x69   :  { %5850 = vmatpush1.bf16.msra.mxu0 %v5849_v46  ;;  %v254_v41 = vsub.s32 1, %v6846_v40  ;;  %v250_v43 = vsub.s32 0, %v6846_v40 }
  0x6a   :  { %5852 = vmatprep.subr.bf16.mxu0 %v5851_v51 }
  0x6b   :  { %v255_v44 = vrot.slane %v246_v42, %v254_v41  ;;  %v251_v45 = vrot.slane %v246_v42, %v250_v43 }
  0x6d   :  { %5854 = vmatpush1.bf16.msra.mxu0 %v5853_v52 }
  0x6e   :  { %5856 = vmatprep.subr.bf16.mxu0 %v5855_v55 }
  0xe9   :  { %v151_v8 = vpop.xlane.xlu0 %150  ;;  %v157_v9 = vpop.xlane.xlu1 %156 }
  0xea   :  { %v162_v10 = vmul.f32 0.015625, %v151_v8  ;;  %v164_v11 = vmul.f32 0.015625, %v157_v9 }
  0xec   :  { %v6719_v12 = vsub.f32 %v6693_v0, %v162_v10  ;;  %v6722_v13 = vsub.f32 %v6698_v1, %v164_v11 }
  0xed   :  { %v154_v14 = vpop.xlane.xlu0 %153  ;;  %v160_v15 = vpop.xlane.xlu1 %159 }
  0xee   :  { %v163_v16 = vmul.f32 0.015625, %v154_v14  ;;  %v165_v17 = vmul.f32 0.015625, %v160_v15  ;;  %v170_v18 = vmul.f32 %v6719_v12, %v6719_v12  ;;  %v172_v19 = vmul.f32 %v6722_v13, %v6722_v13  ;;  %v4739_v15 = vld [vmem:[#allocation9] ss:$0 sm:$0xff] }
  0xf0   :  { %v6729_v20 = vsub.f32 %v6703_v2, %v163_v16  ;;  %v6732_v21 = vsub.f32 %v6712_v5, %v165_v17  ;;  %v174_v22 = vsel %vm148_vm0, %v170_v18, 0.0  ;;  %v180_v23 = vsel %vm148_vm0, %v172_v19, 0.0  ;;  %v4740_v17 = vld [vmem:[#allocation9 + $0x1] ss:$0 sm:$0xff]  ;;  %v230_v18 = vld [vmem:[%s7931_s5 + $0x40] sm:$0xff]  ;;  %v233_v19 = vld [vmem:[%s7931_s5 + $0x58] sm:$0xff] }
  0xf1   :  { %175 = vadd.xlane.f32.xlu0 %v174_v22 }
  0xf2   :  { %v171_v24 = vmul.f32 %v6729_v20, %v6729_v20  ;;  %v173_v25 = vmul.f32 %v6732_v21, %v6732_v21 }
  0xf4   :  { %v177_v26 = vsel %vm148_vm0, %v171_v24, 0.0  ;;  %v183_v27 = vsel %vm148_vm0, %v173_v25, 0.0 }
  0xf5   :  { %181 = vadd.xlane.f32.xlu0 %v180_v23  ;;  %178 = vadd.xlane.f32.xlu1 %v177_v26 }
  0xf9   :  { %184 = vadd.xlane.f32.xlu1 %v183_v27  ;;  %v5859_v27 = vpack.c.bf16 %v233_v19, %v230_v18 }
 0x10a   :  { %459 = vrot.lane.b32.xlu1 %v138_v57, %s6564_s6 }
 0x10b   :  { %457 = vrot.lane.b32.xlu0 %v137_v56, %s6564_s6 }
 0x10e   :  { %461 = vrot.lane.b32.xlu1 %v139_v58, %s6564_s6 }
 0x112   :  { %463 = vrot.lane.b32.xlu1 %v140_v59, %s6564_s6 }
 0x17e   :  { %v176_v60 = vpop.xlane.xlu0 %175 }
 0x17f   :  { %v186_v61 = vmul.f32 0.015625, %v176_v60 }
 0x181   :  { %v190_v62 = vadd.f32 1e-05, %v186_v61 }
 0x182   :  { %v179_v63 = vpop.xlane.xlu1 %178  ;;  %v182_v3 = vpop.xlane.xlu0 %181 }
 0x183   :  { %6292 = vrsqrt.f32 %v190_v62  ;;  %v187_v4 = vmul.f32 0.015625, %v179_v63  ;;  %v188_v6 = vmul.f32 0.015625, %v182_v3  ;;  %v258_v63 = vsub.s32 2, %v6846_v40 }
 0x185   :  { %v191_v7 = vadd.f32 1e-05, %v187_v4  ;;  %v192_v8 = vadd.f32 1e-05, %v188_v6 }
 0x186   :  { %v185_v9 = vpop.xlane.xlu1 %184  ;;  %v6854_v47 = vpop.permute.xlu0 %457 }
 0x187   :  { %6294 = vrsqrt.f32 %v191_v7  ;;  %v189_v10 = vmul.f32 0.015625, %v185_v9 }
 0x188   :  { %6296 = vrsqrt.f32 %v192_v8 }
 0x189   :  { %v193_v11 = vadd.f32 1e-05, %v189_v10 }
 0x18a   :  { %v6856_v49 = vpop.permute.xlu1 %459 }
 0x18b   :  { %6298 = vrsqrt.f32 %v193_v11  ;;  %v259_v11 = vrot.slane %v246_v42, %v258_v63  ;;  %v6897_v42 = vld [vmem:[#allocation2 + $0x10] sm:$0xff] }
 0x18d   :  { %v6293_v14 = vpop.eup %6292 }
 0x18e   :  { %v198_v16 = vmul.f32 %v6293_v14, %v6719_v12  ;;  %v236_v12 = vld [vmem:[%s7931_s5 + $0x70] sm:$0xff]  ;;  %v6860_v57 = vpop.permute.xlu1 %461 }
 0x18f   :  { %v5863_v33 = vpack.c.bf16 %v239_v29, %v236_v12 }
 0x190   :  { %v208_v22 = vmul.f32 %v4739_v15, %v198_v16 }
 0x191   :  { %v6295_v23 = vpop.eup %6294 }
 0x192   :  { %v6297_v24 = vpop.eup %6296  ;;  %v218_v25 = vadd.f32 %v4740_v17, %v208_v22  ;;  %v199_v26 = vmul.f32 %v6295_v23, %v6729_v20  ;;  %v6869_v10 = vpop.permute.xlu1 %463 }
 0x193   :  { %v200_v28 = vmul.f32 %v6297_v24, %v6722_v13 }
 0x194   :  { %4741 = vmatmul.mubr.msk.f32.vlgmr.msra.gmra.mrb[0].mxu0 %vm148_vm0, %v218_v25  ;;  %v209_v30 = vmul.f32 %v4739_v15, %v199_v26 }
 0x195   :  { %v6299_v31 = vpop.eup %6298  ;;  %5858 = vmatpush3.bf16.msra.mxu0 %v5855_v55  ;;  %345 = vmatprep.mubr.f32.mxu0 %v6563_v50  ;;  %v210_v20 = vmul.f32 %v4739_v15, %v200_v28 }
 0x196   :  { %v219_v32 = vadd.f32 %v4740_v17, %v209_v30  ;;  %5860 = vmatprep.subr.bf16.mxu0 %v5859_v27  ;;  %v201_v13 = vmul.f32 %v6299_v31, %v6732_v21  ;;  %v6883_v30 = vld [vmem:[#allocation2] sm:$0xff]  ;;  %v6885_v31 = vld [vmem:[#allocation2 + $0x8] sm:$0xff] }
 0x197   :  { %v220_v36 = vadd.f32 %v4740_v17, %v210_v20 }
 0x198   :  { %4742 = vmatmul.mubr.msk.f32.gmra.mrb[2].mxu0 %vm148_vm0, %v219_v32  ;;  %v211_v37 = vmul.f32 %v4739_v15, %v201_v13 }
 0x199   :  { %5862 = vmatpush3.bf16.msra.mxu0 %v5859_v27  ;;  %351 = vmatprep.mubr.f32.mxu0 %v6563_v50 }
 0x19a   :  { %5864 = vmatprep.subr.bf16.mxu0 %v5863_v33  ;;  %v221_v21 = vadd.f32 %v4740_v17, %v211_v37 }
 0x19c   :  { %4743 = vmatmul.mubr.msk.f32.gmra.mrb[4].mxu0 %vm148_vm0, %v220_v36 }
 0x19d   :  { %5866 = vmatpush3.bf16.msra.mxu0 %v5863_v33  ;;  %357 = vmatprep.mubr.f32.mxu0 %v6563_v50 }
 0x19e   :  { %5868 = vmatprep.subr.bf16.mxu0 %v5867_v38 }
 0x1a0   :  { %4744 = vmatmul.mubr.msk.f32.gmra.mrb[6].mxu0 %vm148_vm0, %v221_v21 }
 0x1a1   :  { %5870 = vmatpush3.bf16.msra.mxu0 %v5867_v38  ;;  %5303 = vmatprep.mubr.msk.f32.mxu0 %vm148_vm0, %v218_v25 }
 0x1a4   :  { %5304 = vmatmul.mubr.msk.f32.vlgmr.msra.gmra.mrb[8].mxu0 %vm148_vm0, %v219_v32 }
 0x1a5   :  { %5306 = vmatprep.mubr.msk.f32.mxu0 %vm148_vm0, %v220_v36 }
 0x1a8   :  { %5307 = vmatmul.mubr.msk.f32.gmra.mrb[10].mxu0 %vm148_vm0, %v221_v21  ;;  %v3621_v21 = vld [vmem:[#allocation7 + $0x120] sm:$0xff] }
 0x267   :  { %v341_v46 = vpop.f32.mrb[0].mxu0 }
 0x268   :  { %v343_v48 = vpop.f32.mrb[1].mxu0  ;;  %v342_v52 = vadd.f32 %v341_v46, %v251_v45 }
 0x269   :  { %v344_v51 = vadd.f32 %v343_v48, %v255_v44 }
 0x26a   :  { %v469_v61 = vmul.f32 %v6854_v47, %v342_v52  ;;  %v449_v20 = vmul.f32 %v342_v52, %v6883_v30 }
 0x26b   :  { %v347_v53 = vpop.f32.mrb[2].mxu0  ;;  %v497_v54 = vmul.f32 %v6854_v47, %v344_v51  ;;  %v493_v33 = vmul.f32 %v344_v51, %v6883_v30 }
 0x26c   :  { %v349_v55 = vpop.f32.mrb[3].mxu0  ;;  %v348_v58 = vadd.f32 %v347_v53, %v251_v45 }
 0x26d   :  { %v350_v56 = vadd.f32 %v349_v55, %v255_v44  ;;  %505 = vrot.lane.b32.xlu0 %v497_v54, %s6564_s6 }
 0x26e   :  { %v470_v7 = vmul.f32 %v6856_v49, %v348_v58  ;;  %v450_v55 = vmul.f32 %v348_v58, %v6885_v31 }
 0x26f   :  { %v353_v59 = vpop.f32.mrb[4].mxu0  ;;  %v498_v60 = vmul.f32 %v6856_v49, %v350_v56  ;;  %v494_v13 = vmul.f32 %v350_v56, %v6885_v31 }
 0x270   :  { %v355_v62 = vpop.f32.mrb[5].mxu0  ;;  %v354_v4 = vadd.f32 %v353_v59, %v251_v45 }
 0x271   :  { %v356_v3 = vadd.f32 %v355_v62, %v255_v44  ;;  %507 = vrot.lane.b32.xlu1 %v498_v60, %s6564_s6  ;;  %477 = vrot.lane.b32.xlu0 %v469_v61, %s6564_s6 }
 0x272   :  { %v471_v18 = vmul.f32 %v6860_v57, %v354_v4  ;;  %v451_v48 = vmul.f32 %v354_v4, %v6897_v42 }
 0x273   :  { %v359_v6 = vpop.f32.mrb[6].mxu0  ;;  %v499_v8 = vmul.f32 %v6860_v57, %v356_v3  ;;  %v495_v51 = vmul.f32 %v356_v3, %v6897_v42 }
 0x274   :  { %v361_v9 = vpop.f32.mrb[7].mxu0  ;;  %v360_v15 = vadd.f32 %v359_v6, %v251_v45 }
 0x275   :  { %v362_v14 = vadd.f32 %v361_v9, %v255_v44  ;;  %479 = vrot.lane.b32.xlu1 %v470_v7, %s6564_s6  ;;  %509 = vrot.lane.b32.xlu0 %v499_v8, %s6564_s6  ;;  %v6899_v44 = vld [vmem:[#allocation2 + $0x18] sm:$0xff] }
 0x276   :  { %v472_v26 = vmul.f32 %v6869_v10, %v360_v15  ;;  %v452_v58 = vmul.f32 %v360_v15, %v6899_v44 }
 0x277   :  { %v5305_v16 = vpop.f32.mrb[8].mxu0  ;;  %v500_v17 = vmul.f32 %v6869_v10, %v362_v14  ;;  %v496_v52 = vmul.f32 %v362_v14, %v6899_v44 }
 0x278   :  { %v436_v19 = vadd.f32 %v5305_v16, %v259_v11  ;;  %v430_v22 = vpop.f32.mrb[9].mxu0 }
 0x279   :  { %v431_v23 = vadd.f32 %v430_v22, %v259_v11  ;;  %511 = vrot.lane.b32.xlu1 %v500_v17, %s6564_s6  ;;  %481 = vrot.lane.b32.xlu0 %v471_v18, %s6564_s6 }
 0x27b   :  { %v5877_v24 = vpack.c.bf16 %v436_v19, %v431_v23  ;;  %v5308_v25 = vpop.f32.mrb[10].mxu0 }
 0x27c   :  { %v446_v27 = vadd.f32 %v5308_v25, %v259_v11  ;;  %v440_v28 = vpop.f32.mrb[11].mxu0 }
 0x27d   :  { %v441_v12 = vadd.f32 %v440_v28, %v259_v11  ;;  %483 = vrot.lane.b32.xlu1 %v472_v26, %s6564_s6 }
 0x27f   :  { %v6881_v29 = vpack.c.bf16 %v446_v27, %v441_v12 }
 0x2df   :  { %v506_v32 = vpop.permute.xlu0 %505 }
 0x2e0   :  { %v517_v36 = vadd.f32 %v506_v32, %v493_v33 }
 0x2e3   :  { %v508_v34 = vpop.permute.xlu1 %507  ;;  %v478_v35 = vpop.permute.xlu0 %477 }
 0x2e4   :  { %v518_v37 = vadd.f32 %v508_v34, %v494_v13  ;;  %v489_v38 = vadd.f32 %v478_v35, %v449_v20 }
 0x2e6   :  { %5313 = vmatprep.mubr.msk.f32.mxu1 %vm148_vm0, %v489_v38  ;;  %v5871_v39 = vpack.c.bf16 %v518_v37, %v517_v36 }
 0x2e7   :  { %v480_v45 = vpop.permute.xlu1 %479  ;;  %v510_v46 = vpop.permute.xlu0 %509 }
 0x2e8   :  { %5873 = vmatprep.subr.msk.bf16.mxu1 %vm6892_vm1, %v5871_v39  ;;  %v519_v56 = vadd.f32 %v510_v46, %v495_v51  ;;  %v490_v61 = vadd.f32 %v480_v45, %v450_v55  ;;  %v906_v51 = vld [vmem:[#allocation7] sm:$0xff]  ;;  %v909_v55 = vld [vmem:[#allocation7 + $0x18] sm:$0xff] }
 0x2e9   :  { %5876 = vmatpush3.bf16.xpose.msk.msra.mxu1 %vm6892_vm1, %v5871_v39 }
 0x2ea   :  { %5878 = vmatprep.subr.bf16.mxu1 %v5877_v24 }
 0x2eb   :  { %v512_v53 = vpop.permute.xlu1 %511  ;;  %v482_v54 = vpop.permute.xlu0 %481 }
 0x2ec   :  { %v520_v59 = vadd.f32 %v512_v53, %v496_v52  ;;  %v491_v60 = vadd.f32 %v482_v54, %v451_v48  ;;  %v907_v52 = vld [vmem:[#allocation7 + $0x8] sm:$0xff]  ;;  %v908_v53 = vld [vmem:[#allocation7 + $0x10] sm:$0xff] }
 0x2ed   :  { %v5891_v54 = vpack.c.bf16 %v907_v52, %v906_v51 }
 0x2ee   :  { %v5881_v62 = vpack.c.bf16 %v520_v59, %v519_v56  ;;  %5327 = vmatprep.mubr.msk.f32.mxu0 %vm148_vm0, %v491_v60  ;;  %v5895_v56 = vpack.c.bf16 %v909_v55, %v908_v53  ;;  %v910_v59 = vld [vmem:[#allocation7 + $0x20] sm:$0xff]  ;;  %v911_v60 = vld [vmem:[#allocation7 + $0x28] sm:$0xff] }
 0x2ef   :  { %v484_v3 = vpop.permute.xlu1 %483 }
 0x2f0   :  { %5314 = vmatmul.mubr.msk.f32.vlgmr.msra.gmra.mrb[0].mxu1 %vm148_vm0, %v490_v61  ;;  %5883 = vmatprep.subr.msk.bf16.mxu0 %vm6892_vm1, %v5881_v62  ;;  %v492_v4 = vadd.f32 %v484_v3, %v452_v58  ;;  %v5899_v61 = vpack.c.bf16 %v911_v60, %v910_v59  ;;  %v913_v3 = vld [vmem:[#allocation7 + $0x38] sm:$0xff] }
 0x2f1   :  { %5880 = vmatpush3.bf16.msra.mxu1 %v5877_v24  ;;  %5886 = vmatpush3.bf16.xpose.msk.msra.mxu0 %vm6892_vm1, %v5881_v62  ;;  %v912_v62 = vld [vmem:[#allocation7 + $0x30] sm:$0xff] }
 0x2f2   :  { %5888 = vmatprep.subr.bf16.mxu1 %v6881_v29  ;;  %5892 = vmatprep.subr.bf16.mxu0 %v5891_v54  ;;  %v5903_v58 = vpack.c.bf16 %v913_v3, %v912_v62 }
 0x2f8   :  { %5328 = vmatmul.mubr.msk.f32.vlgmr.msra.gmra.mrb[12].mxu0 %vm148_vm0, %v492_v4 }
 0x2f9   :  { %5894 = vmatpush3.bf16.msra.mxu0 %v5891_v54 }
 0x2fa   :  { %5896 = vmatprep.subr.bf16.mxu0 %v5895_v56 }
 0x2fd   :  { %5898 = vmatpush3.bf16.msra.mxu0 %v5895_v56 }
 0x2fe   :  { %5900 = vmatprep.subr.bf16.mxu0 %v5899_v61 }
 0x301   :  { %5902 = vmatpush3.bf16.msra.mxu0 %v5899_v61 }
 0x302   :  { %5904 = vmatprep.subr.bf16.mxu0 %v5903_v58 }
 0x305   :  { %5906 = vmatpush3.bf16.msra.mxu0 %v5903_v58 }
 0x3c3   :  { %v5315_v6 = vpop.f32.mrb[0].mxu1 }
 0x3c4   :  { %v609_v7 = vmul.f32 0.125, %v5315_v6  ;;  %v599_v8 = vpop.f32.mrb[1].mxu1 }
 0x3c5   :  { %v608_v9 = vmul.f32 0.125, %v599_v8 }
 0x3c6   :  { %v614_v11 = vsel %vm610_vm2, %v609_v7, -inf }
 0x3c7   :  { %615 = vmax.xlane.f32.xlu1 %v614_v11  ;;  %v611_v14 = vsel %vm610_vm2, %v608_v9, -inf }
 0x3c8   :  { %612 = vmax.xlane.f32.xlu0 %v611_v14 }
 0x3cb   :  { %v5329_v16 = vpop.f32.mrb[12].mxu0 }
 0x3cc   :  { %v792_v17 = vpop.f32.mrb[13].mxu0  ;;  %v802_v19 = vmul.f32 0.125, %v5329_v16 }
 0x3cd   :  { %v801_v18 = vmul.f32 0.125, %v792_v17 }
 0x3ce   :  { %v806_v22 = vsel %vm610_vm2, %v802_v19, -inf }
 0x3cf   :  { %v803_v15 = vsel %vm610_vm2, %v801_v18, -inf }
 0x3d0   :  { %804 = vmax.xlane.f32.xlu0 %v803_v15 }
 0x3d4   :  { %807 = vmax.xlane.f32.xlu0 %v806_v22  ;;  %v4773_v22 = vld [vmem:[%s7933_s7 + $0x40] sm:$0xff] }
 0x454   :  { %v616_v23 = vpop.xlane.xlu1 %615 }
 0x455   :  { %v618_v24 = vsub.f32 %v609_v7, %v616_v23  ;;  %v613_v25 = vpop.xlane.xlu0 %612  ;;  %v4774_v23 = vld [vmem:[%s7933_s7 + $0x48] sm:$0xff] }
 0x456   :  { %v617_v26 = vsub.f32 %v608_v9, %v613_v25  ;;  %v4776_v25 = vld [vmem:[%s7933_s7 + $0x58] sm:$0xff] }
 0x457   :  { %v621_v27 = vmul.f32 1.442695, %v618_v24  ;;  %v5923_v24 = vpack.c.bf16 %v4774_v23, %v4773_v22 }
 0x458   :  { %v619_v28 = vmul.f32 1.442695, %v617_v26 }
 0x459   :  { %6300 = vpow2.f32 %v621_v27  ;;  %5924 = vmatprep.subr.bf16.mxu0 %v5923_v24 }
 0x45a   :  { %6302 = vpow2.f32 %v619_v28 }
 0x45d   :  { %v805_v12 = vpop.xlane.xlu0 %804 }
 0x45e   :  { %v809_v32 = vsub.f32 %v801_v18, %v805_v12  ;;  %v4777_v12 = vld [vmem:[%s7933_s7 + $0x60] sm:$0xff] }
 0x460   :  { %v811_v20 = vmul.f32 1.442695, %v809_v32  ;;  %v4778_v32 = vld [vmem:[%s7933_s7 + $0x68] sm:$0xff] }
 0x461   :  { %v808_v33 = vpop.xlane.xlu0 %807 }
 0x462   :  { %6304 = vpow2.f32 %v811_v20  ;;  %v810_v13 = vsub.f32 %v802_v19, %v808_v33  ;;  %v5931_v20 = vpack.c.bf16 %v4778_v32, %v4777_v12  ;;  %v4779_v33 = vld [vmem:[%s7933_s7 + $0x70] sm:$0xff] }
 0x463   :  { %v6301_v34 = vpop.eup %6300 }
 0x464   :  { %v6303_v35 = vpop.eup %6302  ;;  %v813_v36 = vmul.f32 1.442695, %v810_v13  ;;  %v626_v37 = vsel %vm610_vm2, %v6301_v34, 0.0  ;;  %v4780_v13 = vld [vmem:[%s7933_s7 + $0x78] sm:$0xff] }
 0x465   :  { %627 = vadd.xlane.f32.xlu1 %v626_v37  ;;  %v623_v38 = vsel %vm610_vm2, %v6303_v35, 0.0  ;;  %v113_v37 = vld [vmem:[%s7927_s1] sm:$0xff] }
 0x466   :  { %6306 = vpow2.f32 %v813_v36  ;;  %624 = vadd.xlane.f32.xlu0 %v623_v38  ;;  %v114_v38 = vld [vmem:[%s7927_s1 + $0x8] sm:$0xff] }
 0x46c   :  { %v6305_v39 = vpop.eup %6304 }
 0x46d   :  { %v815_v45 = vsel %vm610_vm2, %v6305_v39, 0.0 }
 0x46e   :  { %816 = vadd.xlane.f32.xlu0 %v815_v45  ;;  %v116_v45 = vld [vmem:[%s7927_s1 + $0x18] sm:$0xff] }
 0x470   :  { %v6307_v46 = vpop.eup %6306 }
 0x471   :  { %v818_v48 = vsel %vm610_vm2, %v6307_v46, 0.0 }
 0x472   :  { %819 = vadd.xlane.f32.xlu1 %v818_v48  ;;  %v4765_v48 = vld [vmem:[#allocation9 + $0x6] ss:$0 sm:$0xff] }
 0x4f2   :  { %v628_v4 = vpop.xlane.xlu1 %627 }
 0x4f3   :  { %6308 = vrcp.f32 %v628_v4  ;;  %v625_v6 = vpop.xlane.xlu0 %624 }
 0x4f4   :  { %6310 = vrcp.f32 %v625_v6 }
 0x4fb   :  { %v817_v7 = vpop.xlane.xlu0 %816 }
 0x4fc   :  { %6312 = vrcp.f32 %v817_v7 }
 0x4fd   :  { %v6309_v8 = vpop.eup %6308 }
 0x4fe   :  { %v6311_v9 = vpop.eup %6310  ;;  %v632_v16 = vmul.f32 %v6309_v8, %v6301_v34  ;;  %v5935_v34 = vpack.c.bf16 %v4780_v13, %v4779_v33 }
 0x4ff   :  { %v820_v11 = vpop.xlane.xlu1 %819  ;;  %v631_v14 = vmul.f32 %v6311_v9, %v6303_v35  ;;  %v118_v9 = vld [vmem:[%s7927_s1 + $0x28] sm:$0xff] }
 0x500   :  { %6314 = vrcp.f32 %v820_v11 }
 0x501   :  { %5320 = vmatprep.mubr.msk.f32.mxu1 %vm610_vm2, %v631_v14 }
 0x502   :  { %5321 = vmatmul.mubr.msk.f32.vlgmr.msra.gmra.mrb[2].mxu1 %vm610_vm2, %v632_v16 }
 0x503   :  { %5890 = vmatpush3.bf16.msra.mxu1 %v6881_v29  ;;  %v4775_v29 = vld [vmem:[%s7933_s7 + $0x50] sm:$0xff] }
 0x504   :  { %v5927_v28 = vpack.c.bf16 %v4776_v25, %v4775_v29 }
 0x506   :  { %v6313_v17 = vpop.eup %6312 }
 0x507   :  { %v823_v18 = vmul.f32 %v6313_v17, %v6305_v39  ;;  %v115_v39 = vld [vmem:[%s7927_s1 + $0x10] sm:$0xff] }
 0x509   :  { %5334 = vmatprep.mubr.msk.f32.mxu1 %vm610_vm2, %v823_v18 }
 0x50a   :  { %v6315_v19 = vpop.eup %6314 }
 0x50b   :  { %v824_v15 = vmul.f32 %v6315_v19, %v6307_v46 }
 0x50d   :  { %5335 = vmatmul.mubr.msk.f32.vlgmr.msra.gmra.mrb[4].mxu1 %vm610_vm2, %v824_v15 }
 0x5d5   :  { %v5322_v26 = vpop.f32.mrb[2].mxu1 }
 0x5d6   :  { %v705_v27 = vpop.f32.mrb[3].mxu1 }
 0x5d7   :  { %5353 = vmatprep.mubr.msk.f32.mxu0 %vm148_vm0, %v705_v27 }
 0x5d8   :  { %5354 = vmatmul.mubr.msk.f32.vlgmr.msra.gmra.mrb[14].mxu0 %vm148_vm0, %v5322_v26 }
 0x5d9   :  { %5926 = vmatpush3.bf16.msra.mxu0 %v5923_v24 }
 0x5da   :  { %5928 = vmatprep.subr.bf16.mxu0 %v5927_v28 }
 0x5dd   :  { %5930 = vmatpush3.bf16.msra.mxu0 %v5927_v28 }
 0x5de   :  { %5932 = vmatprep.subr.bf16.mxu0 %v5931_v20 }
 0x5e0   :  { %v5336_v35 = vpop.f32.mrb[4].mxu1 }
 0x5e1   :  { %5934 = vmatpush3.bf16.msra.mxu0 %v5931_v20  ;;  %v897_v36 = vpop.f32.mrb[5].mxu1 }
 0x5e2   :  { %5356 = vmatprep.mubr.msk.f32.mxu0 %vm148_vm0, %v897_v36  ;;  %5936 = vmatprep.subr.bf16.mxu0 %v5935_v34 }
 0x5e3   :  { %5357 = vmatmul.mubr.msk.f32.gmra.mrb[16].mxu0 %vm148_vm0, %v5336_v35  ;;  %v1104_v35 = vld [vmem:[%s7933_s7 + $0x8] sm:$0xff] }
 0x5e4   :  { %5397 = vmatprep.mubr.msk.f32.mxu0 %vm148_vm0, %v113_v37  ;;  %v1105_v37 = vld [vmem:[%s7933_s7 + $0x10] sm:$0xff] }
 0x5e5   :  { %5938 = vmatpush3.bf16.msra.mxu0 %v5935_v34  ;;  %v1103_v34 = vld [vmem:[%s7933_s7] sm:$0xff] }
 0x5e6   :  { %v5907_v36 = vpack.c.bf16 %v1104_v35, %v1103_v34 }
 0x5e8   :  { %5398 = vmatmul.mubr.msk.f32.vlgmr.msra.gmra.mrb[18].mxu0 %vm148_vm0, %v114_v38  ;;  %5908 = vmatprep.subr.bf16.mxu1 %v5907_v36  ;;  %v1106_v38 = vld [vmem:[%s7933_s7 + $0x18] sm:$0xff] }
 0x5e9   :  { %5400 = vmatprep.mubr.msk.f32.mxu0 %vm148_vm0, %v115_v39  ;;  %5910 = vmatpush3.bf16.msra.mxu1 %v5907_v36  ;;  %v5911_v39 = vpack.c.bf16 %v1106_v38, %v1105_v37  ;;  %v4766_v37 = vld [vmem:[#allocation9 + $0x2] ss:$0 sm:$0xff] }
 0x5eb   :  { %5912 = vmatprep.subr.bf16.mxu1 %v5911_v39 }
 0x5ec   :  { %5401 = vmatmul.mubr.msk.f32.gmra.mrb[20].mxu0 %vm148_vm0, %v116_v45  ;;  %v142_v45 = vld [vmem:[%s7930_s4 + $0x28] sm:$0xff] }
 0x5ed   :  { %5914 = vmatpush3.bf16.msra.mxu1 %v5911_v39 }
 0x6ab   :  { %v5355_v46 = vpop.f32.mrb[14].mxu0 }
 0x6ac   :  { %v1012_v51 = vadd.f32 %v5355_v46, %v6703_v2  ;;  %v992_v52 = vpop.f32.mrb[15].mxu0  ;;  %v1107_v46 = vld [vmem:[%s7933_s7 + $0x20] sm:$0xff] }
 0x6ad   :  { %v1011_v53 = vadd.f32 %v992_v52, %v6693_v0  ;;  %v7051_v52 = vld [vmem:[#allocation6 + $0x1] ss:$0 sm:$0xff] }
 0x6ae   :  { %v6977_v54 = vadd.f32 %v4765_v48, %v1012_v51 }
 0x6af   :  { %v6979_v55 = vadd.f32 %v4765_v48, %v1011_v53  ;;  %v143_v53 = vld [vmem:[%s7930_s4 + $0x30] sm:$0xff] }
 0x6b0   :  { %v1034_v56 = vsel %vm148_vm0, %v6977_v54, 0.0 }
 0x6b1   :  { %1035 = vadd.xlane.f32.xlu1 %v1034_v56  ;;  %v1031_v59 = vsel %vm148_vm0, %v6979_v55, 0.0  ;;  %v141_v56 = vld [vmem:[%s7930_s4 + $0x20] sm:$0xff] }
 0x6b2   :  { %1032 = vadd.xlane.f32.xlu0 %v1031_v59  ;;  %v1109_v59 = vld [vmem:[%s7933_s7 + $0x30] sm:$0xff] }
 0x6b6   :  { %v5358_v60 = vpop.f32.mrb[16].mxu0 }
 0x6b7   :  { %v1014_v61 = vadd.f32 %v5358_v60, %v6712_v5  ;;  %v1002_v62 = vpop.f32.mrb[17].mxu0  ;;  %v1110_v60 = vld [vmem:[%s7933_s7 + $0x38] sm:$0xff] }
 0x6b8   :  { %v1013_v2 = vadd.f32 %v1002_v62, %v6698_v1  ;;  %v117_v1 = vld [vmem:[%s7927_s1 + $0x20] sm:$0xff]  ;;  %v5919_v62 = vpack.c.bf16 %v1110_v60, %v1109_v59 }
 0x6b9   :  { %v6987_v3 = vadd.f32 %v4765_v48, %v1014_v61  ;;  %5403 = vmatprep.mubr.msk.f32.mxu0 %vm148_vm0, %v117_v1 }
 0x6ba   :  { %v6989_v0 = vadd.f32 %v4765_v48, %v1013_v2  ;;  %5404 = vmatmul.mubr.msk.f32.gmra.mrb[22].mxu0 %vm148_vm0, %v118_v9  ;;  %v1108_v48 = vld [vmem:[%s7933_s7 + $0x28] sm:$0xff]  ;;  %v144_v2 = vld [vmem:[%s7930_s4 + $0x38] sm:$0xff] }
 0x6bb   :  { %v5399_v58 = vpop.f32.mrb[18].mxu0  ;;  %v1040_v4 = vsel %vm148_vm0, %v6987_v3, 0.0  ;;  %v5915_v51 = vpack.c.bf16 %v1108_v48, %v1107_v46 }
 0x6bc   :  { %v1322_v6 = vpop.f32.mrb[19].mxu0  ;;  %1041 = vadd.xlane.f32.xlu1 %v1040_v4  ;;  %v1037_v7 = vsel %vm148_vm0, %v6989_v0, 0.0  ;;  %v1328_v4 = vadd.f32 %v5399_v58, %v7051_v52  ;;  %v119_v58 = vld [vmem:[%s7927_s1 + $0x30] sm:$0xff] }
 0x6bd   :  { %1038 = vadd.xlane.f32.xlu0 %v1037_v7  ;;  %5916 = vmatprep.subr.bf16.mxu1 %v5915_v51  ;;  %v7066_v61 = vadd.f32 %v7051_v52, %v1322_v6 }
 0x6be   :  { %5918 = vmatpush3.bf16.msra.mxu1 %v5915_v51  ;;  %v1560_v6 = vmul.f32 %v1328_v4, %v6856_v49  ;;  %5406 = vmatprep.mubr.msk.f32.mxu0 %vm148_vm0, %v119_v58 }
 0x6bf   :  { %v6995_v8 = vpop.f32.mrb[20].mxu0  ;;  %5920 = vmatprep.subr.bf16.mxu1 %v5919_v62  ;;  %v1559_v7 = vmul.f32 %v7066_v61, %v6854_v47 }
 0x6c0   :  { %v1332_v5 = vpop.f32.mrb[21].mxu0  ;;  %v1338_v9 = vadd.f32 %v6995_v8, %v7051_v52 }
 0x6c1   :  { %v1333_v1 = vadd.f32 %v7051_v52, %v1332_v5 }
 0x6c2   :  { %5922 = vmatpush3.bf16.msra.mxu1 %v5919_v62  ;;  %v1562_v8 = vmul.f32 %v1338_v9, %v6869_v10 }
 0x6c3   :  { %v1561_v5 = vmul.f32 %v1333_v1, %v6860_v57 }
 0x73e   :  { %v1036_v11 = vpop.xlane.xlu1 %1035 }
 0x73f   :  { %v1044_v14 = vmul.f32 0.015625, %v1036_v11  ;;  %v1033_v16 = vpop.xlane.xlu0 %1032  ;;  %v120_v11 = vld [vmem:[%s7927_s1 + $0x38] sm:$0xff] }
 0x740   :  { %v1043_v17 = vmul.f32 0.015625, %v1033_v16  ;;  %5407 = vmatmul.mubr.msk.f32.gmra.mrb[24].mxu0 %vm148_vm0, %v120_v11 }
 0x741   :  { %v7006_v18 = vsub.f32 %v6977_v54, %v1044_v14 }
 0x742   :  { %v7009_v19 = vsub.f32 %v6979_v55, %v1043_v17 }
 0x743   :  { %v1052_v15 = vmul.f32 %v7006_v18, %v7006_v18 }
 0x744   :  { %v1051_v22 = vmul.f32 %v7009_v19, %v7009_v19 }
 0x745   :  { %v1058_v23 = vsel %vm148_vm0, %v1052_v15, 0.0 }
 0x746   :  { %1059 = vadd.xlane.f32.xlu1 %v1058_v23  ;;  %v1055_v24 = vsel %vm148_vm0, %v1051_v22, 0.0 }
 0x747   :  { %1056 = vadd.xlane.f32.xlu0 %v1055_v24 }
 0x749   :  { %v1042_v29 = vpop.xlane.xlu1 %1041 }
 0x74a   :  { %v1046_v25 = vmul.f32 0.015625, %v1042_v29  ;;  %v1039_v26 = vpop.xlane.xlu0 %1038 }
 0x74b   :  { %v1045_v27 = vmul.f32 0.015625, %v1039_v26 }
 0x74c   :  { %v7018_v28 = vsub.f32 %v6987_v3, %v1046_v25 }
 0x74d   :  { %v7021_v12 = vsub.f32 %v6989_v0, %v1045_v27 }
 0x74e   :  { %v1054_v32 = vmul.f32 %v7018_v28, %v7018_v28 }
 0x74f   :  { %v1053_v20 = vmul.f32 %v7021_v12, %v7021_v12 }
 0x750   :  { %v1064_v33 = vsel %vm148_vm0, %v1054_v32, 0.0 }
 0x751   :  { %1065 = vadd.xlane.f32.xlu1 %v1064_v33  ;;  %v1061_v13 = vsel %vm148_vm0, %v1053_v20, 0.0 }
 0x752   :  { %1062 = vadd.xlane.f32.xlu0 %v1061_v13 }
 0x762   :  { %1549 = vrot.lane.b32.xlu1 %v142_v45, %s6564_s6 }
 0x766   :  { %1551 = vrot.lane.b32.xlu1 %v143_v53, %s6564_s6  ;;  %v4767_v53 = vld [vmem:[#allocation9 + $0x3] ss:$0 sm:$0xff] }
 0x768   :  { %1547 = vrot.lane.b32.xlu0 %v141_v56, %s6564_s6 }
 0x76a   :  { %1553 = vrot.lane.b32.xlu1 %v144_v2, %s6564_s6 }
 0x76c   :  { %1575 = vrot.lane.b32.xlu0 %v1559_v7, %s6564_s6 }
 0x76e   :  { %1577 = vrot.lane.b32.xlu1 %v1560_v6, %s6564_s6  ;;  %v1536_v6 = vmul.f32 %v1328_v4, %v6885_v31 }
 0x770   :  { %1579 = vrot.lane.b32.xlu0 %v1561_v5, %s6564_s6  ;;  %v1537_v5 = vmul.f32 %v1333_v1, %v6897_v42 }
 0x772   :  { %1581 = vrot.lane.b32.xlu1 %v1562_v8, %s6564_s6 }
 0x78d   :  { %v5405_v14 = vpop.f32.mrb[22].mxu0 }
 0x78e   :  { %v1342_v16 = vpop.f32.mrb[23].mxu0  ;;  %v1348_v32 = vadd.f32 %v5405_v14, %v7051_v52 }
 0x78f   :  { %v1343_v33 = vadd.f32 %v7051_v52, %v1342_v16 }
 0x7d3   :  { %v1060_v17 = vpop.xlane.xlu1 %1059 }
 0x7d4   :  { %v1068_v15 = vmul.f32 0.015625, %v1060_v17  ;;  %v1057_v22 = vpop.xlane.xlu0 %1056 }
 0x7d5   :  { %v1067_v23 = vmul.f32 0.015625, %v1057_v22 }
 0x7d6   :  { %v1072_v24 = vadd.f32 1e-05, %v1068_v15  ;;  %v1538_v15 = vmul.f32 %v1338_v9, %v6899_v44 }
 0x7d7   :  { %v1071_v29 = vadd.f32 1e-05, %v1067_v23 }
 0x7d8   :  { %6316 = vrsqrt.f32 %v1072_v24 }
 0x7d9   :  { %6318 = vrsqrt.f32 %v1071_v29 }
 0x7de   :  { %v1066_v25 = vpop.xlane.xlu1 %1065 }
 0x7df   :  { %v1070_v26 = vmul.f32 0.015625, %v1066_v25  ;;  %v1063_v27 = vpop.xlane.xlu0 %1062 }
 0x7e0   :  { %v1069_v20 = vmul.f32 0.015625, %v1063_v27 }
 0x7e1   :  { %v1074_v13 = vadd.f32 1e-05, %v1070_v26 }
 0x7e2   :  { %v6317_v34 = vpop.eup %6316  ;;  %v1073_v35 = vadd.f32 1e-05, %v1069_v20  ;;  %v7097_v36 = vpop.permute.xlu1 %1549  ;;  %v134_v20 = vld [vmem:[#allocation2 + $0x28] sm:$0xff] }
 0x7e3   :  { %v6319_v38 = vpop.eup %6318  ;;  %v1080_v39 = vmul.f32 %v6317_v34, %v7006_v18  ;;  %6320 = vrsqrt.f32 %v1074_v13  ;;  %v7100_v45 = vpop.permute.xlu0 %1547  ;;  %v1564_v46 = vmul.f32 %v7097_v36, %v1348_v32  ;;  %v133_v13 = vld [vmem:[#allocation2 + $0x20] sm:$0xff]  ;;  %v1540_v34 = vmul.f32 %v1348_v32, %v134_v20 }
 0x7e4   :  { %6322 = vrsqrt.f32 %v1073_v35  ;;  %v1079_v48 = vmul.f32 %v6319_v38, %v7009_v19  ;;  %v1563_v51 = vmul.f32 %v7100_v45, %v1343_v33  ;;  %v1535_v19 = vmul.f32 %v7066_v61, %v6883_v30 }
 0x7e5   :  { %v1090_v56 = vmul.f32 %v4766_v37, %v1080_v39  ;;  %1585 = vrot.lane.b32.xlu1 %v1564_v46, %s6564_s6  ;;  %v1539_v35 = vmul.f32 %v1343_v33, %v133_v13 }
 0x7e6   :  { %v7106_v59 = vpop.permute.xlu1 %1551  ;;  %v1089_v60 = vmul.f32 %v4766_v37, %v1079_v48  ;;  %1583 = vrot.lane.b32.xlu0 %v1563_v51, %s6564_s6  ;;  %v4768_v51 = vld [vmem:[#allocation6] ss:$0 sm:$0xff] }
 0x7e7   :  { %v1100_v62 = vadd.f32 %v4767_v53, %v1090_v56  ;;  %v1576_v2 = vpop.permute.xlu0 %1575 }
 0x7e8   :  { %v1099_v18 = vadd.f32 %v4767_v53, %v1089_v60  ;;  %v1599_v16 = vadd.f32 %v1576_v2, %v1535_v19 }
 0x7ea   :  { %v7109_v7 = vpop.permute.xlu1 %1553  ;;  %5375 = vmatprep.mubr.msk.f32.mxu1 %vm148_vm0, %v1099_v18 }
 0x7eb   :  { %5376 = vmatmul.mubr.msk.f32.vlgmr.msra.gmra.mrb[6].mxu1 %vm148_vm0, %v1100_v62  ;;  %v1580_v23 = vpop.permute.xlu0 %1579 }
 0x7ec   :  { %v1601_v26 = vadd.f32 %v1580_v23, %v1537_v5 }
 0x7ed   :  { %v6321_v58 = vpop.eup %6320 }
 0x7ee   :  { %v6323_v11 = vpop.eup %6322  ;;  %v1578_v8 = vpop.permute.xlu1 %1577  ;;  %v1082_v14 = vmul.f32 %v6321_v58, %v7018_v28 }
 0x7ef   :  { %v1600_v17 = vadd.f32 %v1578_v8, %v1536_v6  ;;  %v1081_v22 = vmul.f32 %v6323_v11, %v7021_v12 }
 0x7f0   :  { %v1092_v24 = vmul.f32 %v4766_v37, %v1082_v14 }
 0x7f1   :  { %v5955_v61 = vpack.c.bf16 %v1600_v17, %v1599_v16  ;;  %v1091_v29 = vmul.f32 %v4766_v37, %v1081_v22 }
 0x7f2   :  { %v1582_v25 = vpop.permute.xlu1 %1581  ;;  %v1102_v28 = vadd.f32 %v4767_v53, %v1092_v24  ;;  %v135_v24 = vld [vmem:[#allocation2 + $0x30] sm:$0xff] }
 0x7f3   :  { %v1602_v4 = vadd.f32 %v1582_v25, %v1538_v15  ;;  %5957 = vmatprep.subr.msk.bf16.mxu0 %vm6892_vm1, %v5955_v61  ;;  %v1101_v1 = vadd.f32 %v4767_v53, %v1091_v29  ;;  %v136_v15 = vld [vmem:[#allocation2 + $0x38] sm:$0xff] }
 0x7f4   :  { %5960 = vmatpush3.bf16.xpose.msk.msra.mxu0 %vm6892_vm1, %v5955_v61 }
 0x7f5   :  { %v5961_v27 = vpack.c.bf16 %v1602_v4, %v1601_v26  ;;  %5378 = vmatprep.mubr.msk.f32.mxu1 %vm148_vm0, %v1101_v1 }
 0x7f6   :  { %5379 = vmatmul.mubr.msk.f32.gmra.mrb[8].mxu1 %vm148_vm0, %v1102_v28 }
 0x7f7   :  { %5963 = vmatprep.subr.msk.bf16.mxu0 %vm6892_vm1, %v5961_v27 }
 0x7fc   :  { %5966 = vmatpush3.bf16.xpose.msk.msra.mxu0 %vm6892_vm1, %v5961_v27 }
 0x813   :  { %v5408_v12 = vpop.f32.mrb[24].mxu0 }
 0x814   :  { %v1352_v9 = vpop.f32.mrb[25].mxu0  ;;  %v1358_v18 = vadd.f32 %v5408_v12, %v7051_v52 }
 0x815   :  { %v1353_v33 = vadd.f32 %v7051_v52, %v1352_v9 }
 0x816   :  { %v1566_v19 = vmul.f32 %v7109_v7, %v1358_v18  ;;  %v1542_v25 = vmul.f32 %v1358_v18, %v136_v15 }
 0x817   :  { %v1565_v6 = vmul.f32 %v7106_v59, %v1353_v33  ;;  %v1541_v4 = vmul.f32 %v1353_v33, %v135_v24  ;;  %v125_v33 = vld [vmem:[%s7928_s2 + $0x20] sm:$0xff] }
 0x857   :  { %v1586_v37 = vpop.permute.xlu1 %1585 }
 0x858   :  { %v1604_v38 = vadd.f32 %v1586_v37, %v1540_v34  ;;  %v1584_v39 = vpop.permute.xlu0 %1583  ;;  %v1363_v37 = vld [vmem:[#allocation7 + $0x48] sm:$0xff] }
 0x859   :  { %v1603_v46 = vadd.f32 %v1584_v39, %v1539_v35  ;;  %v1362_v35 = vld [vmem:[#allocation7 + $0x40] sm:$0xff] }
 0x85a   :  { %v5939_v39 = vpack.c.bf16 %v1363_v37, %v1362_v35 }
 0x85b   :  { %v5975_v48 = vpack.c.bf16 %v1604_v38, %v1603_v46  ;;  %v1364_v38 = vld [vmem:[#allocation7 + $0x50] sm:$0xff]  ;;  %v1365_v46 = vld [vmem:[#allocation7 + $0x58] sm:$0xff] }
 0x85c   :  { %5940 = vmatprep.subr.bf16.mxu1 %v5939_v39 }
 0x85d   :  { %5977 = vmatprep.subr.msk.bf16.mxu0 %vm6892_vm1, %v5975_v48  ;;  %5942 = vmatpush3.bf16.msra.mxu1 %v5939_v39 }
 0x8be   :  { %v5377_v53 = vpop.f32.mrb[6].mxu1 }
 0x8bf   :  { %v1202_v56 = vadd.f32 %v5377_v53, %v4768_v51  ;;  %v1196_v60 = vpop.f32.mrb[7].mxu1  ;;  %v121_v53 = vld [vmem:[%s7928_s2] sm:$0xff] }
 0x8c0   :  { %v1197_v62 = vadd.f32 %v4768_v51, %v1196_v60  ;;  %5425 = vmatprep.mubr.msk.f32.mxu1 %vm148_vm0, %v121_v53  ;;  %v1369_v60 = vld [vmem:[#allocation7 + $0x78] sm:$0xff] }
 0x8c1   :  { %v1512_v2 = vmul.f32 %v1202_v56, %v6856_v49  ;;  %v1508_v22 = vmul.f32 %v1202_v56, %v6885_v31  ;;  %v1368_v56 = vld [vmem:[#allocation7 + $0x70] sm:$0xff] }
 0x8c2   :  { %v1511_v32 = vmul.f32 %v1197_v62, %v6854_v47  ;;  %v1507_v17 = vmul.f32 %v1197_v62, %v6883_v30  ;;  %v5951_v18 = vpack.c.bf16 %v1369_v60, %v1368_v56  ;;  %v122_v62 = vld [vmem:[%s7928_s2 + $0x8] sm:$0xff] }
 0x8c3   :  { %1521 = vrot.lane.b32.xlu1 %v1512_v2, %s6564_s6  ;;  %v123_v2 = vld [vmem:[%s7928_s2 + $0x10] sm:$0xff] }
 0x8c4   :  { %1519 = vrot.lane.b32.xlu0 %v1511_v32, %s6564_s6  ;;  %v124_v32 = vld [vmem:[%s7928_s2 + $0x18] sm:$0xff] }
 0x8c7   :  { %1589 = vrot.lane.b32.xlu1 %v1566_v19, %s6564_s6  ;;  %v126_v19 = vld [vmem:[%s7928_s2 + $0x28] sm:$0xff] }
 0x8c8   :  { %1587 = vrot.lane.b32.xlu0 %v1565_v6, %s6564_s6  ;;  %v127_v6 = vld [vmem:[%s7928_s2 + $0x30] sm:$0xff] }
 0x8c9   :  { %v5380_v58 = vpop.f32.mrb[8].mxu1 }
 0x8ca   :  { %v1212_v11 = vadd.f32 %v5380_v58, %v4768_v51  ;;  %v1206_v5 = vpop.f32.mrb[9].mxu1  ;;  %v128_v58 = vld [vmem:[%s7928_s2 + $0x38] sm:$0xff] }
 0x8cb   :  { %v1207_v8 = vadd.f32 %v4768_v51, %v1206_v5  ;;  %v1367_v51 = vld [vmem:[#allocation7 + $0x68] sm:$0xff] }
 0x8cc   :  { %v1514_v14 = vmul.f32 %v1212_v11, %v6869_v10  ;;  %v1510_v13 = vmul.f32 %v1212_v11, %v6899_v44 }
 0x8cd   :  { %v1513_v52 = vmul.f32 %v1207_v8, %v6860_v57  ;;  %v1509_v31 = vmul.f32 %v1207_v8, %v6897_v42  ;;  %v1366_v42 = vld [vmem:[#allocation7 + $0x60] sm:$0xff] }
 0x8ce   :  { %1525 = vrot.lane.b32.xlu1 %v1514_v14, %s6564_s6  ;;  %v5947_v44 = vpack.c.bf16 %v1367_v51, %v1366_v42 }
 0x8cf   :  { %1523 = vrot.lane.b32.xlu0 %v1513_v52, %s6564_s6 }
 0x935   :  { %v1522_v16 = vpop.permute.xlu1 %1521 }
 0x936   :  { %v1520_v23 = vpop.permute.xlu0 %1519  ;;  %v1532_v29 = vadd.f32 %v1522_v16, %v1508_v22 }
 0x937   :  { %v1531_v61 = vadd.f32 %v1520_v23, %v1507_v17 }
 0x939   :  { %v1590_v26 = vpop.permute.xlu1 %1589  ;;  %5445 = vmatprep.mubr.msk.f32.mxu0 %vm148_vm0, %v1531_v61 }
 0x93a   :  { %v1606_v1 = vadd.f32 %v1590_v26, %v1542_v25  ;;  %5446 = vmatmul.mubr.msk.f32.vlgmr.msra.gmra.mrb[26].mxu0 %vm148_vm0, %v1532_v29  ;;  %v1588_v28 = vpop.permute.xlu0 %1587  ;;  %v4790_v29 = vld [vmem:[#allocation9 + $0x7] ss:$0 sm:$0xff] }
 0x93b   :  { %5980 = vmatpush3.bf16.xpose.msk.msra.mxu0 %vm6892_vm1, %v5975_v48  ;;  %v1605_v30 = vadd.f32 %v1588_v28, %v1541_v4  ;;  %v5943_v48 = vpack.c.bf16 %v1365_v46, %v1364_v38 }
 0x93d   :  { %v5981_v27 = vpack.c.bf16 %v1606_v1, %v1605_v30  ;;  %5944 = vmatprep.subr.bf16.mxu1 %v5943_v48 }
 0x93e   :  { %5946 = vmatpush3.bf16.msra.mxu1 %v5943_v48 }
 0x93f   :  { %5983 = vmatprep.subr.msk.bf16.mxu0 %vm6892_vm1, %v5981_v27  ;;  %5948 = vmatprep.subr.bf16.mxu1 %v5947_v44 }
 0x940   :  { %v1526_v20 = vpop.permute.xlu1 %1525 }
 0x941   :  { %v1524_v12 = vpop.permute.xlu0 %1523  ;;  %v1534_v34 = vadd.f32 %v1526_v20, %v1510_v13 }
 0x942   :  { %v1533_v9 = vadd.f32 %v1524_v12, %v1509_v31  ;;  %5950 = vmatpush3.bf16.msra.mxu1 %v5947_v44 }
 0x943   :  { %5986 = vmatpush3.bf16.xpose.msk.msra.mxu0 %vm6892_vm1, %v5981_v27  ;;  %5952 = vmatprep.subr.bf16.mxu1 %v5951_v18 }
 0x944   :  { %5467 = vmatprep.mubr.msk.f32.mxu0 %vm148_vm0, %v1533_v9 }
 0x946   :  { %5954 = vmatpush3.bf16.msra.mxu1 %v5951_v18 }
 0x949   :  { %5426 = vmatmul.mubr.msk.f32.vlgmr.msra.gmra.mrb[10].mxu1 %vm148_vm0, %v122_v62 }
 0x94a   :  { %5468 = vmatmul.mubr.msk.f32.vlgmr.msra.gmra.mrb[28].mxu0 %vm148_vm0, %v1534_v34  ;;  %5428 = vmatprep.mubr.msk.f32.mxu1 %vm148_vm0, %v123_v2 }
 0x94d   :  { %5429 = vmatmul.mubr.msk.f32.gmra.mrb[12].mxu1 %vm148_vm0, %v124_v32 }
 0x94e   :  { %5431 = vmatprep.mubr.msk.f32.mxu1 %vm148_vm0, %v125_v33 }
 0x951   :  { %5432 = vmatmul.mubr.msk.f32.gmra.mrb[14].mxu1 %vm148_vm0, %v126_v19 }
 0x952   :  { %5434 = vmatprep.mubr.msk.f32.mxu1 %vm148_vm0, %v127_v6 }
 0x955   :  { %5435 = vmatmul.mubr.msk.f32.gmra.mrb[16].mxu1 %vm148_vm0, %v128_v58 }
 0xa0d   :  { %v5447_v11 = vpop.f32.mrb[26].mxu0 }
 0xa0e   :  { %v1701_v5 = vmul.f32 0.125, %v5447_v11  ;;  %v1691_v8 = vpop.f32.mrb[27].mxu0 }
 0xa0f   :  { %v1700_v14 = vmul.f32 0.125, %v1691_v8 }
 0xa10   :  { %v1706_v52 = vsel %vm1702_vm3, %v1701_v5, -inf }
 0xa11   :  { %1707 = vmax.xlane.f32.xlu1 %v1706_v52  ;;  %v1703_v16 = vsel %vm1702_vm3, %v1700_v14, -inf }
 0xa12   :  { %1704 = vmax.xlane.f32.xlu0 %v1703_v16 }
 0xa1c   :  { %v5427_v25 = vpop.f32.mrb[10].mxu1 }
 0xa1d   :  { %v5469_v17 = vpop.f32.mrb[28].mxu0  ;;  %v1474_v26 = vadd.f32 %v5427_v25, %v4790_v29  ;;  %v1468_v4 = vpop.f32.mrb[11].mxu1 }
 0xa1e   :  { %v1890_v15 = vpop.f32.mrb[29].mxu0  ;;  %v1900_v23 = vmul.f32 0.125, %v5469_v17  ;;  %v1469_v1 = vadd.f32 %v4790_v29, %v1468_v4  ;;  %v2006_v4 = vld [vmem:[#allocation7 + $0x88] sm:$0xff] }
 0xa1f   :  { %v1899_v22 = vmul.f32 0.125, %v1890_v15 }
 0xa20   :  { %v1904_v61 = vsel %vm1702_vm3, %v1900_v23, -inf  ;;  %v5967_v28 = vpack.c.bf16 %v1474_v26, %v1469_v1  ;;  %v5430_v18 = vpop.f32.mrb[12].mxu1  ;;  %v2005_v26 = vld [vmem:[#allocation7 + $0x80] sm:$0xff] }
 0xa21   :  { %v1901_v24 = vsel %vm1702_vm3, %v1899_v22, -inf  ;;  %v1478_v62 = vpop.f32.mrb[13].mxu1  ;;  %v1484_v2 = vadd.f32 %v5430_v18, %v4790_v29 }
 0xa22   :  { %1902 = vmax.xlane.f32.xlu0 %v1901_v24  ;;  %5968 = vmatprep.subr.bf16.mxu1 %v5967_v28  ;;  %v1479_v32 = vadd.f32 %v4790_v29, %v1478_v62 }
 0xa23   :  { %5970 = vmatpush3.bf16.msra.mxu1 %v5967_v28 }
 0xa24   :  { %v5971_v33 = vpack.c.bf16 %v1484_v2, %v1479_v32  ;;  %v5433_v19 = vpop.f32.mrb[14].mxu1 }
 0xa25   :  { %v1494_v6 = vadd.f32 %v5433_v19, %v4790_v29  ;;  %v1488_v58 = vpop.f32.mrb[15].mxu1 }
 0xa26   :  { %1905 = vmax.xlane.f32.xlu0 %v1904_v61  ;;  %5972 = vmatprep.subr.bf16.mxu1 %v5971_v33  ;;  %v1489_v11 = vadd.f32 %v4790_v29, %v1488_v58 }
 0xa27   :  { %5974 = vmatpush3.bf16.msra.mxu1 %v5971_v33 }
 0xa28   :  { %v5436_v8 = vpop.f32.mrb[16].mxu1 }
 0xa29   :  { %v1504_v52 = vadd.f32 %v5436_v8, %v4790_v29 }
 0xa9e   :  { %v1708_v30 = vpop.xlane.xlu1 %1707 }
 0xa9f   :  { %v1710_v27 = vsub.f32 %v1701_v5, %v1708_v30  ;;  %v1705_v31 = vpop.xlane.xlu0 %1704  ;;  %v5987_v5 = vpack.c.bf16 %v1494_v6, %v1489_v11 }
 0xaa0   :  { %v1709_v12 = vsub.f32 %v1700_v14, %v1705_v31  ;;  %v1498_v14 = vpop.f32.mrb[17].mxu1  ;;  %v2007_v31 = vld [vmem:[#allocation7 + $0x90] sm:$0xff] }
 0xaa1   :  { %v1713_v9 = vmul.f32 1.442695, %v1710_v27  ;;  %5988 = vmatprep.subr.bf16.mxu1 %v5987_v5  ;;  %v1499_v16 = vadd.f32 %v4790_v29, %v1498_v14  ;;  %v5995_v29 = vpack.c.bf16 %v2006_v4, %v2005_v26 }
 0xaa2   :  { %v1711_v20 = vmul.f32 1.442695, %v1709_v12  ;;  %v2008_v12 = vld [vmem:[#allocation7 + $0x98] sm:$0xff] }
 0xaa3   :  { %6324 = vpow2.f32 %v1713_v9  ;;  %v5991_v17 = vpack.c.bf16 %v1504_v52, %v1499_v16 }
 0xaa4   :  { %6326 = vpow2.f32 %v1711_v20 }
 0xaad   :  { %v6325_v13 = vpop.eup %6324 }
 0xaae   :  { %v6327_v34 = vpop.eup %6326  ;;  %v1718_v35 = vsel %vm1702_vm3, %v6325_v13, 0.0 }
 0xaaf   :  { %v1903_v37 = vpop.xlane.xlu0 %1902  ;;  %1719 = vadd.xlane.f32.xlu1 %v1718_v35  ;;  %v1715_v38 = vsel %vm1702_vm3, %v6327_v34, 0.0  ;;  %v2010_v35 = vld [vmem:[#allocation7 + $0xa8] sm:$0xff] }
 0xab0   :  { %v1907_v39 = vsub.f32 %v1899_v22, %v1903_v37  ;;  %1716 = vadd.xlane.f32.xlu0 %v1715_v38  ;;  %v2011_v38 = vld [vmem:[#allocation7 + $0xb0] sm:$0xff] }
 0xab2   :  { %v1909_v46 = vmul.f32 1.442695, %v1907_v39  ;;  %v2012_v39 = vld [vmem:[#allocation7 + $0xb8] sm:$0xff] }
 0xab3   :  { %v1906_v48 = vpop.xlane.xlu0 %1905 }
 0xab4   :  { %6328 = vpow2.f32 %v1909_v46  ;;  %v1908_v42 = vsub.f32 %v1900_v23, %v1906_v48  ;;  %v6007_v46 = vpack.c.bf16 %v2012_v39, %v2011_v38  ;;  %v4826_v38 = vld [vmem:[%s7933_s7 + $0xa0] sm:$0xff]  ;;  %v4827_v39 = vld [vmem:[%s7933_s7 + $0xa8] sm:$0xff] }
 0xab6   :  { %v1911_v51 = vmul.f32 1.442695, %v1908_v42 }
 0xab8   :  { %6330 = vpow2.f32 %v1911_v51 }
 0xabe   :  { %v6329_v53 = vpop.eup %6328 }
 0xabf   :  { %v1913_v44 = vsel %vm1702_vm3, %v6329_v53, 0.0 }
 0xac0   :  { %1914 = vadd.xlane.f32.xlu0 %v1913_v44 }
 0xac2   :  { %v6331_v56 = vpop.eup %6330 }
 0xac3   :  { %v1916_v60 = vsel %vm1702_vm3, %v6331_v56, 0.0 }
 0xac4   :  { %1917 = vadd.xlane.f32.xlu1 %v1916_v60 }
 0xb3c   :  { %v1720_v15 = vpop.xlane.xlu1 %1719 }
 0xb3d   :  { %6332 = vrcp.f32 %v1720_v15  ;;  %v1717_v22 = vpop.xlane.xlu0 %1716 }
 0xb3e   :  { %6334 = vrcp.f32 %v1717_v22 }
 0xb47   :  { %v6333_v23 = vpop.eup %6332 }
 0xb48   :  { %v6335_v24 = vpop.eup %6334  ;;  %v1724_v25 = vmul.f32 %v6333_v23, %v6325_v13  ;;  %v5999_v13 = vpack.c.bf16 %v2008_v12, %v2007_v31 }
 0xb49   :  { %v1723_v61 = vmul.f32 %v6335_v24, %v6327_v34  ;;  %v2009_v34 = vld [vmem:[#allocation7 + $0xa0] sm:$0xff] }
 0xb4a   :  { %v6003_v37 = vpack.c.bf16 %v2010_v35, %v2009_v34  ;;  %v4824_v34 = vld [vmem:[%s7933_s7 + $0x90] sm:$0xff]  ;;  %v4825_v35 = vld [vmem:[%s7933_s7 + $0x98] sm:$0xff] }
 0xb4b   :  { %5456 = vmatprep.mubr.msk.f32.mxu1 %vm1702_vm3, %v1723_v61 }
 0xb4c   :  { %5457 = vmatmul.mubr.msk.f32.vlgmr.msra.gmra.mrb[18].mxu1 %vm1702_vm3, %v1724_v25 }
 0xb4d   :  { %v1915_v1 = vpop.xlane.xlu0 %1914  ;;  %5990 = vmatpush3.bf16.msra.mxu1 %v5987_v5 }
 0xb4e   :  { %6336 = vrcp.f32 %v1915_v1  ;;  %5992 = vmatprep.subr.bf16.mxu1 %v5991_v17 }
 0xb51   :  { %v1918_v28 = vpop.xlane.xlu1 %1917  ;;  %5994 = vmatpush3.bf16.msra.mxu1 %v5991_v17 }
 0xb52   :  { %6338 = vrcp.f32 %v1918_v28  ;;  %5996 = vmatprep.subr.bf16.mxu1 %v5995_v29 }
 0xb58   :  { %v6337_v30 = vpop.eup %6336 }
 0xb59   :  { %v1921_v27 = vmul.f32 %v6337_v30, %v6329_v53 }
 0xb5b   :  { %5478 = vmatprep.mubr.msk.f32.mxu1 %vm1702_vm3, %v1921_v27 }
 0xb5c   :  { %v6339_v9 = vpop.eup %6338 }
 0xb5d   :  { %v1922_v20 = vmul.f32 %v6339_v9, %v6331_v56  ;;  %v4819_v56 = vld [vmem:[#allocation9 + $0x8] ss:$0 sm:$0xff]  ;;  %v4822_v9 = vld [vmem:[%s7933_s7 + $0x80] sm:$0xff] }
 0xb5f   :  { %5479 = vmatmul.mubr.msk.f32.vlgmr.msra.gmra.mrb[20].mxu1 %vm1702_vm3, %v1922_v20  ;;  %v4823_v20 = vld [vmem:[%s7933_s7 + $0x88] sm:$0xff] }
 0xb60   :  { %5998 = vmatpush3.bf16.msra.mxu1 %v5995_v29 }
 0xb61   :  { %6000 = vmatprep.subr.bf16.mxu1 %v5999_v13 }
 0xb64   :  { %6002 = vmatpush3.bf16.msra.mxu1 %v5999_v13  ;;  %v6011_v13 = vpack.c.bf16 %v4823_v20, %v4822_v9 }
 0xb65   :  { %6004 = vmatprep.subr.bf16.mxu1 %v6003_v37 }
 0xb66   :  { %6012 = vmatprep.subr.bf16.mxu0 %v6011_v13 }
 0xb67   :  { %6014 = vmatpush3.bf16.msra.mxu0 %v6011_v13  ;;  %v4821_v13 = vld [vmem:[#allocation9 + $0x5] ss:$0 sm:$0xff] }
 0xb68   :  { %6006 = vmatpush3.bf16.msra.mxu1 %v6003_v37  ;;  %v6015_v37 = vpack.c.bf16 %v4825_v35, %v4824_v34 }
 0xb69   :  { %6008 = vmatprep.subr.bf16.mxu1 %v6007_v46 }
 0xb6a   :  { %6016 = vmatprep.subr.bf16.mxu0 %v6015_v37 }
 0xb6b   :  { %6018 = vmatpush3.bf16.msra.mxu0 %v6015_v37 }
 0xb6c   :  { %6010 = vmatpush3.bf16.msra.mxu1 %v6007_v46  ;;  %v6019_v46 = vpack.c.bf16 %v4827_v39, %v4826_v38 }
 0xb6e   :  { %6020 = vmatprep.subr.bf16.mxu0 %v6019_v46 }
 0xb6f   :  { %6022 = vmatpush3.bf16.msra.mxu0 %v6019_v46 }
 0xc1f   :  { %v5458_v48 = vpop.f32.mrb[18].mxu1 }
 0xc20   :  { %v1797_v42 = vpop.f32.mrb[19].mxu1 }
 0xc21   :  { %5497 = vmatprep.mubr.msk.f32.mxu1 %vm148_vm0, %v1797_v42  ;;  %v4829_v42 = vld [vmem:[%s7933_s7 + $0xb8] sm:$0xff] }
 0xc22   :  { %5498 = vmatmul.mubr.msk.f32.vlgmr.msra.gmra.mrb[22].mxu1 %vm148_vm0, %v5458_v48  ;;  %v4828_v48 = vld [vmem:[%s7933_s7 + $0xb0] sm:$0xff] }
 0xc32   :  { %v5480_v51 = vpop.f32.mrb[20].mxu1 }
 0xc33   :  { %v1995_v53 = vpop.f32.mrb[21].mxu1 }
 0xc34   :  { %5500 = vmatprep.mubr.msk.f32.mxu1 %vm148_vm0, %v1995_v53  ;;  %v2320_v53 = vld [vmem:[%s7936_s10] sm:$0xff] }
 0xc35   :  { %5501 = vmatmul.mubr.msk.f32.gmra.mrb[24].mxu1 %vm148_vm0, %v5480_v51  ;;  %v6023_v51 = vpack.c.bf16 %v4829_v42, %v4828_v48 }
 0xc37   :  { %6024 = vmatprep.subr.bf16.mxu0 %v6023_v51 }
 0xc38   :  { %6026 = vmatpush3.bf16.msra.mxu0 %v6023_v51 }
 0xcf5   :  { %v5499_v44 = vpop.f32.mrb[22].mxu1 }
 0xcf6   :  { %v2111_v60 = vadd.f32 %v5499_v44, %v6977_v54  ;;  %v2091_v18 = vpop.f32.mrb[23].mxu1  ;;  %v2321_v44 = vld [vmem:[%s7936_s10 + $0x8] sm:$0xff] }
 0xcf7   :  { %v2110_v62 = vadd.f32 %v2091_v18, %v6979_v55  ;;  %v2323_v18 = vld [vmem:[%s7936_s10 + $0x18] sm:$0xff] }
 0xcf8   :  { %v7210_v2 = vadd.f32 %v4819_v56, %v2111_v60  ;;  %v6027_v60 = vpack.c.bf16 %v2321_v44, %v2320_v53 }
 0xcf9   :  { %v7212_v32 = vadd.f32 %v4819_v56, %v2110_v62 }
 0xcfa   :  { %v2133_v33 = vsel %vm148_vm0, %v7210_v2, 0.0  ;;  %6028 = vmatprep.subr.bf16.mxu1 %v6027_v60 }
 0xcfb   :  { %2134 = vadd.xlane.f32.xlu1 %v2133_v33  ;;  %v2130_v19 = vsel %vm148_vm0, %v7212_v32, 0.0  ;;  %v2324_v33 = vld [vmem:[%s7936_s10 + $0x20] sm:$0xff]  ;;  %6030 = vmatpush3.bf16.msra.mxu1 %v6027_v60 }
 0xcfc   :  { %2131 = vadd.xlane.f32.xlu0 %v2130_v19  ;;  %v2325_v19 = vld [vmem:[%s7936_s10 + $0x28] sm:$0xff] }
 0xd08   :  { %v5502_v6 = vpop.f32.mrb[24].mxu1 }
 0xd09   :  { %v2113_v58 = vadd.f32 %v5502_v6, %v6987_v3  ;;  %v2101_v11 = vpop.f32.mrb[25].mxu1  ;;  %v6035_v6 = vpack.c.bf16 %v2325_v19, %v2324_v33  ;;  %v2334_v19 = vld [vmem:[%s7936_s10 + $0x70] sm:$0xff] }
 0xd0a   :  { %v2112_v54 = vadd.f32 %v2101_v11, %v6989_v0  ;;  %v2327_v11 = vld [vmem:[%s7936_s10 + $0x38] sm:$0xff] }
 0xd0b   :  { %v7220_v5 = vadd.f32 %v4819_v56, %v2113_v58  ;;  %v2326_v58 = vld [vmem:[%s7936_s10 + $0x30] sm:$0xff] }
 0xd0c   :  { %v7222_v55 = vadd.f32 %v4819_v56, %v2112_v54  ;;  %v2322_v56 = vld [vmem:[%s7936_s10 + $0x10] sm:$0xff]  ;;  %v6039_v54 = vpack.c.bf16 %v2327_v11, %v2326_v58 }
 0xd0d   :  { %v2139_v8 = vsel %vm148_vm0, %v7220_v5, 0.0  ;;  %v6031_v62 = vpack.c.bf16 %v2323_v18, %v2322_v56 }
 0xd0e   :  { %2140 = vadd.xlane.f32.xlu1 %v2139_v8  ;;  %v2136_v14 = vsel %vm148_vm0, %v7222_v55, 0.0  ;;  %v2328_v8 = vld [vmem:[%s7936_s10 + $0x40] sm:$0xff] }
 0xd0f   :  { %2137 = vadd.xlane.f32.xlu0 %v2136_v14  ;;  %6032 = vmatprep.subr.bf16.mxu1 %v6031_v62  ;;  %v2329_v14 = vld [vmem:[%s7936_s10 + $0x48] sm:$0xff] }
 0xd10   :  { %6034 = vmatpush3.bf16.msra.mxu1 %v6031_v62 }
 0xd11   :  { %6036 = vmatprep.subr.bf16.mxu1 %v6035_v6 }
 0xd14   :  { %6038 = vmatpush3.bf16.msra.mxu1 %v6035_v6 }
 0xd15   :  { %6040 = vmatprep.subr.bf16.mxu1 %v6039_v54 }
 0xd18   :  { %6042 = vmatpush3.bf16.msra.mxu1 %v6039_v54 }
 0xd88   :  { %v2135_v52 = vpop.xlane.xlu1 %2134 }
 0xd89   :  { %v2143_v16 = vmul.f32 0.015625, %v2135_v52  ;;  %v2132_v17 = vpop.xlane.xlu0 %2131  ;;  %v6043_v52 = vpack.c.bf16 %v2329_v14, %v2328_v8 }
 0xd8a   :  { %v2142_v15 = vmul.f32 0.015625, %v2132_v17  ;;  %v2331_v17 = vld [vmem:[%s7936_s10 + $0x58] sm:$0xff] }
 0xd8b   :  { %v7229_v3 = vsub.f32 %v7210_v2, %v2143_v16  ;;  %v2330_v16 = vld [vmem:[%s7936_s10 + $0x50] sm:$0xff]  ;;  %6044 = vmatprep.subr.bf16.mxu1 %v6043_v52 }
 0xd8c   :  { %v7232_v0 = vsub.f32 %v7212_v32, %v2142_v15  ;;  %v6047_v15 = vpack.c.bf16 %v2331_v17, %v2330_v16  ;;  %6046 = vmatpush3.bf16.msra.mxu1 %v6043_v52 }
 0xd8d   :  { %v2151_v22 = vmul.f32 %v7229_v3, %v7229_v3 }
 0xd8e   :  { %v2150_v23 = vmul.f32 %v7232_v0, %v7232_v0  ;;  %6048 = vmatprep.subr.bf16.mxu1 %v6047_v15 }
 0xd8f   :  { %v2157_v24 = vsel %vm148_vm0, %v2151_v22, 0.0  ;;  %v2332_v22 = vld [vmem:[%s7936_s10 + $0x60] sm:$0xff] }
 0xd90   :  { %2158 = vadd.xlane.f32.xlu1 %v2157_v24  ;;  %v2154_v61 = vsel %vm148_vm0, %v2150_v23, 0.0  ;;  %v2333_v23 = vld [vmem:[%s7936_s10 + $0x68] sm:$0xff]  ;;  %6050 = vmatpush3.bf16.msra.mxu1 %v6047_v15 }
 0xd91   :  { %2155 = vadd.xlane.f32.xlu0 %v2154_v61  ;;  %v6051_v24 = vpack.c.bf16 %v2333_v23, %v2332_v22 }
 0xd93   :  { %6052 = vmatprep.subr.bf16.mxu1 %v6051_v24 }
 0xd94   :  { %6054 = vmatpush3.bf16.msra.mxu1 %v6051_v24 }
 0xd9b   :  { %v2141_v25 = vpop.xlane.xlu1 %2140 }
 0xd9c   :  { %v2145_v26 = vmul.f32 0.015625, %v2141_v25  ;;  %v2138_v4 = vpop.xlane.xlu0 %2137 }
 0xd9d   :  { %v2144_v1 = vmul.f32 0.015625, %v2138_v4 }
 0xd9e   :  { %v7241_v29 = vsub.f32 %v7220_v5, %v2145_v26 }
 0xd9f   :  { %v7244_v28 = vsub.f32 %v7222_v55, %v2144_v1 }
 0xda0   :  { %v2153_v30 = vmul.f32 %v7241_v29, %v7241_v29 }
 0xda1   :  { %v2152_v27 = vmul.f32 %v7244_v28, %v7244_v28 }
 0xda2   :  { %v2163_v31 = vsel %vm148_vm0, %v2153_v30, 0.0 }
 0xda3   :  { %2164 = vadd.xlane.f32.xlu1 %v2163_v31  ;;  %v2160_v12 = vsel %vm148_vm0, %v2152_v27, 0.0  ;;  %v4820_v31 = vld [vmem:[#allocation9 + $0x4] ss:$0 sm:$0xff] }
 0xda4   :  { %2161 = vadd.xlane.f32.xlu0 %v2160_v12 }
 0xe1d   :  { %v2159_v61 = vpop.xlane.xlu1 %2158 }
 0xe1e   :  { %v2167_v25 = vmul.f32 0.015625, %v2159_v61  ;;  %v2156_v26 = vpop.xlane.xlu0 %2155 }
 0xe1f   :  { %v2166_v4 = vmul.f32 0.015625, %v2156_v26 }
 0xe20   :  { %v2171_v1 = vadd.f32 1e-05, %v2167_v25  ;;  %v4835_v25 = vld [vmem:[#allocation9 + $0x9] ss:$0 sm:$0xff] }
 0xe21   :  { %v2170_v30 = vadd.f32 1e-05, %v2166_v4 }
 0xe22   :  { %6340 = vrsqrt.f32 %v2171_v1 }
 0xe23   :  { %6342 = vrsqrt.f32 %v2170_v30 }
 0xe2c   :  { %v6341_v27 = vpop.eup %6340 }
 0xe2d   :  { %v6343_v12 = vpop.eup %6342  ;;  %v2179_v9 = vmul.f32 %v6341_v27, %v7229_v3 }
 0xe2e   :  { %v2178_v20 = vmul.f32 %v6343_v12, %v7232_v0 }
 0xe2f   :  { %v2189_v34 = vmul.f32 %v4820_v31, %v2179_v9 }
 0xe30   :  { %v2165_v35 = vpop.xlane.xlu1 %2164  ;;  %v2188_v37 = vmul.f32 %v4820_v31, %v2178_v20 }
 0xe31   :  { %v2169_v38 = vmul.f32 0.015625, %v2165_v35  ;;  %v2162_v39 = vpop.xlane.xlu0 %2161  ;;  %v2199_v51 = vadd.f32 %v4821_v13, %v2189_v34 }
 0xe32   :  { %v2168_v46 = vmul.f32 0.015625, %v2162_v39  ;;  %v2198_v48 = vadd.f32 %v4821_v13, %v2188_v37 }
 0xe33   :  { %v2173_v42 = vadd.f32 1e-05, %v2169_v38 }
 0xe34   :  { %v2172_v53 = vadd.f32 1e-05, %v2168_v46  ;;  %5519 = vmatprep.mubr.msk.f32.mxu0 %vm148_vm0, %v2198_v48 }
 0xe35   :  { %6344 = vrsqrt.f32 %v2173_v42  ;;  %5520 = vmatmul.mubr.msk.f32.vlgmr.msra.gmra.mrb[30].mxu0 %vm148_vm0, %v2199_v51 }
 0xe36   :  { %6346 = vrsqrt.f32 %v2172_v53 }
 0xe3f   :  { %v6345_v3 = vpop.eup %6344 }
 0xe40   :  { %v6347_v44 = vpop.eup %6346  ;;  %v2181_v0 = vmul.f32 %v6345_v3, %v7241_v29  ;;  %v2335_v29 = vld [vmem:[%s7936_s10 + $0x78] sm:$0xff] }
 0xe41   :  { %v2180_v56 = vmul.f32 %v6347_v44, %v7244_v28  ;;  %v6055_v6 = vpack.c.bf16 %v2335_v29, %v2334_v19  ;;  %v4830_v28 = vld [vmem:[#allocation6 + $0x2] ss:$0 sm:$0xff] }
 0xe42   :  { %v2191_v60 = vmul.f32 %v4820_v31, %v2181_v0 }
 0xe43   :  { %v2190_v18 = vmul.f32 %v4820_v31, %v2180_v56  ;;  %6056 = vmatprep.subr.bf16.mxu1 %v6055_v6 }
 0xe44   :  { %v2201_v33 = vadd.f32 %v4821_v13, %v2191_v60  ;;  %6058 = vmatpush3.bf16.msra.mxu1 %v6055_v6  ;;  %v4839_v6 = vld [vmem:[%s7931_s5 + $0xc8] sm:$0xff] }
 0xe45   :  { %v2200_v62 = vadd.f32 %v4821_v13, %v2190_v18 }
 0xe47   :  { %5522 = vmatprep.mubr.msk.f32.mxu0 %vm148_vm0, %v2200_v62 }
 0xe48   :  { %5523 = vmatmul.mubr.msk.f32.gmra.mrb[32].mxu0 %vm148_vm0, %v2201_v33 }
 0xe49   :  { %2632 = vmatprep.mubr.f32.mxu0 %v6563_v50 }
 0xf08   :  { %v5521_v58 = vpop.f32.mrb[30].mxu0 }
 0xf09   :  { %v2303_v11 = vadd.f32 %v5521_v58, %v4830_v28  ;;  %v2297_v54 = vpop.f32.mrb[31].mxu0  ;;  %v4842_v58 = vld [vmem:[%s7931_s5 + $0xe0] sm:$0xff] }
 0xf0a   :  { %v2298_v8 = vadd.f32 %v4830_v28, %v2297_v54  ;;  %v4841_v54 = vld [vmem:[%s7931_s5 + $0xd8] sm:$0xff] }
 0xf0b   :  { %v2317_v52 = vmax.f32 %v2303_v11, 0.0  ;;  %v4838_v11 = vld [vmem:[%s7931_s5 + $0xc0] sm:$0xff] }
 0xf0c   :  { %v2316_v14 = vmax.f32 %v2298_v8, 0.0  ;;  %v6059_v8 = vpack.c.bf16 %v4842_v58, %v4839_v6 }
 0xf0e   :  { %5557 = vmatprep.mubr.f32.mxu1 %v2316_v14  ;;  %v6061_v14 = vpack.c.bf16 %v4841_v54, %v4838_v11  ;;  %6060 = vmatprep.subr.bf16.mxu0 %v6059_v8 }
 0xf0f   :  { %5558 = vmatmul.mubr.f32.vlgmr.msra.gmra.mrb[26].mxu1 %v2317_v52  ;;  %v4845_v52 = vld [vmem:[%s7931_s5 + $0xf8] sm:$0xff] }
 0xf10   :  { %6062 = vmatpush1.bf16.msra.mxu0 %v6061_v14 }
 0xf1b   :  { %v5524_v16 = vpop.f32.mrb[32].mxu0 }
 0xf1c   :  { %v2313_v17 = vadd.f32 %v5524_v16, %v4830_v28  ;;  %v2307_v15 = vpop.f32.mrb[33].mxu0  ;;  %v4848_v16 = vld [vmem:[%s7931_s5 + $0x110] sm:$0xff] }
 0xf1d   :  { %v2308_v22 = vadd.f32 %v4830_v28, %v2307_v15  ;;  %v4844_v15 = vld [vmem:[%s7931_s5 + $0xf0] sm:$0xff] }
 0xf1e   :  { %v2319_v24 = vmax.f32 %v2313_v17, 0.0  ;;  %v6063_v17 = vpack.c.bf16 %v4848_v16, %v4845_v52  ;;  %v4855_v16 = vld [vmem:[%s7931_s5 + $0x148] sm:$0xff] }
 0xf1f   :  { %v2318_v23 = vmax.f32 %v2308_v22, 0.0  ;;  %v4847_v22 = vld [vmem:[%s7931_s5 + $0x108] sm:$0xff] }
 0xf20   :  { %6064 = vmatprep.subr.bf16.mxu0 %v6063_v17 }
 0xf21   :  { %5560 = vmatprep.mubr.f32.mxu1 %v2318_v23  ;;  %v6065_v23 = vpack.c.bf16 %v4847_v22, %v4844_v15 }
 0xf22   :  { %5561 = vmatmul.mubr.f32.gmra.mrb[28].mxu1 %v2319_v24  ;;  %v4851_v24 = vld [vmem:[%s7931_s5 + $0x128] sm:$0xff] }
 0xf23   :  { %6066 = vmatpush1.bf16.msra.mxu0 %v6065_v23  ;;  %v4858_v23 = vld [vmem:[%s7931_s5 + $0x160] sm:$0xff] }
 0xfe2   :  { %v5559_v61 = vpop.f32.mrb[26].mxu1 }
 0xfe3   :  { %v2422_v26 = vadd.f32 %v5559_v61, %v7210_v2  ;;  %v2402_v4 = vpop.f32.mrb[27].mxu1  ;;  %v4854_v61 = vld [vmem:[%s7931_s5 + $0x140] sm:$0xff] }
 0xfe4   :  { %v2421_v1 = vadd.f32 %v2402_v4, %v7212_v32  ;;  %v4853_v4 = vld [vmem:[%s7931_s5 + $0x138] sm:$0xff] }
 0xfe5   :  { %v7335_v30 = vadd.f32 %v4835_v25, %v2422_v26  ;;  %v4850_v26 = vld [vmem:[%s7931_s5 + $0x120] sm:$0xff] }
 0xfe6   :  { %v7337_v27 = vadd.f32 %v4835_v25, %v2421_v1  ;;  %v6069_v1 = vpack.c.bf16 %v4853_v4, %v4850_v26 }
 0xfe7   :  { %v2444_v31 = vsel %vm148_vm0, %v7335_v30, 0.0 }
 0xfe8   :  { %2445 = vadd.xlane.f32.xlu1 %v2444_v31  ;;  %v2441_v12 = vsel %vm148_vm0, %v7337_v27, 0.0  ;;  %v4857_v31 = vld [vmem:[%s7931_s5 + $0x158] sm:$0xff] }
 0xfe9   :  { %2442 = vadd.xlane.f32.xlu0 %v2441_v12  ;;  %v4860_v12 = vld [vmem:[%s7931_s5 + $0x170] sm:$0xff] }
 0xff5   :  { %v5562_v9 = vpop.f32.mrb[28].mxu1 }
 0xff6   :  { %v2424_v20 = vadd.f32 %v5562_v9, %v7220_v5  ;;  %v2412_v13 = vpop.f32.mrb[29].mxu1  ;;  %v6071_v9 = vpack.c.bf16 %v4860_v12, %v4857_v31 }
 0xff7   :  { %v2423_v2 = vadd.f32 %v2412_v13, %v7222_v55  ;;  %v4859_v13 = vld [vmem:[%s7931_s5 + $0x168] sm:$0xff] }
 0xff8   :  { %v7345_v34 = vadd.f32 %v4835_v25, %v2424_v20  ;;  %v4856_v20 = vld [vmem:[%s7931_s5 + $0x150] sm:$0xff] }
 0xff9   :  { %v7347_v32 = vadd.f32 %v4835_v25, %v2423_v2  ;;  %v6067_v25 = vpack.c.bf16 %v4854_v61, %v4851_v24  ;;  %v6073_v2 = vpack.c.bf16 %v4859_v13, %v4856_v20  ;;  %v4861_v24 = vld [vmem:[%s7931_s5 + $0x178] sm:$0xff] }
 0xffa   :  { %v2450_v35 = vsel %vm148_vm0, %v7345_v34, 0.0  ;;  %v6087_v61 = vpack.c.bf16 %v4861_v24, %v4858_v23  ;;  %v7491_v24 = vld [vmem:[#allocation2 + $0x8] sm:$0xff] }
 0xffb   :  { %2451 = vadd.xlane.f32.xlu1 %v2450_v35  ;;  %v2447_v37 = vsel %vm148_vm0, %v7347_v32, 0.0  ;;  %6068 = vmatprep.subr.bf16.mxu0 %v6067_v25  ;;  %v4840_v35 = vld [vmem:[%s7931_s5 + $0xd0] sm:$0xff] }
 0xffc   :  { %2448 = vadd.xlane.f32.xlu0 %v2447_v37  ;;  %6070 = vmatpush1.bf16.msra.mxu0 %v6069_v1  ;;  %v4843_v37 = vld [vmem:[%s7931_s5 + $0xe8] sm:$0xff] }
 0xffd   :  { %6072 = vmatprep.subr.bf16.mxu0 %v6071_v9 }
0x1000   :  { %6074 = vmatpush1.bf16.msra.mxu0 %v6073_v2 }
0x1075   :  { %v2446_v38 = vpop.xlane.xlu1 %2445 }
0x1076   :  { %v2454_v39 = vmul.f32 0.015625, %v2446_v38  ;;  %v2443_v46 = vpop.xlane.xlu0 %2442  ;;  %v6075_v38 = vpack.c.bf16 %v4843_v37, %v4840_v35 }
0x1077   :  { %v2453_v48 = vmul.f32 0.015625, %v2443_v46 }
0x1078   :  { %v7354_v5 = vsub.f32 %v7335_v30, %v2454_v39  ;;  %6076 = vmatprep.subr.bf16.mxu0 %v6075_v38 }
0x1079   :  { %v7357_v55 = vsub.f32 %v7337_v27, %v2453_v48 }
0x107a   :  { %v2462_v42 = vmul.f32 %v7354_v5, %v7354_v5 }
0x107b   :  { %v2461_v51 = vmul.f32 %v7357_v55, %v7357_v55 }
0x107c   :  { %v2468_v53 = vsel %vm148_vm0, %v2462_v42, 0.0 }
0x107d   :  { %2469 = vadd.xlane.f32.xlu1 %v2468_v53  ;;  %v2465_v3 = vsel %vm148_vm0, %v2461_v51, 0.0 }
0x107e   :  { %2466 = vadd.xlane.f32.xlu0 %v2465_v3 }
0x1088   :  { %v2452_v44 = vpop.xlane.xlu1 %2451 }
0x1089   :  { %v2456_v0 = vmul.f32 0.015625, %v2452_v44  ;;  %v2449_v56 = vpop.xlane.xlu0 %2448 }
0x108a   :  { %v2455_v60 = vmul.f32 0.015625, %v2449_v56 }
0x108b   :  { %v7366_v18 = vsub.f32 %v7345_v34, %v2456_v0  ;;  %v4836_v0 = vld [vmem:[#allocation9 + $0xa] ss:$0 sm:$0xff] }
0x108c   :  { %v7369_v62 = vsub.f32 %v7347_v32, %v2455_v60 }
0x108d   :  { %v2464_v33 = vmul.f32 %v7366_v18, %v7366_v18 }
0x108e   :  { %v2463_v19 = vmul.f32 %v7369_v62, %v7369_v62 }
0x108f   :  { %v2474_v29 = vsel %vm148_vm0, %v2464_v33, 0.0  ;;  %v4837_v33 = vld [vmem:[#allocation9 + $0xb] ss:$0 sm:$0xff] }
0x1090   :  { %2475 = vadd.xlane.f32.xlu1 %v2474_v29  ;;  %v2471_v28 = vsel %vm148_vm0, %v2463_v19, 0.0  ;;  %v4846_v19 = vld [vmem:[%s7931_s5 + $0x100] sm:$0xff]  ;;  %v4849_v29 = vld [vmem:[%s7931_s5 + $0x118] sm:$0xff] }
0x1091   :  { %2472 = vadd.xlane.f32.xlu0 %v2471_v28  ;;  %v6079_v52 = vpack.c.bf16 %v4849_v29, %v4846_v19 }
0x110a   :  { %v2470_v39 = vpop.xlane.xlu1 %2469 }
0x110b   :  { %v2478_v46 = vmul.f32 0.015625, %v2470_v39  ;;  %v2467_v48 = vpop.xlane.xlu0 %2466 }
0x110c   :  { %v2477_v42 = vmul.f32 0.015625, %v2467_v48 }
0x110d   :  { %v2482_v51 = vadd.f32 1e-05, %v2478_v46 }
0x110e   :  { %v2481_v53 = vadd.f32 1e-05, %v2477_v42 }
0x110f   :  { %6348 = vrsqrt.f32 %v2482_v51 }
0x1110   :  { %6350 = vrsqrt.f32 %v2481_v53 }
0x1119   :  { %v6349_v3 = vpop.eup %6348 }
0x111a   :  { %v6351_v44 = vpop.eup %6350  ;;  %v2490_v60 = vmul.f32 %v6349_v3, %v7354_v5  ;;  %v4852_v5 = vld [vmem:[%s7931_s5 + $0x130] sm:$0xff] }
0x111b   :  { %v2489_v56 = vmul.f32 %v6351_v44, %v7357_v55  ;;  %v6083_v22 = vpack.c.bf16 %v4855_v16, %v4852_v5 }
0x111c   :  { %v2500_v14 = vmul.f32 %v4836_v0, %v2490_v60 }
0x111d   :  { %v2499_v6 = vmul.f32 %v4836_v0, %v2489_v56  ;;  %v2476_v28 = vpop.xlane.xlu1 %2475 }
0x111e   :  { %v2480_v58 = vmul.f32 0.015625, %v2476_v28  ;;  %v2473_v11 = vpop.xlane.xlu0 %2472  ;;  %v2510_v15 = vadd.f32 %v4837_v33, %v2500_v14 }
0x111f   :  { %v2509_v54 = vadd.f32 %v4837_v33, %v2499_v6  ;;  %v2479_v8 = vmul.f32 0.015625, %v2473_v11 }
0x1120   :  { %v2484_v55 = vadd.f32 1e-05, %v2480_v58 }
0x1121   :  { %v2483_v17 = vadd.f32 1e-05, %v2479_v8  ;;  %4862 = vmatmul.mubr.msk.f32.vlgmr.msra.gmra.mrb[34].mxu0 %vm148_vm0, %v2509_v54 }
0x1122   :  { %6352 = vrsqrt.f32 %v2484_v55  ;;  %2638 = vmatprep.mubr.f32.mxu0 %v6563_v50  ;;  %6078 = vmatpush3.bf16.msra.mxu0 %v6075_v38 }
0x1123   :  { %6354 = vrsqrt.f32 %v2483_v17  ;;  %6080 = vmatprep.subr.bf16.mxu0 %v6079_v52 }
0x1125   :  { %4863 = vmatmul.mubr.msk.f32.gmra.mrb[36].mxu0 %vm148_vm0, %v2510_v15 }
0x1126   :  { %6082 = vmatpush3.bf16.msra.mxu0 %v6079_v52  ;;  %2644 = vmatprep.mubr.f32.mxu0 %v6563_v50 }
0x1127   :  { %6084 = vmatprep.subr.bf16.mxu0 %v6083_v22 }
0x112a   :  { %6086 = vmatpush3.bf16.msra.mxu0 %v6083_v22  ;;  %v7488_v22 = vld [vmem:[#allocation2] sm:$0xff] }
0x112b   :  { %6088 = vmatprep.subr.bf16.mxu0 %v6087_v61 }
0x112c   :  { %v6353_v25 = vpop.eup %6352 }
0x112d   :  { %v6355_v26 = vpop.eup %6354  ;;  %v2492_v1 = vmul.f32 %v6353_v25, %v7366_v18  ;;  %v2539_v18 = vld [vmem:[#allocation4 + $0x3] sm:$0x7] }
0x112e   :  { %v2491_v4 = vmul.f32 %v6355_v26, %v7369_v62  ;;  %6090 = vmatpush3.bf16.msra.mxu0 %v6087_v61  ;;  %v2548_v62 = vrot.slane %v2539_v18, %v254_v41  ;;  %v2552_v19 = vrot.slane %v2539_v18, %v258_v63 }
0x112f   :  { %v2502_v9 = vmul.f32 %v4836_v0, %v2492_v1 }
0x1130   :  { %v2501_v31 = vmul.f32 %v4836_v0, %v2491_v4 }
0x1131   :  { %v2512_v20 = vadd.f32 %v4837_v33, %v2502_v9 }
0x1132   :  { %v2511_v12 = vadd.f32 %v4837_v33, %v2501_v31 }
0x1134   :  { %4864 = vmatmul.mubr.msk.f32.gmra.mrb[38].mxu0 %vm148_vm0, %v2511_v12 }
0x1135   :  { %2650 = vmatprep.mubr.f32.mxu0 %v6563_v50  ;;  %v2544_v50 = vrot.slane %v2539_v18, %v250_v43 }
0x1138   :  { %4865 = vmatmul.mubr.msk.f32.gmra.mrb[40].mxu0 %vm148_vm0, %v2512_v20 }
0x1139   :  { %5579 = vmatprep.mubr.msk.f32.mxu0 %vm148_vm0, %v2509_v54 }
0x113c   :  { %5580 = vmatmul.mubr.msk.f32.vlgmr.msra.gmra.mrb[42].mxu0 %vm148_vm0, %v2510_v15 }
0x113d   :  { %5582 = vmatprep.mubr.msk.f32.mxu0 %vm148_vm0, %v2511_v12 }
0x1140   :  { %5583 = vmatmul.mubr.msk.f32.gmra.mrb[44].mxu0 %vm148_vm0, %v2512_v20 }
0x11f4   :  { %v2634_v13 = vpop.f32.mrb[34].mxu0 }
0x11f5   :  { %v2636_v2 = vpop.f32.mrb[35].mxu0  ;;  %v2635_v48 = vadd.f32 %v2634_v13, %v2544_v50 }
0x11f6   :  { %v2637_v35 = vadd.f32 %v2636_v2, %v2548_v62  ;;  %v7503_v2 = vld [vmem:[#allocation2 + $0x10] sm:$0xff] }
0x11f7   :  { %v2746_v41 = vmul.f32 %v2635_v48, %v6854_v47  ;;  %v2742_v31 = vmul.f32 %v7488_v22, %v2635_v48 }
0x11f8   :  { %v2774_v37 = vmul.f32 %v2637_v35, %v6854_v47  ;;  %v2640_v38 = vpop.f32.mrb[36].mxu0  ;;  %v2770_v23 = vmul.f32 %v7488_v22, %v2637_v35 }
0x11f9   :  { %v2642_v39 = vpop.f32.mrb[37].mxu0  ;;  %v2641_v51 = vadd.f32 %v2640_v38, %v2544_v50 }
0x11fa   :  { %v2643_v46 = vadd.f32 %v2642_v39, %v2548_v62  ;;  %2782 = vrot.lane.b32.xlu0 %v2774_v37, %s6564_s6 }
0x11fb   :  { %v2747_v53 = vmul.f32 %v2641_v51, %v6856_v49  ;;  %v2743_v18 = vmul.f32 %v7491_v24, %v2641_v51 }
0x11fc   :  { %v2775_v42 = vmul.f32 %v2643_v46, %v6856_v49  ;;  %v2771_v61 = vmul.f32 %v7491_v24, %v2643_v46 }
0x11fe   :  { %2784 = vrot.lane.b32.xlu1 %v2775_v42, %s6564_s6 }
0x1202   :  { %2754 = vrot.lane.b32.xlu1 %v2746_v41, %s6564_s6 }
0x1206   :  { %2756 = vrot.lane.b32.xlu1 %v2747_v53, %s6564_s6 }
0x1207   :  { %v2646_v43 = vpop.f32.mrb[38].mxu0 }
0x1208   :  { %v2648_v3 = vpop.f32.mrb[39].mxu0  ;;  %v2647_v0 = vadd.f32 %v2646_v43, %v2544_v50 }
0x1209   :  { %v2649_v44 = vadd.f32 %v2648_v3, %v2548_v62 }
0x120a   :  { %v2748_v6 = vmul.f32 %v2647_v0, %v6860_v57  ;;  %v2744_v38 = vmul.f32 %v7503_v2, %v2647_v0 }
0x120b   :  { %v2776_v56 = vmul.f32 %v2649_v44, %v6860_v57  ;;  %v2652_v60 = vpop.f32.mrb[40].mxu0  ;;  %v2772_v35 = vmul.f32 %v7503_v2, %v2649_v44 }
0x120c   :  { %v2654_v33 = vpop.f32.mrb[41].mxu0  ;;  %v2653_v28 = vadd.f32 %v2652_v60, %v2544_v50  ;;  %v7506_v50 = vld [vmem:[#allocation2 + $0x18] sm:$0xff] }
0x120d   :  { %v2655_v29 = vadd.f32 %v2654_v33, %v2548_v62  ;;  %2786 = vrot.lane.b32.xlu0 %v2776_v56, %s6564_s6 }
0x120e   :  { %v2749_v52 = vmul.f32 %v2653_v28, %v6869_v10  ;;  %v2745_v43 = vmul.f32 %v7506_v50, %v2653_v28 }
0x120f   :  { %v2777_v58 = vmul.f32 %v2655_v29, %v6869_v10  ;;  %v5581_v11 = vpop.f32.mrb[42].mxu0  ;;  %v2773_v37 = vmul.f32 %v7506_v50, %v2655_v29 }
0x1210   :  { %v2729_v54 = vadd.f32 %v5581_v11, %v2552_v19  ;;  %v2723_v8 = vpop.f32.mrb[43].mxu0 }
0x1211   :  { %v2724_v14 = vadd.f32 %v2723_v8, %v2552_v19  ;;  %2788 = vrot.lane.b32.xlu1 %v2777_v58, %s6564_s6  ;;  %2758 = vrot.lane.b32.xlu0 %v2748_v6, %s6564_s6 }
0x1213   :  { %v6097_v40 = vpack.c.bf16 %v2729_v54, %v2724_v14  ;;  %v5584_v63 = vpop.f32.mrb[44].mxu0 }
0x1214   :  { %v2739_v55 = vadd.f32 %v5584_v63, %v2552_v19  ;;  %v2733_v5 = vpop.f32.mrb[45].mxu0 }
0x1215   :  { %v2734_v16 = vadd.f32 %v2733_v5, %v2552_v19  ;;  %2760 = vrot.lane.b32.xlu1 %v2749_v52, %s6564_s6 }
0x1217   :  { %v7486_v17 = vpack.c.bf16 %v2739_v55, %v2734_v16 }
0x126c   :  { %v2783_v15 = vpop.permute.xlu0 %2782 }
0x126d   :  { %v2794_v26 = vadd.f32 %v2783_v15, %v2770_v23 }
0x1270   :  { %v2785_v25 = vpop.permute.xlu1 %2784 }
0x1271   :  { %v2795_v4 = vadd.f32 %v2785_v25, %v2771_v61 }
0x1273   :  { %v6091_v1 = vpack.c.bf16 %v2795_v4, %v2794_v26 }
0x1274   :  { %v2755_v12 = vpop.permute.xlu1 %2754 }
0x1275   :  { %v2766_v9 = vadd.f32 %v2755_v12, %v2742_v31  ;;  %6093 = vmatprep.subr.msk.bf16.mxu1 %vm6892_vm1, %v6091_v1 }
0x1276   :  { %6096 = vmatpush3.bf16.xpose.msk.msra.mxu1 %vm6892_vm1, %v6091_v1 }
0x1277   :  { %5589 = vmatprep.mubr.msk.f32.mxu1 %vm148_vm0, %v2766_v9  ;;  %6098 = vmatprep.subr.bf16.mxu1 %v6097_v40 }
0x1278   :  { %v2757_v20 = vpop.permute.xlu1 %2756 }
0x1279   :  { %v2767_v62 = vadd.f32 %v2757_v20, %v2743_v18 }
0x127d   :  { %5590 = vmatmul.mubr.msk.f32.vlgmr.msra.gmra.mrb[30].mxu1 %vm148_vm0, %v2767_v62  ;;  %v3183_v62 = vld [vmem:[#allocation7 + $0xc0] sm:$0xff] }
0x127e   :  { %6100 = vmatpush3.bf16.msra.mxu1 %v6097_v40 }
0x127f   :  { %v2787_v13 = vpop.permute.xlu0 %2786  ;;  %6108 = vmatprep.subr.bf16.mxu1 %v7486_v17 }
0x1280   :  { %v2796_v48 = vadd.f32 %v2787_v13, %v2772_v35  ;;  %v3184_v13 = vld [vmem:[#allocation7 + $0xc8] sm:$0xff]  ;;  %v3185_v35 = vld [vmem:[#allocation7 + $0xd0] sm:$0xff] }
0x1283   :  { %v2789_v39 = vpop.permute.xlu1 %2788  ;;  %v2759_v46 = vpop.permute.xlu0 %2758 }
0x1284   :  { %v2797_v42 = vadd.f32 %v2789_v39, %v2773_v37  ;;  %v2768_v41 = vadd.f32 %v2759_v46, %v2744_v38  ;;  %v6111_v37 = vpack.c.bf16 %v3184_v13, %v3183_v62  ;;  %v3186_v38 = vld [vmem:[#allocation7 + $0xd8] sm:$0xff]  ;;  %v3187_v46 = vld [vmem:[#allocation7 + $0xe0] sm:$0xff]  ;;  %v6423_v62 = vld [vmem:[%s7927_s1 + $0x38] sm:$0xff] }
0x1285   :  { %v6115_v39 = vpack.c.bf16 %v3186_v38, %v3185_v35  ;;  %v4886_v35 = vld [vmem:[#allocation9 + $0x10] ss:$0 sm:$0xff] }
0x1286   :  { %v6101_v51 = vpack.c.bf16 %v2797_v42, %v2796_v48  ;;  %5603 = vmatprep.mubr.msk.f32.mxu0 %vm148_vm0, %v2768_v41  ;;  %v3188_v48 = vld [vmem:[#allocation7 + $0xe8] sm:$0xff]  ;;  %v3189_v41 = vld [vmem:[#allocation7 + $0xf0] sm:$0xff] }
0x1287   :  { %v2761_v53 = vpop.permute.xlu1 %2760  ;;  %v6119_v42 = vpack.c.bf16 %v3188_v48, %v3187_v46 }
0x1288   :  { %6103 = vmatprep.subr.msk.bf16.mxu0 %vm6892_vm1, %v6101_v51  ;;  %v2769_v3 = vadd.f32 %v2761_v53, %v2745_v43 }
0x1289   :  { %6106 = vmatpush3.bf16.xpose.msk.msra.mxu0 %vm6892_vm1, %v6101_v51  ;;  %v3190_v51 = vld [vmem:[#allocation7 + $0xf8] sm:$0xff] }
0x128a   :  { %6112 = vmatprep.subr.bf16.mxu0 %v6111_v37  ;;  %v6123_v53 = vpack.c.bf16 %v3190_v51, %v3189_v41 }
0x1290   :  { %5604 = vmatmul.mubr.msk.f32.vlgmr.msra.gmra.mrb[46].mxu0 %vm148_vm0, %v2769_v3 }
0x1291   :  { %6114 = vmatpush3.bf16.msra.mxu0 %v6111_v37 }
0x1292   :  { %6116 = vmatprep.subr.bf16.mxu0 %v6115_v39 }
0x1295   :  { %6118 = vmatpush3.bf16.msra.mxu0 %v6115_v39 }
0x1296   :  { %6120 = vmatprep.subr.bf16.mxu0 %v6119_v42 }
0x1299   :  { %6122 = vmatpush3.bf16.msra.mxu0 %v6119_v42 }
0x129a   :  { %6124 = vmatprep.subr.bf16.mxu0 %v6123_v53 }
0x129d   :  { %6126 = vmatpush3.bf16.msra.mxu0 %v6123_v53 }
0x1350   :  { %v5591_v44 = vpop.f32.mrb[30].mxu1 }
0x1351   :  { %v2886_v0 = vmul.f32 0.125, %v5591_v44  ;;  %v2876_v56 = vpop.f32.mrb[31].mxu1 }
0x1352   :  { %v2885_v60 = vmul.f32 0.125, %v2876_v56 }
0x1353   :  { %v2890_v33 = vsel %vm610_vm2, %v2886_v0, -inf }
0x1354   :  { %2891 = vmax.xlane.f32.xlu1 %v2890_v33  ;;  %v2887_v19 = vsel %vm610_vm2, %v2885_v60, -inf }
0x1355   :  { %2888 = vmax.xlane.f32.xlu0 %v2887_v19 }
0x1363   :  { %v5605_v29 = vpop.f32.mrb[46].mxu0 }
0x1364   :  { %v3068_v6 = vpop.f32.mrb[47].mxu0  ;;  %v3078_v11 = vmul.f32 0.125, %v5605_v29 }
0x1365   :  { %v3077_v58 = vmul.f32 0.125, %v3068_v6 }
0x1366   :  { %v3082_v28 = vsel %vm610_vm2, %v3078_v11, -inf }
0x1367   :  { %v3079_v54 = vsel %vm610_vm2, %v3077_v58, -inf }
0x1368   :  { %3080 = vmax.xlane.f32.xlu0 %v3079_v54  ;;  %v4902_v54 = vld [vmem:[%s7933_s7 + $0x100] sm:$0xff] }
0x136c   :  { %3083 = vmax.xlane.f32.xlu0 %v3082_v28 }
0x13e1   :  { %v2892_v8 = vpop.xlane.xlu1 %2891 }
0x13e2   :  { %v2894_v14 = vsub.f32 %v2886_v0, %v2892_v8  ;;  %v2889_v52 = vpop.xlane.xlu0 %2888  ;;  %v4904_v8 = vld [vmem:[%s7933_s7 + $0x110] sm:$0xff] }
0x13e3   :  { %v2893_v40 = vsub.f32 %v2885_v60, %v2889_v52 }
0x13e4   :  { %v2897_v63 = vmul.f32 1.442695, %v2894_v14  ;;  %v4905_v14 = vld [vmem:[%s7933_s7 + $0x118] sm:$0xff] }
0x13e5   :  { %v2895_v55 = vmul.f32 1.442695, %v2893_v40 }
0x13e6   :  { %6356 = vpow2.f32 %v2897_v63  ;;  %v6147_v63 = vpack.c.bf16 %v4905_v14, %v4904_v8 }
0x13e7   :  { %6358 = vpow2.f32 %v2895_v55  ;;  %v4906_v55 = vld [vmem:[%s7933_s7 + $0x120] sm:$0xff] }
0x13f0   :  { %v6357_v5 = vpop.eup %6356 }
0x13f1   :  { %v6359_v16 = vpop.eup %6358  ;;  %v2902_v15 = vsel %vm610_vm2, %v6357_v5, 0.0 }
0x13f2   :  { %2903 = vadd.xlane.f32.xlu1 %v2902_v15  ;;  %v2899_v23 = vsel %vm610_vm2, %v6359_v16, 0.0  ;;  %v4908_v15 = vld [vmem:[%s7933_s7 + $0x130] sm:$0xff] }
0x13f3   :  { %2900 = vadd.xlane.f32.xlu0 %v2899_v23  ;;  %v4909_v23 = vld [vmem:[%s7933_s7 + $0x138] sm:$0xff] }
0x13f5   :  { %v3081_v61 = vpop.xlane.xlu0 %3080 }
0x13f6   :  { %v3085_v25 = vsub.f32 %v3077_v58, %v3081_v61  ;;  %v6155_v61 = vpack.c.bf16 %v4909_v23, %v4908_v15 }
0x13f8   :  { %v3087_v26 = vmul.f32 1.442695, %v3085_v25 }
0x13f9   :  { %v3084_v4 = vpop.xlane.xlu0 %3083 }
0x13fa   :  { %6360 = vpow2.f32 %v3087_v26  ;;  %v3086_v1 = vsub.f32 %v3078_v11, %v3084_v4  ;;  %v6416_v4 = vld [vmem:[%s7927_s1] sm:$0xff] }
0x13fc   :  { %v3089_v31 = vmul.f32 1.442695, %v3086_v1  ;;  %v6417_v1 = vld [vmem:[%s7927_s1 + $0x8] sm:$0xff] }
0x13fe   :  { %6362 = vpow2.f32 %v3089_v31  ;;  %v6418_v31 = vld [vmem:[%s7927_s1 + $0x10] sm:$0xff] }
0x1404   :  { %v6361_v12 = vpop.eup %6360 }
0x1405   :  { %v3091_v9 = vsel %vm610_vm2, %v6361_v12, 0.0 }
0x1406   :  { %3092 = vadd.xlane.f32.xlu0 %v3091_v9  ;;  %v6420_v9 = vld [vmem:[%s7927_s1 + $0x20] sm:$0xff] }
0x1408   :  { %v6363_v20 = vpop.eup %6362 }
0x1409   :  { %v3094_v18 = vsel %vm610_vm2, %v6363_v20, 0.0 }
0x140a   :  { %3095 = vadd.xlane.f32.xlu1 %v3094_v18  ;;  %v6422_v18 = vld [vmem:[%s7927_s1 + $0x30] sm:$0xff] }
0x147f   :  { %v2904_v43 = vpop.xlane.xlu1 %2903 }
0x1480   :  { %6364 = vrcp.f32 %v2904_v43  ;;  %v2901_v3 = vpop.xlane.xlu0 %2900 }
0x1481   :  { %6366 = vrcp.f32 %v2901_v3 }
0x148a   :  { %v6365_v44 = vpop.eup %6364 }
0x148b   :  { %v6367_v0 = vpop.eup %6366  ;;  %v2908_v60 = vmul.f32 %v6365_v44, %v6357_v5  ;;  %v4907_v5 = vld [vmem:[%s7933_s7 + $0x128] sm:$0xff] }
0x148c   :  { %v2907_v56 = vmul.f32 %v6367_v0, %v6359_v16  ;;  %v6151_v16 = vpack.c.bf16 %v4907_v5, %v4906_v55 }
0x148e   :  { %5596 = vmatprep.mubr.msk.f32.mxu1 %vm610_vm2, %v2907_v56 }
0x148f   :  { %5597 = vmatmul.mubr.msk.f32.vlgmr.msra.gmra.mrb[32].mxu1 %vm610_vm2, %v2908_v60 }
0x1490   :  { %6110 = vmatpush3.bf16.msra.mxu1 %v7486_v17  ;;  %v4903_v17 = vld [vmem:[%s7933_s7 + $0x108] sm:$0xff] }
0x1491   :  { %v6143_v28 = vpack.c.bf16 %v4903_v17, %v4902_v54 }
0x1493   :  { %v3093_v33 = vpop.xlane.xlu0 %3092  ;;  %6144 = vmatprep.subr.bf16.mxu0 %v6143_v28 }
0x1494   :  { %6368 = vrcp.f32 %v3093_v33 }
0x1497   :  { %v3096_v19 = vpop.xlane.xlu1 %3095 }
0x1498   :  { %6370 = vrcp.f32 %v3096_v19 }
0x149e   :  { %v6369_v29 = vpop.eup %6368 }
0x149f   :  { %v3099_v6 = vmul.f32 %v6369_v29, %v6361_v12  ;;  %v6419_v12 = vld [vmem:[%s7927_s1 + $0x18] sm:$0xff] }
0x14a1   :  { %5610 = vmatprep.mubr.msk.f32.mxu1 %vm610_vm2, %v3099_v6  ;;  %v4910_v6 = vld [vmem:[#allocation6 + $0x4] ss:$0 sm:$0xff] }
0x14a2   :  { %v6371_v58 = vpop.eup %6370 }
0x14a3   :  { %v3100_v11 = vmul.f32 %v6371_v58, %v6363_v20  ;;  %v6421_v20 = vld [vmem:[%s7927_s1 + $0x28] sm:$0xff] }
0x14a5   :  { %5611 = vmatmul.mubr.msk.f32.vlgmr.msra.gmra.mrb[34].mxu1 %vm610_vm2, %v3100_v11 }
0x1562   :  { %v5598_v52 = vpop.f32.mrb[32].mxu1 }
0x1563   :  { %v2981_v40 = vpop.f32.mrb[33].mxu1 }
0x1564   :  { %5629 = vmatprep.mubr.msk.f32.mxu0 %vm148_vm0, %v2981_v40 }
0x1565   :  { %5630 = vmatmul.mubr.msk.f32.vlgmr.msra.gmra.mrb[48].mxu0 %vm148_vm0, %v5598_v52 }
0x1566   :  { %6146 = vmatpush3.bf16.msra.mxu0 %v6143_v28 }
0x1567   :  { %6148 = vmatprep.subr.bf16.mxu0 %v6147_v63 }
0x156a   :  { %6150 = vmatpush3.bf16.msra.mxu0 %v6147_v63 }
0x156b   :  { %6152 = vmatprep.subr.bf16.mxu0 %v6151_v16 }
0x156e   :  { %6154 = vmatpush3.bf16.msra.mxu0 %v6151_v16 }
0x156f   :  { %6156 = vmatprep.subr.bf16.mxu0 %v6155_v61 }
0x1572   :  { %6158 = vmatpush3.bf16.msra.mxu0 %v6155_v61 }
0x1578   :  { %v5612_v25 = vpop.f32.mrb[34].mxu1 }
0x1579   :  { %v3173_v26 = vpop.f32.mrb[35].mxu1 }
0x157a   :  { %5632 = vmatprep.mubr.msk.f32.mxu0 %vm148_vm0, %v3173_v26 }
0x157b   :  { %5633 = vmatmul.mubr.msk.f32.gmra.mrb[50].mxu0 %vm148_vm0, %v5612_v25 }
0x157c   :  { %5673 = vmatprep.mubr.msk.f32.mxu0 %vm148_vm0, %v6416_v4 }
0x157f   :  { %5674 = vmatmul.mubr.msk.f32.vlgmr.msra.gmra.mrb[52].mxu0 %vm148_vm0, %v6417_v1 }
0x1580   :  { %5676 = vmatprep.mubr.msk.f32.mxu0 %vm148_vm0, %v6418_v31  ;;  %v4889_v31 = vld [vmem:[%s7933_s7 + $0xc0] sm:$0xff] }
0x1583   :  { %5677 = vmatmul.mubr.msk.f32.gmra.mrb[54].mxu0 %vm148_vm0, %v6419_v12  ;;  %v4890_v12 = vld [vmem:[%s7933_s7 + $0xc8] sm:$0xff] }
0x1584   :  { %5679 = vmatprep.mubr.msk.f32.mxu0 %vm148_vm0, %v6420_v9 }
0x1587   :  { %5680 = vmatmul.mubr.msk.f32.gmra.mrb[56].mxu0 %vm148_vm0, %v6421_v20  ;;  %v6127_v20 = vpack.c.bf16 %v4890_v12, %v4889_v31 }
0x1588   :  { %5682 = vmatprep.mubr.msk.f32.mxu0 %vm148_vm0, %v6422_v18 }
0x1589   :  { %6128 = vmatprep.subr.bf16.mxu1 %v6127_v20 }
0x158a   :  { %6130 = vmatpush3.bf16.msra.mxu1 %v6127_v20 }
0x158b   :  { %5683 = vmatmul.mubr.msk.f32.gmra.mrb[58].mxu0 %vm148_vm0, %v6423_v62 }
0x1638   :  { %v5631_v13 = vpop.f32.mrb[48].mxu0 }
0x1639   :  { %v3289_v37 = vadd.f32 %v5631_v13, %v7335_v30  ;;  %v3269_v38 = vpop.f32.mrb[49].mxu0  ;;  %v4891_v13 = vld [vmem:[%s7933_s7 + $0xd0] sm:$0xff] }
0x163a   :  { %v3288_v39 = vadd.f32 %v3269_v38, %v7337_v27  ;;  %v4893_v38 = vld [vmem:[%s7933_s7 + $0xe0] sm:$0xff] }
0x163b   :  { %v7592_v46 = vadd.f32 %v4886_v35, %v3289_v37 }
0x163c   :  { %v7594_v48 = vadd.f32 %v4886_v35, %v3288_v39  ;;  %v4894_v39 = vld [vmem:[%s7933_s7 + $0xe8] sm:$0xff] }
0x163d   :  { %v3311_v42 = vsel %vm148_vm0, %v7592_v46, 0.0 }
0x163e   :  { %3312 = vadd.xlane.f32.xlu1 %v3311_v42  ;;  %v3308_v41 = vsel %vm148_vm0, %v7594_v48, 0.0  ;;  %v6135_v42 = vpack.c.bf16 %v4894_v39, %v4893_v38 }
0x163f   :  { %3309 = vadd.xlane.f32.xlu0 %v3308_v41  ;;  %v4895_v41 = vld [vmem:[%s7933_s7 + $0xf0] sm:$0xff] }
0x164e   :  { %v5634_v51 = vpop.f32.mrb[50].mxu0 }
0x164f   :  { %v3291_v53 = vadd.f32 %v5634_v51, %v7345_v34  ;;  %v3279_v43 = vpop.f32.mrb[51].mxu0  ;;  %v4896_v51 = vld [vmem:[%s7933_s7 + $0xf8] sm:$0xff] }
0x1650   :  { %v3290_v30 = vadd.f32 %v3279_v43, %v7347_v32 }
0x1651   :  { %v7602_v3 = vadd.f32 %v4886_v35, %v3291_v53  ;;  %v6139_v53 = vpack.c.bf16 %v4896_v51, %v4895_v41 }
0x1652   :  { %v7604_v27 = vadd.f32 %v4886_v35, %v3290_v30  ;;  %v5675_v44 = vpop.f32.mrb[52].mxu0  ;;  %v4892_v35 = vld [vmem:[%s7933_s7 + $0xd8] sm:$0xff] }
0x1653   :  { %v3577_v0 = vpop.f32.mrb[53].mxu0  ;;  %v3317_v56 = vsel %vm148_vm0, %v7602_v3, 0.0  ;;  %v6131_v37 = vpack.c.bf16 %v4892_v35, %v4891_v13  ;;  %v3583_v43 = vadd.f32 %v5675_v44, %v4910_v6 }
0x1654   :  { %3318 = vadd.xlane.f32.xlu1 %v3317_v56  ;;  %v3314_v60 = vsel %vm148_vm0, %v7604_v27, 0.0 }
0x1655   :  { %3315 = vadd.xlane.f32.xlu0 %v3314_v60  ;;  %6132 = vmatprep.subr.bf16.mxu1 %v6131_v37  ;;  %v3775_v30 = vmul.f32 %v3583_v43, %v6856_v49  ;;  %v3578_v60 = vadd.f32 %v4910_v6, %v3577_v0  ;;  %v3767_v20 = vmul.f32 %v7491_v24, %v3583_v43 }
0x1656   :  { %v5678_v33 = vpop.f32.mrb[54].mxu0  ;;  %6134 = vmatpush3.bf16.msra.mxu1 %v6131_v37 }
0x1657   :  { %v3587_v19 = vpop.f32.mrb[55].mxu0  ;;  %6136 = vmatprep.subr.bf16.mxu1 %v6135_v42 }
0x1658   :  { %v3588_v56 = vadd.f32 %v4910_v6, %v3587_v19 }
0x165a   :  { %v5681_v34 = vpop.f32.mrb[56].mxu0  ;;  %6138 = vmatpush3.bf16.msra.mxu1 %v6135_v42  ;;  %v3768_v41 = vmul.f32 %v7503_v2, %v3588_v56 }
0x165b   :  { %v3597_v29 = vpop.f32.mrb[57].mxu0  ;;  %6140 = vmatprep.subr.bf16.mxu1 %v6139_v53 }
0x165e   :  { %v5684_v32 = vpop.f32.mrb[58].mxu0  ;;  %6142 = vmatpush3.bf16.msra.mxu1 %v6139_v53 }
0x165f   :  { %v7610_v58 = vadd.f32 %v5684_v32, %v4910_v6  ;;  %v3607_v11 = vpop.f32.mrb[59].mxu0  ;;  %v3593_v32 = vadd.f32 %v5678_v33, %v4910_v6 }
0x1660   :  { %v7612_v54 = vadd.f32 %v4910_v6, %v3607_v11  ;;  %v3776_v11 = vmul.f32 %v3588_v56, %v6860_v57 }
0x1661   :  { %v3769_v51 = vmul.f32 %v7506_v50, %v3593_v32 }
0x16cb   :  { %v3313_v17 = vpop.xlane.xlu1 %3312 }
0x16cc   :  { %v3321_v28 = vmul.f32 0.015625, %v3313_v17  ;;  %v3310_v8 = vpop.xlane.xlu0 %3309  ;;  %v3774_v17 = vmul.f32 %v3578_v60, %v6854_v47 }
0x16cd   :  { %v3320_v14 = vmul.f32 0.015625, %v3310_v8  ;;  %v3777_v8 = vmul.f32 %v3593_v32, %v6869_v10 }
0x16ce   :  { %v7615_v52 = vsub.f32 %v7592_v46, %v3321_v28  ;;  %v3598_v28 = vadd.f32 %v4910_v6, %v3597_v29 }
0x16cf   :  { %v7618_v40 = vsub.f32 %v7594_v48, %v3320_v14  ;;  %v3603_v14 = vadd.f32 %v5681_v34, %v4910_v6  ;;  %v4887_v6 = vld [vmem:[#allocation9 + $0xc] ss:$0 sm:$0xff] }
0x16d0   :  { %v3329_v63 = vmul.f32 %v7615_v52, %v7615_v52  ;;  %v3778_v44 = vmul.f32 %v3598_v28, %v7100_v45 }
0x16d1   :  { %v3328_v55 = vmul.f32 %v7618_v40, %v7618_v40  ;;  %v3779_v0 = vmul.f32 %v3603_v14, %v7097_v36  ;;  %v4888_v36 = vld [vmem:[#allocation9 + $0xd] ss:$0 sm:$0xff] }
0x16d2   :  { %v3335_v5 = vsel %vm148_vm0, %v3329_v63, 0.0 }
0x16d3   :  { %3336 = vadd.xlane.f32.xlu1 %v3335_v5  ;;  %v3332_v16 = vsel %vm148_vm0, %v3328_v55, 0.0 }
0x16d4   :  { %3333 = vadd.xlane.f32.xlu0 %v3332_v16 }
0x16e1   :  { %v3319_v15 = vpop.xlane.xlu1 %3318 }
0x16e2   :  { %v3323_v23 = vmul.f32 0.015625, %v3319_v15  ;;  %v3316_v61 = vpop.xlane.xlu0 %3315 }
0x16e3   :  { %v3322_v25 = vmul.f32 0.015625, %v3316_v61 }
0x16e4   :  { %v7627_v26 = vsub.f32 %v7602_v3, %v3323_v23 }
0x16e5   :  { %v7630_v4 = vsub.f32 %v7604_v27, %v3322_v25 }
0x16e6   :  { %v3331_v1 = vmul.f32 %v7627_v26, %v7627_v26 }
0x16e7   :  { %v3330_v9 = vmul.f32 %v7630_v4, %v7630_v4 }
0x16e8   :  { %v3341_v18 = vsel %vm148_vm0, %v3331_v1, 0.0 }
0x16e9   :  { %3342 = vadd.xlane.f32.xlu1 %v3341_v18  ;;  %v3338_v62 = vsel %vm148_vm0, %v3330_v9, 0.0 }
0x16ea   :  { %3339 = vadd.xlane.f32.xlu0 %v3338_v62  ;;  %v3766_v62 = vmul.f32 %v7488_v22, %v3578_v60 }
0x16fa   :  { %3792 = vrot.lane.b32.xlu1 %v3775_v30, %s6564_s6  ;;  %v6424_v30 = vld [vmem:[#allocation2 + $0x20] sm:$0xff] }
0x16fb   :  { %v3770_v60 = vmul.f32 %v6424_v30, %v3598_v28  ;;  %v3618_v30 = vld [vmem:[#allocation7 + $0x108] sm:$0xff] }
0x16fe   :  { %3794 = vrot.lane.b32.xlu1 %v3776_v11, %s6564_s6 }
0x1700   :  { %3790 = vrot.lane.b32.xlu0 %v3774_v17, %s6564_s6  ;;  %v6425_v17 = vld [vmem:[#allocation2 + $0x28] sm:$0xff] }
0x1702   :  { %3796 = vrot.lane.b32.xlu1 %v3777_v8, %s6564_s6  ;;  %v3771_v8 = vmul.f32 %v6425_v17, %v3603_v14  ;;  %v3620_v17 = vld [vmem:[#allocation7 + $0x118] sm:$0xff] }
0x1704   :  { %3798 = vrot.lane.b32.xlu0 %v3778_v44, %s6564_s6 }
0x1706   :  { %3800 = vrot.lane.b32.xlu1 %v3779_v0, %s6564_s6 }
0x1760   :  { %v3337_v33 = vpop.xlane.xlu1 %3336 }
0x1761   :  { %v3345_v19 = vmul.f32 0.015625, %v3337_v33  ;;  %v3334_v29 = vpop.xlane.xlu0 %3333 }
0x1762   :  { %v3344_v63 = vmul.f32 0.015625, %v3334_v29 }
0x1763   :  { %v3349_v55 = vadd.f32 1e-05, %v3345_v19 }
0x1764   :  { %v3348_v5 = vadd.f32 1e-05, %v3344_v63 }
0x1765   :  { %6372 = vrsqrt.f32 %v3349_v55 }
0x1766   :  { %6374 = vrsqrt.f32 %v3348_v5 }
0x176f   :  { %v6373_v34 = vpop.eup %6372 }
0x1770   :  { %v6375_v16 = vpop.eup %6374  ;;  %v3357_v45 = vmul.f32 %v6373_v34, %v7615_v52 }
0x1771   :  { %v3356_v15 = vmul.f32 %v6375_v16, %v7618_v40 }
0x1772   :  { %v3367_v23 = vmul.f32 %v4887_v6, %v3357_v45 }
0x1773   :  { %v3366_v61 = vmul.f32 %v4887_v6, %v3356_v15 }
0x1774   :  { %v3377_v31 = vadd.f32 %v4888_v36, %v3367_v23 }
0x1775   :  { %v3376_v25 = vadd.f32 %v4888_v36, %v3366_v61 }
0x1776   :  { %v3343_v1 = vpop.xlane.xlu1 %3342 }
0x1777   :  { %v3347_v12 = vmul.f32 0.015625, %v3343_v1  ;;  %v3340_v9 = vpop.xlane.xlu0 %3339  ;;  %5651 = vmatprep.mubr.msk.f32.mxu1 %vm148_vm0, %v3376_v25  ;;  %v3780_v1 = vmul.f32 %v7612_v54, %v7106_v59 }
0x1778   :  { %v3346_v18 = vmul.f32 0.015625, %v3340_v9  ;;  %5652 = vmatmul.mubr.msk.f32.vlgmr.msra.gmra.mrb[36].mxu1 %vm148_vm0, %v3377_v31 }
0x1779   :  { %v3351_v52 = vadd.f32 1e-05, %v3347_v12 }
0x177a   :  { %v3350_v13 = vadd.f32 1e-05, %v3346_v18  ;;  %v3793_v40 = vpop.permute.xlu1 %3792 }
0x177b   :  { %6376 = vrsqrt.f32 %v3351_v52  ;;  %v3815_v35 = vadd.f32 %v3793_v40, %v3767_v20  ;;  %v3791_v37 = vpop.permute.xlu0 %3790  ;;  %v6427_v40 = vld [vmem:[#allocation2 + $0x38] sm:$0xff] }
0x177c   :  { %6378 = vrsqrt.f32 %v3350_v13  ;;  %v3814_v38 = vadd.f32 %v3791_v37, %v3766_v62 }
0x177e   :  { %v6175_v39 = vpack.c.bf16 %v3815_v35, %v3814_v38  ;;  %v3795_v42 = vpop.permute.xlu1 %3794  ;;  %v3773_v35 = vmul.f32 %v6427_v40, %v7610_v58 }
0x177f   :  { %v3816_v43 = vadd.f32 %v3795_v42, %v3768_v41  ;;  %v3799_v44 = vpop.permute.xlu0 %3798 }
0x1780   :  { %6177 = vmatprep.subr.msk.bf16.mxu0 %vm6892_vm1, %v6175_v39  ;;  %v3818_v29 = vadd.f32 %v3799_v44, %v3770_v60  ;;  %v3619_v60 = vld [vmem:[#allocation7 + $0x110] sm:$0xff]  ;;  %v3622_v44 = vld [vmem:[#allocation7 + $0x128] sm:$0xff] }
0x1781   :  { %6180 = vmatpush3.bf16.xpose.msk.msra.mxu0 %vm6892_vm1, %v6175_v39 }
0x1782   :  { %v3797_v53 = vpop.permute.xlu1 %3796 }
0x1783   :  { %v3817_v11 = vadd.f32 %v3797_v53, %v3769_v51 }
0x1785   :  { %v6377_v0 = vpop.eup %6376  ;;  %v6181_v33 = vpack.c.bf16 %v3817_v11, %v3816_v43  ;;  %v3617_v43 = vld [vmem:[#allocation7 + $0x100] sm:$0xff] }
0x1786   :  { %v6379_v19 = vpop.eup %6378  ;;  %v3801_v56 = vpop.permute.xlu1 %3800  ;;  %v3359_v32 = vmul.f32 %v6377_v0, %v7627_v26  ;;  %v6426_v26 = vld [vmem:[%s7928_s2] sm:$0xff]  ;;  %v6159_v11 = vpack.c.bf16 %v3618_v30, %v3617_v43 }
0x1787   :  { %v3819_v63 = vadd.f32 %v3801_v56, %v3771_v8  ;;  %6183 = vmatprep.subr.msk.bf16.mxu0 %vm6892_vm1, %v6181_v33  ;;  %v3358_v55 = vmul.f32 %v6379_v19, %v7630_v4  ;;  %v4897_v4 = vld [vmem:[#allocation6 + $0x3] ss:$0 sm:$0xff]  ;;  %v6163_v8 = vpack.c.bf16 %v3620_v17, %v3619_v60  ;;  %v6430_v56 = vld [vmem:[%s7928_s2 + $0x10] sm:$0xff] }
0x1788   :  { %v3369_v5 = vmul.f32 %v4887_v6, %v3359_v32  ;;  %6160 = vmatprep.subr.bf16.mxu1 %v6159_v11  ;;  %v3624_v0 = vld [vmem:[#allocation7 + $0x138] sm:$0xff]  ;;  %v6431_v32 = vld [vmem:[%s7928_s2 + $0x18] sm:$0xff] }
0x1789   :  { %v6195_v34 = vpack.c.bf16 %v3819_v63, %v3818_v29  ;;  %6186 = vmatpush3.bf16.xpose.msk.msra.mxu0 %vm6892_vm1, %v6181_v33  ;;  %v3368_v28 = vmul.f32 %v4887_v6, %v3358_v55  ;;  %6162 = vmatpush3.bf16.msra.mxu1 %v6159_v11  ;;  %v6429_v19 = vld [vmem:[%s7928_s2 + $0x8] sm:$0xff]  ;;  %v6432_v29 = vld [vmem:[%s7928_s2 + $0x20] sm:$0xff]  ;;  %v6434_v55 = vld [vmem:[%s7928_s2 + $0x30] sm:$0xff] }
0x178a   :  { %v3379_v16 = vadd.f32 %v4888_v36, %v3369_v5  ;;  %6164 = vmatprep.subr.bf16.mxu1 %v6163_v8  ;;  %v6433_v63 = vld [vmem:[%s7928_s2 + $0x28] sm:$0xff]  ;;  %v6435_v5 = vld [vmem:[%s7928_s2 + $0x38] sm:$0xff] }
0x178b   :  { %6197 = vmatprep.subr.msk.bf16.mxu0 %vm6892_vm1, %v6195_v34  ;;  %v3378_v14 = vadd.f32 %v4888_v36, %v3368_v28  ;;  %v3781_v36 = vmul.f32 %v7610_v58, %v7109_v7 }
0x178d   :  { %5654 = vmatprep.mubr.msk.f32.mxu1 %vm148_vm0, %v3378_v14  ;;  %6166 = vmatpush3.bf16.msra.mxu1 %v6163_v8 }
0x178e   :  { %5655 = vmatmul.mubr.msk.f32.gmra.mrb[38].mxu1 %vm148_vm0, %v3379_v16 }
0x178f   :  { %5701 = vmatprep.mubr.msk.f32.mxu1 %vm148_vm0, %v6426_v26 }
0x184b   :  { %v5653_v45 = vpop.f32.mrb[36].mxu1 }
0x184c   :  { %v3481_v15 = vadd.f32 %v5653_v45, %v4897_v4  ;;  %v3475_v23 = vpop.f32.mrb[37].mxu1 }
0x184d   :  { %v3476_v6 = vadd.f32 %v4897_v4, %v3475_v23 }
0x184e   :  { %v3743_v61 = vmul.f32 %v3481_v15, %v6856_v49  ;;  %v3739_v59 = vmul.f32 %v7491_v24, %v3481_v15 }
0x184f   :  { %v3742_v25 = vmul.f32 %v3476_v6, %v6854_v47  ;;  %v3738_v18 = vmul.f32 %v7488_v22, %v3476_v6 }
0x1850   :  { %3752 = vrot.lane.b32.xlu1 %v3743_v61, %s6564_s6 }
0x1851   :  { %3750 = vrot.lane.b32.xlu0 %v3742_v25, %s6564_s6 }
0x1854   :  { %3804 = vrot.lane.b32.xlu1 %v3781_v36, %s6564_s6 }
0x1855   :  { %3802 = vrot.lane.b32.xlu0 %v3780_v1, %s6564_s6 }
0x1861   :  { %v5656_v31 = vpop.f32.mrb[38].mxu1 }
0x1862   :  { %v3491_v12 = vadd.f32 %v5656_v31, %v4897_v4  ;;  %v3485_v9 = vpop.f32.mrb[39].mxu1 }
0x1863   :  { %v3486_v49 = vadd.f32 %v4897_v4, %v3485_v9 }
0x1864   :  { %v3745_v47 = vmul.f32 %v3491_v12, %v6869_v10  ;;  %v6428_v10 = vld [vmem:[#allocation2 + $0x30] sm:$0xff] }
0x1865   :  { %v3744_v20 = vmul.f32 %v3486_v49, %v6860_v57  ;;  %v3772_v57 = vmul.f32 %v6428_v10, %v7612_v54  ;;  %v3740_v42 = vmul.f32 %v7503_v2, %v3486_v49  ;;  %v3741_v54 = vmul.f32 %v7506_v50, %v3491_v12  ;;  %v3623_v50 = vld [vmem:[#allocation7 + $0x130] sm:$0xff] }
0x1866   :  { %3756 = vrot.lane.b32.xlu1 %v3745_v47, %s6564_s6  ;;  %v6167_v2 = vpack.c.bf16 %v3622_v44, %v3621_v21  ;;  %v6171_v33 = vpack.c.bf16 %v3624_v0, %v3623_v50  ;;  %v4919_v10 = vld [vmem:[#allocation9 + $0x11] ss:$0 sm:$0xff] }
0x1867   :  { %3754 = vrot.lane.b32.xlu0 %v3744_v20, %s6564_s6 }
0x1868   :  { %6168 = vmatprep.subr.bf16.mxu1 %v6167_v2 }
0x1869   :  { %6170 = vmatpush3.bf16.msra.mxu1 %v6167_v2 }
0x186a   :  { %6172 = vmatprep.subr.bf16.mxu1 %v6171_v33 }
0x186d   :  { %6174 = vmatpush3.bf16.msra.mxu1 %v6171_v33 }
0x1870   :  { %5702 = vmatmul.mubr.msk.f32.vlgmr.msra.gmra.mrb[40].mxu1 %vm148_vm0, %v6429_v19 }
0x1871   :  { %5704 = vmatprep.mubr.msk.f32.mxu1 %vm148_vm0, %v6430_v56 }
0x1874   :  { %5705 = vmatmul.mubr.msk.f32.gmra.mrb[42].mxu1 %vm148_vm0, %v6431_v32 }
0x1875   :  { %5707 = vmatprep.mubr.msk.f32.mxu1 %vm148_vm0, %v6432_v29 }
0x1878   :  { %5708 = vmatmul.mubr.msk.f32.gmra.mrb[44].mxu1 %vm148_vm0, %v6433_v63 }
0x1879   :  { %5710 = vmatprep.mubr.msk.f32.mxu1 %vm148_vm0, %v6434_v55 }
0x187c   :  { %5711 = vmatmul.mubr.msk.f32.gmra.mrb[46].mxu1 %vm148_vm0, %v6435_v5  ;;  %v4219_v5 = vld [vmem:[#allocation7 + $0x140] sm:$0xff] }
0x18c2   :  { %v3753_v7 = vpop.permute.xlu1 %3752 }
0x18c3   :  { %v3751_v62 = vpop.permute.xlu0 %3750  ;;  %v3763_v13 = vadd.f32 %v3753_v7, %v3739_v59 }
0x18c4   :  { %v3762_v52 = vadd.f32 %v3751_v62, %v3738_v18 }
0x18c6   :  { %v3805_v37 = vpop.permute.xlu1 %3804  ;;  %5721 = vmatprep.mubr.msk.f32.mxu0 %vm148_vm0, %v3762_v52 }
0x18c7   :  { %v3821_v38 = vadd.f32 %v3805_v37, %v3773_v35  ;;  %5722 = vmatmul.mubr.msk.f32.vlgmr.msra.gmra.mrb[60].mxu0 %vm148_vm0, %v3763_v13  ;;  %v3803_v39 = vpop.permute.xlu0 %3802 }
0x18c8   :  { %6200 = vmatpush3.bf16.xpose.msk.msra.mxu0 %vm6892_vm1, %v6195_v34  ;;  %v3820_v22 = vadd.f32 %v3803_v39, %v3772_v57 }
0x18ca   :  { %v6201_v24 = vpack.c.bf16 %v3821_v38, %v3820_v22 }
0x18cc   :  { %6203 = vmatprep.subr.msk.bf16.mxu0 %vm6892_vm1, %v6201_v24 }
0x18d0   :  { %6206 = vmatpush3.bf16.xpose.msk.msra.mxu0 %vm6892_vm1, %v6201_v24 }
0x18d8   :  { %v3757_v58 = vpop.permute.xlu1 %3756 }
0x18d9   :  { %v3755_v41 = vpop.permute.xlu0 %3754  ;;  %v3765_v53 = vadd.f32 %v3757_v58, %v3741_v54 }
0x18da   :  { %v3764_v51 = vadd.f32 %v3755_v41, %v3740_v42 }
0x18dc   :  { %5743 = vmatprep.mubr.msk.f32.mxu0 %vm148_vm0, %v3764_v51 }
0x18dd   :  { %5744 = vmatmul.mubr.msk.f32.vlgmr.msra.gmra.mrb[62].mxu0 %vm148_vm0, %v3765_v53 }
0x1943   :  { %v5703_v37 = vpop.f32.mrb[40].mxu1 }
0x1944   :  { %v3699_v57 = vpop.f32.mrb[41].mxu1  ;;  %v3705_v38 = vadd.f32 %v5703_v37, %v4919_v10 }
0x1945   :  { %v3700_v39 = vadd.f32 %v4919_v10, %v3699_v57 }
0x1947   :  { %v6187_v22 = vpack.c.bf16 %v3705_v38, %v3700_v39  ;;  %v5706_v24 = vpop.f32.mrb[42].mxu1 }
0x1948   :  { %v3709_v42 = vpop.f32.mrb[43].mxu1  ;;  %v3715_v41 = vadd.f32 %v5706_v24, %v4919_v10 }
0x1949   :  { %v3710_v51 = vadd.f32 %v4919_v10, %v3709_v42  ;;  %6188 = vmatprep.subr.bf16.mxu1 %v6187_v22 }
0x194a   :  { %6190 = vmatpush3.bf16.msra.mxu1 %v6187_v22 }
0x194b   :  { %v6191_v53 = vpack.c.bf16 %v3715_v41, %v3710_v51  ;;  %v5709_v60 = vpop.f32.mrb[44].mxu1 }
0x194c   :  { %v3725_v11 = vadd.f32 %v5709_v60, %v4919_v10  ;;  %v3719_v17 = vpop.f32.mrb[45].mxu1 }
0x194d   :  { %6192 = vmatprep.subr.bf16.mxu1 %v6191_v53  ;;  %v3720_v8 = vadd.f32 %v4919_v10, %v3719_v17 }
0x194e   :  { %6194 = vmatpush3.bf16.msra.mxu1 %v6191_v53 }
0x194f   :  { %v6207_v21 = vpack.c.bf16 %v3725_v11, %v3720_v8  ;;  %v5712_v44 = vpop.f32.mrb[46].mxu1 }
0x1950   :  { %v3729_v2 = vpop.f32.mrb[47].mxu1  ;;  %v3735_v50 = vadd.f32 %v5712_v44, %v4919_v10  ;;  %v4951_v44 = vld [vmem:[%s7933_s7 + $0x140] sm:$0xff] }
0x1951   :  { %6208 = vmatprep.subr.bf16.mxu1 %v6207_v21  ;;  %v3730_v0 = vadd.f32 %v4919_v10, %v3729_v2  ;;  %v4952_v2 = vld [vmem:[%s7933_s7 + $0x148] sm:$0xff] }
0x1953   :  { %v6211_v33 = vpack.c.bf16 %v3735_v50, %v3730_v0  ;;  %v6231_v0 = vpack.c.bf16 %v4952_v2, %v4951_v44 }
0x1955   :  { %6232 = vmatprep.subr.bf16.mxu0 %v6231_v0 }
0x1956   :  { %6234 = vmatpush3.bf16.msra.mxu0 %v6231_v0 }
0x199a   :  { %v5723_v34 = vpop.f32.mrb[60].mxu0 }
0x199b   :  { %v3916_v28 = vmul.f32 0.125, %v5723_v34  ;;  %v3906_v14 = vpop.f32.mrb[61].mxu0  ;;  %v4220_v34 = vld [vmem:[#allocation7 + $0x148] sm:$0xff] }
0x199c   :  { %v3915_v16 = vmul.f32 0.125, %v3906_v14 }
0x199d   :  { %v3920_v26 = vsel %vm1702_vm3, %v3916_v28, -inf }
0x199e   :  { %3921 = vmax.xlane.f32.xlu1 %v3920_v26  ;;  %v3917_v4 = vsel %vm1702_vm3, %v3915_v16, -inf }
0x199f   :  { %3918 = vmax.xlane.f32.xlu0 %v3917_v4 }
0x19b0   :  { %v5745_v45 = vpop.f32.mrb[62].mxu0 }
0x19b1   :  { %v4104_v15 = vpop.f32.mrb[63].mxu0  ;;  %v4114_v6 = vmul.f32 0.125, %v5745_v45  ;;  %v4221_v45 = vld [vmem:[#allocation7 + $0x150] sm:$0xff] }
0x19b2   :  { %v4113_v23 = vmul.f32 0.125, %v4104_v15  ;;  %v4222_v15 = vld [vmem:[#allocation7 + $0x158] sm:$0xff] }
0x19b3   :  { %v4118_v25 = vsel %vm1702_vm3, %v4114_v6, -inf }
0x19b4   :  { %v4115_v61 = vsel %vm1702_vm3, %v4113_v23, -inf }
0x19b5   :  { %4116 = vmax.xlane.f32.xlu0 %v4115_v61  ;;  %v6219_v61 = vpack.c.bf16 %v4222_v15, %v4221_v45  ;;  %v4964_v45 = vld [vmem:[%s7936_s10 + $0x80] sm:$0xff]  ;;  %v4965_v15 = vld [vmem:[%s7936_s10 + $0x88] sm:$0xff] }
0x19b9   :  { %4119 = vmax.xlane.f32.xlu0 %v4118_v25  ;;  %v4223_v25 = vld [vmem:[#allocation7 + $0x160] sm:$0xff] }
0x1a2b   :  { %v3922_v36 = vpop.xlane.xlu1 %3921 }
0x1a2c   :  { %v3924_v1 = vsub.f32 %v3916_v28, %v3922_v36  ;;  %v3919_v31 = vpop.xlane.xlu0 %3918  ;;  %v6215_v28 = vpack.c.bf16 %v4220_v34, %v4219_v5  ;;  %v4224_v36 = vld [vmem:[#allocation7 + $0x168] sm:$0xff]  ;;  %v4955_v34 = vld [vmem:[%s7933_s7 + $0x160] sm:$0xff] }
0x1a2d   :  { %v3923_v12 = vsub.f32 %v3915_v16, %v3919_v31  ;;  %v4225_v31 = vld [vmem:[#allocation7 + $0x170] sm:$0xff] }
0x1a2e   :  { %v3927_v9 = vmul.f32 1.442695, %v3924_v1  ;;  %v6223_v1 = vpack.c.bf16 %v4224_v36, %v4223_v25  ;;  %v4968_v36 = vld [vmem:[%s7936_s10 + $0xa0] sm:$0xff] }
0x1a2f   :  { %v3925_v49 = vmul.f32 1.442695, %v3923_v12  ;;  %v4226_v12 = vld [vmem:[#allocation7 + $0x178] sm:$0xff] }
0x1a30   :  { %6380 = vpow2.f32 %v3927_v9  ;;  %v6227_v9 = vpack.c.bf16 %v4226_v12, %v4225_v31  ;;  %v4970_v12 = vld [vmem:[%s7936_s10 + $0xb0] sm:$0xff] }
0x1a31   :  { %6382 = vpow2.f32 %v3925_v49 }
0x1a3a   :  { %v6381_v47 = vpop.eup %6380 }
0x1a3b   :  { %v6383_v20 = vpop.eup %6382  ;;  %v3932_v7 = vsel %vm1702_vm3, %v6381_v47, 0.0 }
0x1a3c   :  { %3933 = vadd.xlane.f32.xlu1 %v3932_v7  ;;  %v3929_v18 = vsel %vm1702_vm3, %v6383_v20, 0.0 }
0x1a3d   :  { %3930 = vadd.xlane.f32.xlu0 %v3929_v18 }
0x1a42   :  { %v4117_v59 = vpop.xlane.xlu0 %4116 }
0x1a43   :  { %v4121_v62 = vsub.f32 %v4113_v23, %v4117_v59  ;;  %v4948_v59 = vld [vmem:[#allocation9 + $0x12] ss:$0 sm:$0xff] }
0x1a45   :  { %v4123_v52 = vmul.f32 1.442695, %v4121_v62 }
0x1a46   :  { %v4120_v13 = vpop.xlane.xlu0 %4119 }
0x1a47   :  { %6384 = vpow2.f32 %v4123_v52  ;;  %v4122_v40 = vsub.f32 %v4114_v6, %v4120_v13 }
0x1a49   :  { %v4125_v35 = vmul.f32 1.442695, %v4122_v40 }
0x1a4b   :  { %6386 = vpow2.f32 %v4125_v35 }
0x1a51   :  { %v6385_v58 = vpop.eup %6384 }
0x1a52   :  { %v4127_v54 = vsel %vm1702_vm3, %v6385_v58, 0.0 }
0x1a53   :  { %4128 = vadd.xlane.f32.xlu0 %v4127_v54 }
0x1a55   :  { %v6387_v43 = vpop.eup %6386 }
0x1a56   :  { %v4130_v30 = vsel %vm1702_vm3, %v6387_v43, 0.0 }
0x1a57   :  { %4131 = vadd.xlane.f32.xlu1 %v4130_v30 }
0x1ac9   :  { %v3934_v19 = vpop.xlane.xlu1 %3933 }
0x1aca   :  { %6388 = vrcp.f32 %v3934_v19  ;;  %v3931_v56 = vpop.xlane.xlu0 %3930 }
0x1acb   :  { %6390 = vrcp.f32 %v3931_v56 }
0x1ad4   :  { %v6389_v32 = vpop.eup %6388 }
0x1ad5   :  { %v6391_v29 = vpop.eup %6390  ;;  %v3938_v55 = vmul.f32 %v6389_v32, %v6381_v47  ;;  %v4953_v32 = vld [vmem:[%s7933_s7 + $0x150] sm:$0xff] }
0x1ad6   :  { %v3937_v63 = vmul.f32 %v6391_v29, %v6383_v20  ;;  %v4954_v29 = vld [vmem:[%s7933_s7 + $0x158] sm:$0xff] }
0x1ad8   :  { %5732 = vmatprep.mubr.msk.f32.mxu1 %vm1702_vm3, %v3937_v63 }
0x1ad9   :  { %5733 = vmatmul.mubr.msk.f32.vlgmr.msra.gmra.mrb[48].mxu1 %vm1702_vm3, %v3938_v55  ;;  %v6235_v55 = vpack.c.bf16 %v4954_v29, %v4953_v32 }
0x1ada   :  { %6210 = vmatpush3.bf16.msra.mxu1 %v6207_v21 }
0x1adb   :  { %6212 = vmatprep.subr.bf16.mxu1 %v6211_v33  ;;  %6236 = vmatprep.subr.bf16.mxu0 %v6235_v55 }
0x1adc   :  { %6238 = vmatpush3.bf16.msra.mxu0 %v6235_v55 }
0x1ade   :  { %6214 = vmatpush3.bf16.msra.mxu1 %v6211_v33 }
0x1adf   :  { %6216 = vmatprep.subr.bf16.mxu1 %v6215_v28 }
0x1ae0   :  { %v4129_v14 = vpop.xlane.xlu0 %4128 }
0x1ae1   :  { %6392 = vrcp.f32 %v4129_v14 }
0x1ae4   :  { %v4132_v16 = vpop.xlane.xlu1 %4131 }
0x1ae5   :  { %6394 = vrcp.f32 %v4132_v16  ;;  %v4957_v16 = vld [vmem:[%s7933_s7 + $0x170] sm:$0xff] }
0x1aeb   :  { %v6393_v26 = vpop.eup %6392 }
0x1aec   :  { %v4135_v4 = vmul.f32 %v6393_v26, %v6385_v58  ;;  %v4958_v26 = vld [vmem:[%s7933_s7 + $0x178] sm:$0xff] }
0x1aee   :  { %5754 = vmatprep.mubr.msk.f32.mxu1 %vm1702_vm3, %v4135_v4  ;;  %v6243_v4 = vpack.c.bf16 %v4958_v26, %v4957_v16 }
0x1aef   :  { %v6395_v23 = vpop.eup %6394 }
0x1af0   :  { %v4136_v6 = vmul.f32 %v6395_v23, %v6387_v43  ;;  %v4966_v23 = vld [vmem:[%s7936_s10 + $0x90] sm:$0xff] }
0x1af2   :  { %5755 = vmatmul.mubr.msk.f32.vlgmr.msra.gmra.mrb[50].mxu1 %vm1702_vm3, %v4136_v6  ;;  %v6247_v6 = vpack.c.bf16 %v4965_v15, %v4964_v45 }
0x1af3   :  { %6218 = vmatpush3.bf16.msra.mxu1 %v6215_v28  ;;  %v4956_v28 = vld [vmem:[%s7933_s7 + $0x168] sm:$0xff] }
0x1af4   :  { %6220 = vmatprep.subr.bf16.mxu1 %v6219_v61  ;;  %v6239_v14 = vpack.c.bf16 %v4956_v28, %v4955_v34  ;;  %v4979_v34 = vld [vmem:[%s7936_s10 + $0xf8] sm:$0xff] }
0x1af6   :  { %6240 = vmatprep.subr.bf16.mxu0 %v6239_v14 }
0x1af7   :  { %6222 = vmatpush3.bf16.msra.mxu1 %v6219_v61  ;;  %6242 = vmatpush3.bf16.msra.mxu0 %v6239_v14  ;;  %v4967_v61 = vld [vmem:[%s7936_s10 + $0x98] sm:$0xff] }
0x1af8   :  { %6224 = vmatprep.subr.bf16.mxu1 %v6223_v1  ;;  %6244 = vmatprep.subr.bf16.mxu0 %v6243_v4  ;;  %v6251_v25 = vpack.c.bf16 %v4967_v61, %v4966_v23 }
0x1afb   :  { %6226 = vmatpush3.bf16.msra.mxu1 %v6223_v1  ;;  %6246 = vmatpush3.bf16.msra.mxu0 %v6243_v4  ;;  %v4969_v1 = vld [vmem:[%s7936_s10 + $0xa8] sm:$0xff] }
0x1afc   :  { %6228 = vmatprep.subr.bf16.mxu1 %v6227_v9  ;;  %v6255_v31 = vpack.c.bf16 %v4969_v1, %v4968_v36 }
0x1aff   :  { %6230 = vmatpush3.bf16.msra.mxu1 %v6227_v9  ;;  %v4971_v9 = vld [vmem:[%s7936_s10 + $0xb8] sm:$0xff] }
0x1b00   :  { %6248 = vmatprep.subr.bf16.mxu1 %v6247_v6 }
0x1bac   :  { %v5734_v49 = vpop.f32.mrb[48].mxu1 }
0x1bad   :  { %v4011_v47 = vpop.f32.mrb[49].mxu1 }
0x1bae   :  { %5773 = vmatprep.mubr.msk.f32.mxu1 %vm148_vm0, %v4011_v47  ;;  %v4972_v47 = vld [vmem:[%s7936_s10 + $0xc0] sm:$0xff] }
0x1baf   :  { %5774 = vmatmul.mubr.msk.f32.vlgmr.msra.gmra.mrb[52].mxu1 %vm148_vm0, %v5734_v49  ;;  %v6259_v49 = vpack.c.bf16 %v4971_v9, %v4970_v12 }
0x1bb0   :  { %6250 = vmatpush3.bf16.msra.mxu1 %v6247_v6 }
0x1bb1   :  { %6252 = vmatprep.subr.bf16.mxu1 %v6251_v25 }
0x1bb4   :  { %6254 = vmatpush3.bf16.msra.mxu1 %v6251_v25 }
0x1bb5   :  { %6256 = vmatprep.subr.bf16.mxu1 %v6255_v31 }
0x1bb8   :  { %6258 = vmatpush3.bf16.msra.mxu1 %v6255_v31  ;;  %v4980_v31 = vld [vmem:[#allocation9 + $0x13] ss:$0 sm:$0xff] }
0x1bb9   :  { %6260 = vmatprep.subr.bf16.mxu1 %v6259_v49 }
0x1bbc   :  { %6262 = vmatpush3.bf16.msra.mxu1 %v6259_v49 }
0x1bc5   :  { %v5756_v20 = vpop.f32.mrb[50].mxu1 }
0x1bc6   :  { %v4209_v7 = vpop.f32.mrb[51].mxu1 }
0x1bc7   :  { %5776 = vmatprep.mubr.msk.f32.mxu1 %vm148_vm0, %v4209_v7 }
0x1bc8   :  { %5777 = vmatmul.mubr.msk.f32.gmra.mrb[54].mxu1 %vm148_vm0, %v5756_v20  ;;  %v4973_v20 = vld [vmem:[%s7936_s10 + $0xc8] sm:$0xff] }
0x1bc9   :  { %v6263_v7 = vpack.c.bf16 %v4973_v20, %v4972_v47 }
0x1bcb   :  { %6264 = vmatprep.subr.bf16.mxu1 %v6263_v7 }
0x1bcc   :  { %6266 = vmatpush3.bf16.msra.mxu1 %v6263_v7 }
0x1c82   :  { %v5775_v18 = vpop.f32.mrb[52].mxu1 }
0x1c83   :  { %v4325_v62 = vadd.f32 %v5775_v18, %v7592_v46  ;;  %v4305_v52 = vpop.f32.mrb[53].mxu1  ;;  %v4974_v18 = vld [vmem:[%s7936_s10 + $0xd0] sm:$0xff] }
0x1c84   :  { %v4324_v13 = vadd.f32 %v4305_v52, %v7594_v48  ;;  %v4976_v52 = vld [vmem:[%s7936_s10 + $0xe0] sm:$0xff] }
0x1c85   :  { %v7776_v40 = vadd.f32 %v4948_v59, %v4325_v62 }
0x1c86   :  { %v7778_v35 = vadd.f32 %v4948_v59, %v4324_v13  ;;  %v4977_v13 = vld [vmem:[%s7936_s10 + $0xe8] sm:$0xff] }
0x1c87   :  { %v4347_v37 = vsel %vm148_vm0, %v7776_v40, 0.0 }
0x1c88   :  { %4348 = vadd.xlane.f32.xlu1 %v4347_v37  ;;  %v4344_v10 = vsel %vm148_vm0, %v7778_v35, 0.0  ;;  %v6271_v37 = vpack.c.bf16 %v4977_v13, %v4976_v52 }
0x1c89   :  { %4345 = vadd.xlane.f32.xlu0 %v4344_v10 }
0x1c9b   :  { %v5778_v57 = vpop.f32.mrb[54].mxu1 }
0x1c9c   :  { %v4327_v38 = vadd.f32 %v5778_v57, %v7602_v3  ;;  %v4315_v39 = vpop.f32.mrb[55].mxu1 }
0x1c9d   :  { %v4326_v46 = vadd.f32 %v4315_v39, %v7604_v27 }
0x1c9e   :  { %v7786_v22 = vadd.f32 %v4948_v59, %v4327_v38 }
0x1c9f   :  { %v7788_v48 = vadd.f32 %v4948_v59, %v4326_v46  ;;  %v4975_v59 = vld [vmem:[%s7936_s10 + $0xd8] sm:$0xff] }
0x1ca0   :  { %v4353_v24 = vsel %vm148_vm0, %v7786_v22, 0.0  ;;  %v6267_v62 = vpack.c.bf16 %v4975_v59, %v4974_v18 }
0x1ca1   :  { %4354 = vadd.xlane.f32.xlu1 %v4353_v24  ;;  %v4350_v58 = vsel %vm148_vm0, %v7788_v48, 0.0 }
0x1ca2   :  { %4351 = vadd.xlane.f32.xlu0 %v4350_v58  ;;  %6268 = vmatprep.subr.bf16.mxu1 %v6267_v62 }
0x1ca3   :  { %6270 = vmatpush3.bf16.msra.mxu1 %v6267_v62 }
0x1ca4   :  { %6272 = vmatprep.subr.bf16.mxu1 %v6271_v37 }
0x1ca7   :  { %6274 = vmatpush3.bf16.msra.mxu1 %v6271_v37 }
0x1d15   :  { %v4349_v42 = vpop.xlane.xlu1 %4348 }
0x1d16   :  { %v4357_v54 = vmul.f32 0.015625, %v4349_v42  ;;  %v4346_v41 = vpop.xlane.xlu0 %4345  ;;  %v4949_v42 = vld [vmem:[#allocation9 + $0xe] ss:$0 sm:$0xff] }
0x1d17   :  { %v4356_v51 = vmul.f32 0.015625, %v4346_v41 }
0x1d18   :  { %v7795_v3 = vsub.f32 %v7776_v40, %v4357_v54 }
0x1d19   :  { %v7798_v27 = vsub.f32 %v7778_v35, %v4356_v51 }
0x1d1a   :  { %v4365_v53 = vmul.f32 %v7795_v3, %v7795_v3 }
0x1d1b   :  { %v4364_v43 = vmul.f32 %v7798_v27, %v7798_v27 }
0x1d1c   :  { %v4371_v30 = vsel %vm148_vm0, %v4365_v53, 0.0  ;;  %v4950_v53 = vld [vmem:[#allocation9 + $0xf] ss:$0 sm:$0xff] }
0x1d1d   :  { %4372 = vadd.xlane.f32.xlu1 %v4371_v30  ;;  %v4368_v60 = vsel %vm148_vm0, %v4364_v43, 0.0 }
0x1d1e   :  { %4369 = vadd.xlane.f32.xlu0 %v4368_v60 }
0x1d2e   :  { %v4355_v11 = vpop.xlane.xlu1 %4354 }
0x1d2f   :  { %v4359_v17 = vmul.f32 0.015625, %v4355_v11  ;;  %v4352_v8 = vpop.xlane.xlu0 %4351 }
0x1d30   :  { %v4358_v21 = vmul.f32 0.015625, %v4352_v8 }
0x1d31   :  { %v7813_v50 = vsub.f32 %v7786_v22, %v4359_v17 }
0x1d32   :  { %v7816_v33 = vsub.f32 %v7788_v48, %v4358_v21 }
0x1d33   :  { %v4367_v19 = vmul.f32 %v7813_v50, %v7813_v50 }
0x1d34   :  { %v4366_v56 = vmul.f32 %v7816_v33, %v7816_v33 }
0x1d35   :  { %v4377_v63 = vsel %vm148_vm0, %v4367_v19, 0.0 }
0x1d36   :  { %4378 = vadd.xlane.f32.xlu1 %v4377_v63  ;;  %v4374_v5 = vsel %vm148_vm0, %v4366_v56, 0.0 }
0x1d37   :  { %4375 = vadd.xlane.f32.xlu0 %v4374_v5  ;;  %v4978_v5 = vld [vmem:[%s7936_s10 + $0xf0] sm:$0xff] }
0x1d38   :  { %v6275_v28 = vpack.c.bf16 %v4979_v34, %v4978_v5 }
0x1d3a   :  { %6276 = vmatprep.subr.bf16.mxu1 %v6275_v28 }
0x1d3b   :  { %6278 = vmatpush3.bf16.msra.mxu1 %v6275_v28 }
0x1daa   :  { %v4373_v10 = vpop.xlane.xlu1 %4372 }
0x1dab   :  { %v4381_v57 = vmul.f32 0.015625, %v4373_v10  ;;  %v4370_v38 = vpop.xlane.xlu0 %4369 }
0x1dac   :  { %v4380_v39 = vmul.f32 0.015625, %v4370_v38 }
0x1dad   :  { %v4385_v46 = vadd.f32 1e-05, %v4381_v57 }
0x1dae   :  { %v4384_v24 = vadd.f32 1e-05, %v4380_v39 }
0x1daf   :  { %6396 = vrsqrt.f32 %v4385_v46 }
0x1db0   :  { %6398 = vrsqrt.f32 %v4384_v24 }
0x1db9   :  { %v6397_v58 = vpop.eup %6396 }
0x1dba   :  { %v6399_v54 = vpop.eup %6398  ;;  %v4393_v41 = vmul.f32 %v6397_v58, %v7795_v3 }
0x1dbb   :  { %v4392_v51 = vmul.f32 %v6399_v54, %v7798_v27 }
0x1dbc   :  { %v4403_v43 = vmul.f32 %v4949_v42, %v4393_v41 }
0x1dbd   :  { %v4402_v30 = vmul.f32 %v4949_v42, %v4392_v51 }
0x1dbe   :  { %v4413_v11 = vadd.f32 %v4950_v53, %v4403_v43 }
0x1dbf   :  { %v4412_v60 = vadd.f32 %v4950_v53, %v4402_v30 }
0x1dc1   :  { %5795 = vmatprep.mubr.msk.f32.mxu0 %vm148_vm0, %v4412_v60 }
0x1dc2   :  { %5796 = vmatmul.mubr.msk.f32.vlgmr.msra.gmra.mrb[64].mxu0 %vm148_vm0, %v4413_v11 }
0x1dc3   :  { %v4379_v17 = vpop.xlane.xlu1 %4378 }
0x1dc4   :  { %v4383_v8 = vmul.f32 0.015625, %v4379_v17  ;;  %v4376_v21 = vpop.xlane.xlu0 %4375 }
0x1dc5   :  { %v4382_v44 = vmul.f32 0.015625, %v4376_v21 }
0x1dc6   :  { %v4387_v2 = vadd.f32 1e-05, %v4383_v8 }
0x1dc7   :  { %v4386_v0 = vadd.f32 1e-05, %v4382_v44 }
0x1dc8   :  { %6400 = vrsqrt.f32 %v4387_v2 }
0x1dc9   :  { %6402 = vrsqrt.f32 %v4386_v0 }
0x1dd2   :  { %v6401_v3 = vpop.eup %6400 }
0x1dd3   :  { %v6403_v19 = vpop.eup %6402  ;;  %v4395_v27 = vmul.f32 %v6401_v3, %v7813_v50  ;;  %v4959_v50 = vld [vmem:[#allocation6 + $0x5] ss:$0 sm:$0xff] }
0x1dd4   :  { %v4394_v56 = vmul.f32 %v6403_v19, %v7816_v33 }
0x1dd5   :  { %v4405_v32 = vmul.f32 %v4949_v42, %v4395_v27 }
0x1dd6   :  { %v4404_v29 = vmul.f32 %v4949_v42, %v4394_v56 }
0x1dd7   :  { %v4415_v55 = vadd.f32 %v4950_v53, %v4405_v32  ;;  %v4981_v32 = vld [vmem:[#allocation9 + $0x14] ss:$0 sm:$0xff] }
0x1dd8   :  { %v4414_v63 = vadd.f32 %v4950_v53, %v4404_v29 }
0x1dda   :  { %5798 = vmatprep.mubr.msk.f32.mxu0 %vm148_vm0, %v4414_v63 }
0x1ddb   :  { %5799 = vmatmul.mubr.msk.f32.gmra.mrb[66].mxu0 %vm148_vm0, %v4415_v55  ;;  %v4982_v55 = vld [vmem:[#allocation9 + $0x15] ss:$0 sm:$0xff] }
0x1e95   :  { %v5797_v33 = vpop.f32.mrb[64].mxu0 }
0x1e96   :  { %v4517_v14 = vadd.f32 %v5797_v33, %v4959_v50  ;;  %v4511_v16 = vpop.f32.mrb[65].mxu0 }
0x1e97   :  { %v4512_v26 = vadd.f32 %v4959_v50, %v4511_v16 }
0x1e98   :  { %v4531_v45 = vmax.f32 %v4517_v14, 0.0 }
0x1e99   :  { %v4530_v4 = vmax.f32 %v4512_v26, 0.0 }
0x1e9b   :  { %5833 = vmatprep.mubr.f32.mxu1 %v4530_v4 }
0x1e9c   :  { %5834 = vmatmul.mubr.f32.vlgmr.msra.gmra.mrb[56].mxu1 %v4531_v45 }
0x1eae   :  { %v5800_v15 = vpop.f32.mrb[66].mxu0 }
0x1eaf   :  { %v4527_v23 = vadd.f32 %v5800_v15, %v4959_v50  ;;  %v4521_v6 = vpop.f32.mrb[67].mxu0 }
0x1eb0   :  { %v4522_v61 = vadd.f32 %v4959_v50, %v4521_v6 }
0x1eb1   :  { %v4533_v36 = vmax.f32 %v4527_v23, 0.0 }
0x1eb2   :  { %v4532_v25 = vmax.f32 %v4522_v61, 0.0 }
0x1eb4   :  { %5836 = vmatprep.mubr.f32.mxu1 %v4532_v25 }
0x1eb5   :  { %5837 = vmatmul.mubr.f32.gmra.mrb[58].mxu1 %v4533_v36 }
0x1f6f   :  { %v5835_v1 = vpop.f32.mrb[56].mxu1 }
0x1f70   :  { %v4637_v12 = vadd.f32 %v5835_v1, %v7776_v40  ;;  %v4617_v9 = vpop.f32.mrb[57].mxu1 }
0x1f71   :  { %v4636_v49 = vadd.f32 %v4617_v9, %v7778_v35 }
0x1f72   :  { %v4649_v47 = vadd.f32 %v4980_v31, %v4637_v12 }
0x1f73   :  { %v4648_v20 = vadd.f32 %v4980_v31, %v4636_v49 }
0x1f74   :  { %v4659_v7 = vsel %vm148_vm0, %v4649_v47, 0.0 }
0x1f75   :  { %4660 = vadd.xlane.f32.xlu1 %v4659_v7  ;;  %v4656_v18 = vsel %vm148_vm0, %v4648_v20, 0.0 }
0x1f76   :  { %4657 = vadd.xlane.f32.xlu0 %v4656_v18 }
0x1f88   :  { %v5838_v59 = vpop.f32.mrb[58].mxu1 }
0x1f89   :  { %v4639_v62 = vadd.f32 %v5838_v59, %v7786_v22  ;;  %v4627_v52 = vpop.f32.mrb[59].mxu1 }
0x1f8a   :  { %v4638_v13 = vadd.f32 %v4627_v52, %v7788_v48 }
0x1f8b   :  { %v4651_v37 = vadd.f32 %v4980_v31, %v4639_v62 }
0x1f8c   :  { %v4650_v10 = vadd.f32 %v4980_v31, %v4638_v13 }
0x1f8d   :  { %v4665_v40 = vsel %vm148_vm0, %v4651_v37, 0.0 }
0x1f8e   :  { %4666 = vadd.xlane.f32.xlu1 %v4665_v40  ;;  %v4662_v35 = vsel %vm148_vm0, %v4650_v10, 0.0 }
0x1f8f   :  { %4663 = vadd.xlane.f32.xlu0 %v4662_v35 }
0x2002   :  { %v4661_v57 = vpop.xlane.xlu1 %4660 }
0x2003   :  { %v4669_v38 = vmul.f32 0.015625, %v4661_v57  ;;  %v4658_v39 = vpop.xlane.xlu0 %4657 }
0x2004   :  { %v4668_v46 = vmul.f32 0.015625, %v4658_v39 }
0x2005   :  { %v4673_v24 = vsub.f32 %v4649_v47, %v4669_v38 }
0x2006   :  { %v4672_v58 = vsub.f32 %v4648_v20, %v4668_v46 }
0x2007   :  { %v4677_v42 = vmul.f32 %v4673_v24, %v4673_v24 }
0x2008   :  { %v4676_v54 = vmul.f32 %v4672_v58, %v4672_v58 }
0x2009   :  { %v4683_v22 = vsel %vm148_vm0, %v4677_v42, 0.0 }
0x200a   :  { %4684 = vadd.xlane.f32.xlu1 %v4683_v22  ;;  %v4680_v48 = vsel %vm148_vm0, %v4676_v54, 0.0 }
0x200b   :  { %4681 = vadd.xlane.f32.xlu0 %v4680_v48 }
0x201b   :  { %v4667_v41 = vpop.xlane.xlu1 %4666 }
0x201c   :  { %v4671_v51 = vmul.f32 0.015625, %v4667_v41  ;;  %v4664_v53 = vpop.xlane.xlu0 %4663 }
0x201d   :  { %v4670_v43 = vmul.f32 0.015625, %v4664_v53 }
0x201e   :  { %v4675_v30 = vsub.f32 %v4651_v37, %v4671_v51 }
0x201f   :  { %v4674_v60 = vsub.f32 %v4650_v10, %v4670_v43 }
0x2020   :  { %v4679_v11 = vmul.f32 %v4675_v30, %v4675_v30 }
0x2021   :  { %v4678_v17 = vmul.f32 %v4674_v60, %v4674_v60 }
0x2022   :  { %v4689_v8 = vsel %vm148_vm0, %v4679_v11, 0.0 }
0x2023   :  { %4690 = vadd.xlane.f32.xlu1 %v4689_v8  ;;  %v4686_v21 = vsel %vm148_vm0, %v4678_v17, 0.0 }
0x2024   :  { %4687 = vadd.xlane.f32.xlu0 %v4686_v21 }
0x2097   :  { %v4685_v44 = vpop.xlane.xlu1 %4684 }
0x2098   :  { %v4693_v2 = vmul.f32 0.015625, %v4685_v44  ;;  %v4682_v0 = vpop.xlane.xlu0 %4681 }
0x2099   :  { %v4692_v3 = vmul.f32 0.015625, %v4682_v0 }
0x209a   :  { %v4697_v19 = vadd.f32 1e-05, %v4693_v2 }
0x209b   :  { %v4696_v27 = vadd.f32 1e-05, %v4692_v3 }
0x209c   :  { %6404 = vrsqrt.f32 %v4697_v19 }
0x209d   :  { %6406 = vrsqrt.f32 %v4696_v27 }
0x20a6   :  { %v6405_v56 = vpop.eup %6404 }
0x20a7   :  { %v6407_v29 = vpop.eup %6406  ;;  %v4705_v63 = vmul.f32 %v6405_v56, %v4673_v24 }
0x20a8   :  { %v4704_v5 = vmul.f32 %v6407_v29, %v4672_v58 }
0x20a9   :  { %v4715_v34 = vmul.f32 %v4981_v32, %v4705_v63 }
0x20aa   :  { %v4714_v28 = vmul.f32 %v4981_v32, %v4704_v5 }
0x20ab   :  { %v4725_v50 = vadd.f32 %v4982_v55, %v4715_v34 }
0x20ac   :  { %v4724_v33 = vadd.f32 %v4982_v55, %v4714_v28 }
0x20ad   :  { %4729 = vst.msk [vmem:[%s7938_s12 + $0x8] sm:$0xff] %vm148_vm0, %v4725_v50 }
0x20ae   :  { %4728 = vst.msk [vmem:[%s7938_s12] sm:$0xff] %vm148_vm0, %v4724_v33 }
0x20b0   :  { %v4691_v14 = vpop.xlane.xlu1 %4690 }
0x20b1   :  { %v4695_v16 = vmul.f32 0.015625, %v4691_v14  ;;  %v4688_v26 = vpop.xlane.xlu0 %4687 }
0x20b2   :  { %v4694_v4 = vmul.f32 0.015625, %v4688_v26 }
0x20b3   :  { %v4699_v45 = vadd.f32 1e-05, %v4695_v16 }
0x20b4   :  { %v4698_v15 = vadd.f32 1e-05, %v4694_v4 }
0x20b5   :  { %6408 = vrsqrt.f32 %v4699_v45 }
0x20b6   :  { %6410 = vrsqrt.f32 %v4698_v15 }
0x20bf   :  { %v6409_v23 = vpop.eup %6408 }
0x20c0   :  { %v6411_v6 = vpop.eup %6410  ;;  %v4707_v61 = vmul.f32 %v6409_v23, %v4675_v30 }
0x20c1   :  { %v4706_v25 = vmul.f32 %v6411_v6, %v4674_v60 }
0x20c2   :  { %v4717_v36 = vmul.f32 %v4981_v32, %v4707_v61 }
0x20c3   :  { %v4716_v1 = vmul.f32 %v4981_v32, %v4706_v25 }
0x20c4   :  { %v4727_v31 = vadd.f32 %v4982_v55, %v4717_v36 }
0x20c5   :  { %v4726_v12 = vadd.f32 %v4982_v55, %v4716_v1 }
0x20c6   :  { %4731 = vst.msk [vmem:[%s7938_s12 + $0x18] sm:$0xff] %vm148_vm0, %v4727_v31 }
0x20c7   :  { %4730 = vst.msk [vmem:[%s7938_s12 + $0x10] sm:$0xff] %vm148_vm0, %v4726_v12 }
0x20c8   :  { %4736 = vsyncpa [#allocation3], 1 }
0x20c9   :  { %4737 = vsyncpa [#allocation5], 1 }
0x20ca   :  { %4738 = vsyncpa [#allocation8], 1 }

</bundles_post_ra>
